<compile_context>
chip_gen: v6e
topology: v6e:2x2x1
jax: 0.10.0
libtpu: 0.0.40
codegen_flags: <defaults>
</compile_context>

<pallas_src>
import jax
import jax.numpy as jnp
from jax import lax
from jax.experimental import pallas as pl
from jax.experimental.pallas import tpu as pltpu  # noqa: F401  (kept for the production TODO path)

# ----- synthetic config (Wav2Vec2ConformerConfig, small) -----
B = 2               # batch
T = 16              # sequence length
D = 64              # hidden_size
H = 4               # num_attention_heads
HEAD = D // H       # head_size = 16
I = 128             # intermediate_size
NUM_LAYERS = 2      # num_hidden_layers
K = 5               # conv_depthwise_kernel_size (odd)
PAD = (K - 1) // 2
ROPE_BASE = 10000.0 # rotary_embedding_base
EPS = 1e-5          # layer_norm_eps / batch-norm eps
NEG_INF = float(jnp.finfo(jnp.float32).min)
BT = B * T
BD = B * D

# IMPORTANT: the reference eager_attention_forward does torch.matmul(query, key) with NO key
# transpose and divides by scaling (= head_size**-0.5).  That contraction is only shape valid
# when seq_len == head_size; this kernel reproduces the literal reference semantics.
assert T == HEAD, "reference eager attention requires seq_len == head_size"
assert D % T == 0

# packed per-layer (NV, D) vector rows
(V_FFN1_LN_G, V_FFN1_LN_B, V_FFN1_B2,
 V_ATTN_LN_G, V_ATTN_LN_B, V_BO,
 V_CONV_LN_G, V_CONV_LN_B, V_BN_SCALE, V_BN_SHIFT,
 V_FFN2_LN_G, V_FFN2_LN_B, V_FFN2_B2,
 V_FIN_LN_G, V_FIN_LN_B) = range(15)
NV = 15


# -------------------- in-kernel math helpers --------------------
def _layer_norm(x, g, b):
    mu = jnp.mean(x, axis=-1, keepdims=True)
    var = jnp.mean((x - mu) ** 2, axis=-1, keepdims=True)
    return (x - mu) * lax.rsqrt(var + EPS) * g + b


def _silu(x):  # hidden_act == "swish"
    return x * jax.nn.sigmoid(x)


def _mm(x, w):
    # bf16 MXU operands, f32 accumulation (weights are stored bf16).
    return jnp.dot(x.astype(jnp.bfloat16), w, preferred_element_type=jnp.float32)


# -------------------- fused whole-encoder kernel (no grid) --------------------
def encoder_kernel(x_ref, cos_ref, sin_ref, bias_ref, qmask_ref, kvrep_ref,
                   hmask_ref, tapmask_ref, encln_ref,
                   wqkv_ref, bqkv_ref, wo_ref,
                   f1w1_ref, f1w2_ref, f2w1_ref, f2w2_ref,
                   pw1a_ref, pw1b_ref, pw2_ref, dw_ref, vecd_ref, veci_ref,
                   out_ref):
    # constants: loaded once, reused by every (unrolled) layer -- nothing rebuilt per layer
    cosf = cos_ref[...]          # (BT, D)  f32 rotary cos, tiled per head
    sinf = sin_ref[...]          # (BT, D)  f32 rotary sin
    bias = bias_ref[...]         # (BT, D)  f32 additive padding mask (tiled per head)
    qmask = qmask_ref[...]       # (BT, BD) bf16 batch block mask
    kvrep = kvrep_ref[...]       # (BD, BT) bf16 K/V row replication matrix
    hmask = hmask_ref[...]       # (BD, D)  bf16 head block-diagonal mask
    tapmask = tapmask_ref[...]   # (BT, K)  f32 depthwise-conv boundary masks
    encln = encln_ref[...]       # (2, D)   f32 encoder-level LayerNorm gamma/beta

    def ffn(h, g, b, w1, b1, w2, b2):
        h = _layer_norm(h, g, b)
        h = _silu(_mm(h, w1) + b1)          # intermediate dense + swish
        return _mm(h, w2) + b2              # output dense (dropouts identity at eval)

    def conformer_layer(x, l):
        vec = vecd_ref[l]                   # (NV, D) f32 packed per-layer vectors
        vrow = lambda i: vec[i:i + 1, :]    # (1, D)
        veci = veci_ref[l]                  # (2, I)  packed FFN intermediate biases

        # ---- FFN1 (half-step residual) ----
        x = x + 0.5 * ffn(x, vrow(V_FFN1_LN_G), vrow(V_FFN1_LN_B),
                          f1w1_ref[l], veci[0:1, :], f1w2_ref[l], vrow(V_FFN1_B2))

        # ---- self attention with rotary position embeddings ----
        res = x
        h = _layer_norm(x, vrow(V_ATTN_LN_G), vrow(V_ATTN_LN_B))
        # fused projection: [Wq*s, rot(Wq)*s, Wk, rot(Wk), Wv] (rotate_half + 1/scaling folded
        # into the weights in the wrapper) -> one 320-lane-wide matmul
        qkv = _mm(h, wqkv_ref[l]) + bqkv_ref[l]                       # (BT, 5D) f32
        q = qkv[:, 0 * D:1 * D] * cosf + qkv[:, 1 * D:2 * D] * sinf   # scaled q_embed
        k = qkv[:, 2 * D:3 * D] * cosf + qkv[:, 3 * D:4 * D] * sinf   # k_embed
        v = qkv[:, 4 * D:5 * D]

        # batch + head folding: q tiled over batch blocks (zeroed off-batch), K/V replicated
        # per head into (BD, D) block-diagonal operands (0/1 masks applied in bf16 = exact).
        qw = jnp.concatenate([q] * B, axis=1).astype(jnp.bfloat16) * qmask        # (BT, BD)
        kbig = jnp.dot(kvrep, k.astype(jnp.bfloat16),
                       preferred_element_type=jnp.float32).astype(jnp.bfloat16) * hmask
        vbig = jnp.dot(kvrep, v.astype(jnp.bfloat16),
                       preferred_element_type=jnp.float32).astype(jnp.bfloat16) * hmask

        # literal reference: matmul(query, key) (no transpose) / scaling, all batches/heads at
        # once in a single lane-dense (BT, BD) x (BD, D) bf16 matmul.
        scores = jnp.dot(qw, kbig, preferred_element_type=jnp.float32) + bias     # (BT, D)
        rowmax = jnp.max(scores, axis=-1, keepdims=True)
        p = jnp.exp(scores - rowmax)
        # exact f32 per-head-block softmax (segment sums, no MXU, no approx reciprocal)
        probs = jnp.concatenate(
            [p[:, hh * HEAD:(hh + 1) * HEAD] /
             (jnp.sum(p[:, hh * HEAD:(hh + 1) * HEAD], axis=-1, keepdims=True) + 1e-30)
             for hh in range(H)], axis=1)
        pw = jnp.concatenate([probs] * B, axis=1).astype(jnp.bfloat16) * qmask
        attn = jnp.dot(pw, vbig, preferred_element_type=jnp.float32)              # (BT, D)
        attn = _mm(attn, wo_ref[l]) + vrow(V_BO)          # linear_out
        x = res + attn                                    # attn dropout identity (eval)

        # ---- convolution module ----
        res = x
        h = _layer_norm(x, vrow(V_CONV_LN_G), vrow(V_CONV_LN_B))
        val = _mm(h, pw1a_ref[l])                         # pointwise conv1, value half
        gate = _mm(h, pw1b_ref[l])                        # pointwise conv1, gate half
        h = val * jax.nn.sigmoid(gate)                    # GLU (sigmoid only on gate lanes)
        # depthwise conv over time ('same' zero padding, per sequence): sublane shifts with
        # precomputed boundary masks -- pure VPU FMAs, no MXU, no in-kernel mask construction.
        dw = dw_ref[l]                                    # (K, D) f32
        acc = h * dw[PAD:PAD + 1, :]                      # center tap
        for kk in range(K):
            s = kk - PAD
            if s == 0:
                continue
            shifted = jnp.roll(h, -s, axis=0) * tapmask[:, kk:kk + 1]
            acc = acc + shifted * dw[kk:kk + 1, :]
        # eval-mode batch norm pre-folded to scale/shift, then swish
        h = _silu(acc * vrow(V_BN_SCALE) + vrow(V_BN_SHIFT))
        h = _mm(h, pw2_ref[l])                            # pointwise conv2, no bias
        x = res + h

        # ---- FFN2 (half-step residual) + per-layer final layer norm ----
        x = x + 0.5 * ffn(x, vrow(V_FFN2_LN_G), vrow(V_FFN2_LN_B),
                          f2w1_ref[l], veci[1:2, :], f2w2_ref[l], vrow(V_FFN2_B2))
        return _layer_norm(x, vrow(V_FIN_LN_G), vrow(V_FIN_LN_B))

    x = x_ref[...]                                        # (BT, D) f32
    for l in range(NUM_LAYERS):                           # toy size: static unroll, all in VMEM
        x = conformer_layer(x, l)

    # encoder-level LayerNorm
    out_ref[...] = _layer_norm(x, encln[0:1, :], encln[1:2, :])


# -------------------- wrapper --------------------
def encoder_forward(hidden_states, attention_mask, position_ids, params):
    f32, bf16 = jnp.float32, jnp.bfloat16
    m = attention_mask.astype(f32)                                    # (B, T)
    x = (hidden_states * m[:, :, None]).reshape(BT, D)                # hidden_states[~mask] = 0

    # additive attention mask, literal reference: depends only on the key-position lane
    bias_bd = (1.0 - m) * NEG_INF                                     # (B, T)
    bias = jnp.tile(bias_bd[:, None, :], (1, T, H)).reshape(BT, D)

    # rotary position embeddings (default rope, attention_scaling == 1.0), tiled per head
    inv_freq = 1.0 / (ROPE_BASE ** (jnp.arange(0, HEAD, 2, dtype=f32) / HEAD))
    freqs = position_ids.astype(f32)[:, :, None] * inv_freq[None, None, :]
    emb = jnp.concatenate([freqs, freqs], axis=-1)                    # (B, T, HEAD)
    cosf = jnp.tile(jnp.cos(emb), (1, 1, H)).reshape(BT, D)
    sinf = jnp.tile(jnp.sin(emb), (1, 1, H)).reshape(BT, D)

    # compile-time-constant structure masks, hoisted out of the kernel (0/1 -> exact in bf16)
    r = jnp.arange(BT)
    c_bd = jnp.arange(BD)
    c_d = jnp.arange(D)
    qmask = (r[:, None] // T == c_bd[None, :] // D).astype(bf16)               # (BT, BD)
    kvrep = ((c_bd[:, None] // D == r[None, :] // T) &
             (c_bd[:, None] % T == r[None, :] % T)).astype(bf16)               # (BD, BT)
    hmask = ((c_bd[:, None] % D) // T == c_d[None, :] // HEAD).astype(bf16)    # (BD, D)
    offs = jnp.arange(K) - PAD
    tpos = r % T
    tapmask = ((tpos[:, None] + offs[None, :] >= 0) &
               (tpos[:, None] + offs[None, :] <= T - 1)).astype(f32)           # (BT, K)

    encln = jnp.concatenate([params["ln_g"], params["ln_b"]], axis=0)          # (2, D)

    args = (x, cosf, sinf, bias, qmask, kvrep, hmask, tapmask, encln) + params["stacked"]

    # Grid-less pallas_call: every operand is a whole-array VMEM block (tiny shapes).
    out = pl.pallas_call(
        encoder_kernel,
        out_shape=jax.ShapeDtypeStruct((BT, D), f32),
    )(*args)
    return out.reshape(B, T, D)


# -------------------- parameter init & packing --------------------
def _init_layer(key):
    ks = jax.random.split(key, 19)
    lin = lambda k, din, dout: jax.random.normal(k, (din, dout), jnp.float32) * 0.05
    vec = lambda k, d: jax.random.normal(k, (1, d), jnp.float32) * 0.05
    ones = lambda d: jnp.ones((1, d), jnp.float32)
    zeros = lambda d: jnp.zeros((1, d), jnp.float32)
    return dict(
        ffn1_ln_g=ones(D), ffn1_ln_b=zeros(D),
        ffn1_w1=lin(ks[0], D, I), ffn1_b1=vec(ks[1], I),
        ffn1_w2=lin(ks[2], I, D), ffn1_b2=vec(ks[3], D),
        attn_ln_g=ones(D), attn_ln_b=zeros(D),
        wq=lin(ks[4], D, D), bq=vec(ks[5], D),
        wk=lin(ks[6], D, D), bk=vec(ks[7], D),
        wv=lin(ks[8], D, D), bv=vec(ks[9], D),
        wo=lin(ks[10], D, D), bo=vec(ks[11], D),
        conv_ln_g=ones(D), conv_ln_b=zeros(D),
        pw1_w=lin(ks[12], D, 2 * D),
        dw_w=jax.random.normal(ks[13], (K, D), jnp.float32) * 0.1,
        bn_g=ones(D), bn_b=zeros(D), bn_mean=zeros(D), bn_var=ones(D),
        pw2_w=lin(ks[14], D, D),
        ffn2_ln_g=ones(D), ffn2_ln_b=zeros(D),
        ffn2_w1=lin(ks[15], D, I), ffn2_b1=vec(ks[16], I),
        ffn2_w2=lin(ks[17], I, D), ffn2_b2=vec(ks[18], D),
        fin_ln_g=ones(D), fin_ln_b=zeros(D),
    )


def _rotate_cols(w):
    # rotate_half applied to the per-head output features (columns) of a projection.
    wr = w.reshape(w.shape[0], H, HEAD)
    wr = jnp.concatenate([-wr[..., HEAD // 2:], wr[..., :HEAD // 2]], axis=-1)
    return wr.reshape(w.shape[0], H * HEAD)


def _pack_params(layers):
    bf16 = jnp.bfloat16
    inv_scaling = HEAD ** 0.5   # reference divides scores by scaling = head_size**-0.5

    def one(p):
        wq_s, bq_s = p["wq"] * inv_scaling, p["bq"] * inv_scaling
        w_qkv5 = jnp.concatenate(
            [wq_s, _rotate_cols(wq_s), p["wk"], _rotate_cols(p["wk"]), p["wv"]], axis=1)
        b_qkv5 = jnp.concatenate(
            [bq_s, _rotate_cols(bq_s), p["bk"], _rotate_cols(p["bk"]), p["bv"]], axis=1)
        bn_scale = p["bn_g"] * lax.rsqrt(p["bn_var"] + EPS)
        bn_shift = p["bn_b"] - p["bn_mean"] * bn_scale
        vecd = jnp.concatenate([
            p["ffn1_ln_g"], p["ffn1_ln_b"], p["ffn1_b2"],
            p["attn_ln_g"], p["attn_ln_b"], p["bo"],
            p["conv_ln_g"], p["conv_ln_b"], bn_scale, bn_shift,
            p["ffn2_ln_g"], p["ffn2_ln_b"], p["ffn2_b2"],
            p["fin_ln_g"], p["fin_ln_b"]], axis=0)                    # (NV, D)
        veci = jnp.concatenate([p["ffn1_b1"], p["ffn2_b1"]], axis=0)  # (2, I)
        return (w_qkv5.astype(bf16), b_qkv5, p["wo"].astype(bf16),
                p["ffn1_w1"].astype(bf16), p["ffn1_w2"].astype(bf16),
                p["ffn2_w1"].astype(bf16), p["ffn2_w2"].astype(bf16),
                p["pw1_w"][:, :D].astype(bf16),     # GLU value half
                p["pw1_w"][:, D:].astype(bf16),     # GLU gate half
                p["pw2_w"].astype(bf16),
                p["dw_w"], vecd, veci)

    per_layer = [one(p) for p in layers]
    n = len(per_layer[0])
    return tuple(jnp.stack([lp[i] for lp in per_layer], axis=0) for i in range(n))


# -------------------- main --------------------
if __name__ == "__main__":
    key = jax.random.PRNGKey(0)
    k_x, k_p = jax.random.split(key)

    hidden_states = jax.random.normal(k_x, (B, T, D), jnp.float32)
    # last two time steps of every sequence are padding
    attention_mask = jnp.concatenate(
        [jnp.ones((B, T - 2), jnp.int32), jnp.zeros((B, 2), jnp.int32)], axis=-1)
    position_ids = jnp.broadcast_to(jnp.arange(T, dtype=jnp.int32)[None, :], (B, T))

    # TODO(synk): LayerDrop / dropout / gradient checkpointing / output_attentions are
    # training- or introspection-only and are skipped (eval forward only).
    layer_keys = jax.random.split(k_p, NUM_LAYERS)
    params = {
        "stacked": _pack_params([_init_layer(k) for k in layer_keys]),
        "ln_g": jnp.ones((1, D), jnp.float32),   # encoder.layer_norm
        "ln_b": jnp.zeros((1, D), jnp.float32),
    }

    out = encoder_forward(hidden_states, attention_mask, position_ids, params)
    out = jax.block_until_ready(out)

    assert out.shape == (B, T, D)
    assert bool(jnp.all(jnp.isfinite(out)))
    print("KERNEL_OK")
</pallas_src>

<mosaic_0001>
module attributes {stable_mosaic.version = 11 : i64} {
  func.func @encoder_kernel(%arg0: memref<32x64xf32, #tpu.memory_space<vmem>>, %arg1: memref<32x64xf32, #tpu.memory_space<vmem>>, %arg2: memref<32x64xf32, #tpu.memory_space<vmem>>, %arg3: memref<32x64xf32, #tpu.memory_space<vmem>>, %arg4: memref<32x128xbf16, #tpu.memory_space<vmem>>, %arg5: memref<128x32xbf16, #tpu.memory_space<vmem>>, %arg6: memref<128x64xbf16, #tpu.memory_space<vmem>>, %arg7: memref<32x5xf32, #tpu.memory_space<vmem>>, %arg8: memref<2x64xf32, #tpu.memory_space<vmem>>, %arg9: memref<2x64x320xbf16, #tpu.memory_space<vmem>>, %arg10: memref<2x1x320xf32, #tpu.memory_space<vmem>>, %arg11: memref<2x64x64xbf16, #tpu.memory_space<vmem>>, %arg12: memref<2x64x128xbf16, #tpu.memory_space<vmem>>, %arg13: memref<2x128x64xbf16, #tpu.memory_space<vmem>>, %arg14: memref<2x64x128xbf16, #tpu.memory_space<vmem>>, %arg15: memref<2x128x64xbf16, #tpu.memory_space<vmem>>, %arg16: memref<2x64x64xbf16, #tpu.memory_space<vmem>>, %arg17: memref<2x64x64xbf16, #tpu.memory_space<vmem>>, %arg18: memref<2x64x64xbf16, #tpu.memory_space<vmem>>, %arg19: memref<2x5x64xf32, #tpu.memory_space<vmem>>, %arg20: memref<2x15x64xf32, #tpu.memory_space<vmem>>, %arg21: memref<2x2x128xf32, #tpu.memory_space<vmem>>, %arg22: memref<32x64xf32, #tpu.memory_space<vmem>>) attributes {dimension_semantics = [], scalar_prefetch = 0 : i64, scratch_operands = 0 : i64, tpu.core_type = #tpu.core_type<tc>} {
    %c0 = arith.constant 0 : index
    %c0_0 = arith.constant 0 : index
    %0 = vector.load %arg1[%c0, %c0_0] : memref<32x64xf32, #tpu.memory_space<vmem>>, vector<32x64xf32>
    %c0_1 = arith.constant 0 : index
    %c0_2 = arith.constant 0 : index
    %1 = vector.load %arg2[%c0_1, %c0_2] : memref<32x64xf32, #tpu.memory_space<vmem>>, vector<32x64xf32>
    %c0_3 = arith.constant 0 : index
    %c0_4 = arith.constant 0 : index
    %2 = vector.load %arg3[%c0_3, %c0_4] : memref<32x64xf32, #tpu.memory_space<vmem>>, vector<32x64xf32>
    %c0_5 = arith.constant 0 : index
    %c0_6 = arith.constant 0 : index
    %3 = vector.load %arg4[%c0_5, %c0_6] : memref<32x128xbf16, #tpu.memory_space<vmem>>, vector<32x128xbf16>
    %c0_7 = arith.constant 0 : index
    %c0_8 = arith.constant 0 : index
    %4 = vector.load %arg5[%c0_7, %c0_8] : memref<128x32xbf16, #tpu.memory_space<vmem>>, vector<128x32xbf16>
    %c0_9 = arith.constant 0 : index
    %c0_10 = arith.constant 0 : index
    %5 = vector.load %arg6[%c0_9, %c0_10] : memref<128x64xbf16, #tpu.memory_space<vmem>>, vector<128x64xbf16>
    %c0_11 = arith.constant 0 : index
    %c0_12 = arith.constant 0 : index
    %6 = vector.load %arg7[%c0_11, %c0_12] : memref<32x5xf32, #tpu.memory_space<vmem>>, vector<32x5xf32>
    %c0_13 = arith.constant 0 : index
    %c0_14 = arith.constant 0 : index
    %7 = vector.load %arg8[%c0_13, %c0_14] : memref<2x64xf32, #tpu.memory_space<vmem>>, vector<2x64xf32>
    %c0_15 = arith.constant 0 : index
    %c0_16 = arith.constant 0 : index
    %8 = vector.load %arg0[%c0_15, %c0_16] : memref<32x64xf32, #tpu.memory_space<vmem>>, vector<32x64xf32>
    %c0_17 = arith.constant 0 : index
    %c0_18 = arith.constant 0 : index
    %c0_19 = arith.constant 0 : index
    %9 = vector.load %arg20[%c0_17, %c0_18, %c0_19] : memref<2x15x64xf32, #tpu.memory_space<vmem>>, vector<1x15x64xf32>
    %10 = vector.shape_cast %9 : vector<1x15x64xf32> to vector<15x64xf32>
    %c0_20 = arith.constant 0 : index
    %c0_21 = arith.constant 0 : index
    %c0_22 = arith.constant 0 : index
    %11 = vector.load %arg21[%c0_20, %c0_21, %c0_22] : memref<2x2x128xf32, #tpu.memory_space<vmem>>, vector<1x2x128xf32>
    %12 = vector.shape_cast %11 : vector<1x2x128xf32> to vector<2x128xf32>
    %13 = vector.extract_strided_slice %10 {offsets = [0, 0], sizes = [1, 64], strides = [1, 1]} : vector<15x64xf32> to vector<1x64xf32>
    %14 = vector.extract_strided_slice %10 {offsets = [1, 0], sizes = [1, 64], strides = [1, 1]} : vector<15x64xf32> to vector<1x64xf32>
    %c0_23 = arith.constant 0 : index
    %c0_24 = arith.constant 0 : index
    %c0_25 = arith.constant 0 : index
    %15 = vector.load %arg12[%c0_23, %c0_24, %c0_25] : memref<2x64x128xbf16, #tpu.memory_space<vmem>>, vector<1x64x128xbf16>
    %16 = vector.shape_cast %15 : vector<1x64x128xbf16> to vector<64x128xbf16>
    %17 = vector.extract_strided_slice %12 {offsets = [0, 0], sizes = [1, 128], strides = [1, 1]} : vector<2x128xf32> to vector<1x128xf32>
    %c0_26 = arith.constant 0 : index
    %c0_27 = arith.constant 0 : index
    %c0_28 = arith.constant 0 : index
    %18 = vector.load %arg13[%c0_26, %c0_27, %c0_28] : memref<2x128x64xbf16, #tpu.memory_space<vmem>>, vector<1x128x64xbf16>
    %19 = vector.shape_cast %18 : vector<1x128x64xbf16> to vector<128x64xbf16>
    %20 = vector.extract_strided_slice %10 {offsets = [2, 0], sizes = [1, 64], strides = [1, 1]} : vector<15x64xf32> to vector<1x64xf32>
    %cst = arith.constant dense<0.000000e+00> : vector<32xf32>
    %21 = vector.multi_reduction <add>, %8, %cst [1] : vector<32x64xf32> to vector<32xf32>
    %22 = vector.shape_cast %21 : vector<32xf32> to vector<32x1xf32>
    %cst_29 = arith.constant 6.400000e+01 : f32
    %23 = vector.broadcast %cst_29 : f32 to vector<32x1xf32>
    %24 = arith.divf %22, %23 : vector<32x1xf32>
    %25 = vector.broadcast %24 : vector<32x1xf32> to vector<32x64xf32>
    %26 = arith.subf %8, %25 : vector<32x64xf32>
    %27 = arith.mulf %26, %26 : vector<32x64xf32>
    %cst_30 = arith.constant dense<0.000000e+00> : vector<32xf32>
    %28 = vector.multi_reduction <add>, %27, %cst_30 [1] : vector<32x64xf32> to vector<32xf32>
    %29 = vector.shape_cast %28 : vector<32xf32> to vector<32x1xf32>
    %cst_31 = arith.constant 6.400000e+01 : f32
    %30 = vector.broadcast %cst_31 : f32 to vector<32x1xf32>
    %31 = arith.divf %29, %30 : vector<32x1xf32>
    %32 = vector.broadcast %24 : vector<32x1xf32> to vector<32x64xf32>
    %33 = arith.subf %8, %32 : vector<32x64xf32>
    %cst_32 = arith.constant 9.99999974E-6 : f32
    %34 = vector.broadcast %cst_32 : f32 to vector<32x1xf32>
    %35 = arith.addf %31, %34 : vector<32x1xf32>
    %36 = math.rsqrt %35 : vector<32x1xf32>
    %37 = vector.broadcast %36 : vector<32x1xf32> to vector<32x64xf32>
    %38 = arith.mulf %33, %37 : vector<32x64xf32>
    %39 = vector.broadcast %13 : vector<1x64xf32> to vector<32x64xf32>
    %40 = arith.mulf %38, %39 : vector<32x64xf32>
    %41 = vector.broadcast %14 : vector<1x64xf32> to vector<32x64xf32>
    %42 = arith.addf %40, %41 : vector<32x64xf32>
    %43 = arith.truncf %42 : vector<32x64xf32> to vector<32x64xbf16>
    %cst_33 = arith.constant dense<0.000000e+00> : vector<32x128xf32>
    %44 = tpu.matmul %43, %16, %cst_33 {dimension_numbers = #tpu.dot_dimension_numbers<[1], [0], [0], [1], [0, 0, 1, 1], [], []>} : vector<32x64xbf16>, vector<64x128xbf16>, vector<32x128xf32> -> vector<32x128xf32>
    %45 = vector.broadcast %17 : vector<1x128xf32> to vector<32x128xf32>
    %46 = arith.addf %44, %45 : vector<32x128xf32>
    %47 = arith.negf %46 : vector<32x128xf32>
    %48 = math.exp %47 : vector<32x128xf32>
    %cst_34 = arith.constant 1.000000e+00 : f32
    %49 = vector.broadcast %cst_34 : f32 to vector<32x128xf32>
    %50 = arith.addf %49, %48 : vector<32x128xf32>
    %51 = arith.divf %49, %50 : vector<32x128xf32>
    %52 = arith.mulf %46, %51 : vector<32x128xf32>
    %53 = arith.truncf %52 : vector<32x128xf32> to vector<32x128xbf16>
    %cst_35 = arith.constant dense<0.000000e+00> : vector<32x64xf32>
    %54 = tpu.matmul %53, %19, %cst_35 {dimension_numbers = #tpu.dot_dimension_numbers<[1], [0], [0], [1], [0, 0, 1, 1], [], []>} : vector<32x128xbf16>, vector<128x64xbf16>, vector<32x64xf32> -> vector<32x64xf32>
    %55 = vector.broadcast %20 : vector<1x64xf32> to vector<32x64xf32>
    %56 = arith.addf %54, %55 : vector<32x64xf32>
    %cst_36 = arith.constant 5.000000e-01 : f32
    %57 = vector.broadcast %cst_36 : f32 to vector<32x64xf32>
    %58 = arith.mulf %57, %56 : vector<32x64xf32>
    %59 = arith.addf %8, %58 : vector<32x64xf32>
    %60 = vector.extract_strided_slice %10 {offsets = [3, 0], sizes = [1, 64], strides = [1, 1]} : vector<15x64xf32> to vector<1x64xf32>
    %61 = vector.extract_strided_slice %10 {offsets = [4, 0], sizes = [1, 64], strides = [1, 1]} : vector<15x64xf32> to vector<1x64xf32>
    %cst_37 = arith.constant dense<0.000000e+00> : vector<32xf32>
    %62 = vector.multi_reduction <add>, %59, %cst_37 [1] : vector<32x64xf32> to vector<32xf32>
    %63 = vector.shape_cast %62 : vector<32xf32> to vector<32x1xf32>
    %cst_38 = arith.constant 6.400000e+01 : f32
    %64 = vector.broadcast %cst_38 : f32 to vector<32x1xf32>
    %65 = arith.divf %63, %64 : vector<32x1xf32>
    %66 = vector.broadcast %65 : vector<32x1xf32> to vector<32x64xf32>
    %67 = arith.subf %59, %66 : vector<32x64xf32>
    %68 = arith.mulf %67, %67 : vector<32x64xf32>
    %cst_39 = arith.constant dense<0.000000e+00> : vector<32xf32>
    %69 = vector.multi_reduction <add>, %68, %cst_39 [1] : vector<32x64xf32> to vector<32xf32>
    %70 = vector.shape_cast %69 : vector<32xf32> to vector<32x1xf32>
    %cst_40 = arith.constant 6.400000e+01 : f32
    %71 = vector.broadcast %cst_40 : f32 to vector<32x1xf32>
    %72 = arith.divf %70, %71 : vector<32x1xf32>
    %73 = vector.broadcast %65 : vector<32x1xf32> to vector<32x64xf32>
    %74 = arith.subf %59, %73 : vector<32x64xf32>
    %cst_41 = arith.constant 9.99999974E-6 : f32
    %75 = vector.broadcast %cst_41 : f32 to vector<32x1xf32>
    %76 = arith.addf %72, %75 : vector<32x1xf32>
    %77 = math.rsqrt %76 : vector<32x1xf32>
    %78 = vector.broadcast %77 : vector<32x1xf32> to vector<32x64xf32>
    %79 = arith.mulf %74, %78 : vector<32x64xf32>
    %80 = vector.broadcast %60 : vector<1x64xf32> to vector<32x64xf32>
    %81 = arith.mulf %79, %80 : vector<32x64xf32>
    %82 = vector.broadcast %61 : vector<1x64xf32> to vector<32x64xf32>
    %83 = arith.addf %81, %82 : vector<32x64xf32>
    %c0_42 = arith.constant 0 : index
    %c0_43 = arith.constant 0 : index
    %c0_44 = arith.constant 0 : index
    %84 = vector.load %arg9[%c0_42, %c0_43, %c0_44] : memref<2x64x320xbf16, #tpu.memory_space<vmem>>, vector<1x64x320xbf16>
    %85 = vector.shape_cast %84 : vector<1x64x320xbf16> to vector<64x320xbf16>
    %86 = arith.truncf %83 : vector<32x64xf32> to vector<32x64xbf16>
    %cst_45 = arith.constant dense<0.000000e+00> : vector<32x320xf32>
    %87 = tpu.matmul %86, %85, %cst_45 {dimension_numbers = #tpu.dot_dimension_numbers<[1], [0], [0], [1], [0, 0, 1, 1], [], []>} : vector<32x64xbf16>, vector<64x320xbf16>, vector<32x320xf32> -> vector<32x320xf32>
    %c0_46 = arith.constant 0 : index
    %c0_47 = arith.constant 0 : index
    %c0_48 = arith.constant 0 : index
    %88 = vector.load %arg10[%c0_46, %c0_47, %c0_48] : memref<2x1x320xf32, #tpu.memory_space<vmem>>, vector<1x1x320xf32>
    %89 = vector.shape_cast %88 : vector<1x1x320xf32> to vector<1x320xf32>
    %90 = vector.broadcast %89 : vector<1x320xf32> to vector<32x320xf32>
    %91 = arith.addf %87, %90 : vector<32x320xf32>
    %92 = vector.extract_strided_slice %91 {offsets = [0, 0], sizes = [32, 64], strides = [1, 1]} : vector<32x320xf32> to vector<32x64xf32>
    %93 = arith.mulf %92, %0 : vector<32x64xf32>
    %94 = vector.extract_strided_slice %91 {offsets = [0, 64], sizes = [32, 64], strides = [1, 1]} : vector<32x320xf32> to vector<32x64xf32>
    %95 = arith.mulf %94, %1 : vector<32x64xf32>
    %96 = arith.addf %93, %95 : vector<32x64xf32>
    %97 = vector.extract_strided_slice %91 {offsets = [0, 128], sizes = [32, 64], strides = [1, 1]} : vector<32x320xf32> to vector<32x64xf32>
    %98 = arith.mulf %97, %0 : vector<32x64xf32>
    %99 = vector.extract_strided_slice %91 {offsets = [0, 192], sizes = [32, 64], strides = [1, 1]} : vector<32x320xf32> to vector<32x64xf32>
    %100 = arith.mulf %99, %1 : vector<32x64xf32>
    %101 = arith.addf %98, %100 : vector<32x64xf32>
    %102 = vector.extract_strided_slice %91 {offsets = [0, 256], sizes = [32, 64], strides = [1, 1]} : vector<32x320xf32> to vector<32x64xf32>
    %103 = tpu.concatenate %96, %96 in 1 : vector<32x64xf32>, vector<32x64xf32> -> vector<32x128xf32>
    %104 = arith.truncf %103 : vector<32x128xf32> to vector<32x128xbf16>
    %105 = arith.mulf %104, %3 : vector<32x128xbf16>
    %106 = arith.truncf %101 : vector<32x64xf32> to vector<32x64xbf16>
    %cst_49 = arith.constant dense<0.000000e+00> : vector<128x64xf32>
    %107 = tpu.matmul %4, %106, %cst_49 {dimension_numbers = #tpu.dot_dimension_numbers<[1], [0], [0], [1], [0, 0, 1, 1], [], []>} : vector<128x32xbf16>, vector<32x64xbf16>, vector<128x64xf32> -> vector<128x64xf32>
    %108 = arith.truncf %107 : vector<128x64xf32> to vector<128x64xbf16>
    %109 = arith.mulf %108, %5 : vector<128x64xbf16>
    %110 = arith.truncf %102 : vector<32x64xf32> to vector<32x64xbf16>
    %cst_50 = arith.constant dense<0.000000e+00> : vector<128x64xf32>
    %111 = tpu.matmul %4, %110, %cst_50 {dimension_numbers = #tpu.dot_dimension_numbers<[1], [0], [0], [1], [0, 0, 1, 1], [], []>} : vector<128x32xbf16>, vector<32x64xbf16>, vector<128x64xf32> -> vector<128x64xf32>
    %112 = arith.truncf %111 : vector<128x64xf32> to vector<128x64xbf16>
    %113 = arith.mulf %112, %5 : vector<128x64xbf16>
    %cst_51 = arith.constant dense<0.000000e+00> : vector<32x64xf32>
    %114 = tpu.matmul %105, %109, %cst_51 {dimension_numbers = #tpu.dot_dimension_numbers<[1], [0], [0], [1], [0, 0, 1, 1], [], []>} : vector<32x128xbf16>, vector<128x64xbf16>, vector<32x64xf32> -> vector<32x64xf32>
    %115 = arith.addf %114, %2 : vector<32x64xf32>
    %cst_52 = arith.constant dense<0xFF800000> : vector<32xf32>
    %116 = vector.multi_reduction <maximumf>, %115, %cst_52 [1] : vector<32x64xf32> to vector<32xf32>
    %117 = vector.shape_cast %116 : vector<32xf32> to vector<32x1xf32>
    %118 = vector.broadcast %117 : vector<32x1xf32> to vector<32x64xf32>
    %119 = arith.subf %115, %118 : vector<32x64xf32>
    %120 = math.exp %119 : vector<32x64xf32>
    %121 = vector.extract_strided_slice %120 {offsets = [0, 0], sizes = [32, 16], strides = [1, 1]} : vector<32x64xf32> to vector<32x16xf32>
    %122 = vector.extract_strided_slice %120 {offsets = [0, 0], sizes = [32, 16], strides = [1, 1]} : vector<32x64xf32> to vector<32x16xf32>
    %cst_53 = arith.constant dense<0.000000e+00> : vector<32xf32>
    %123 = vector.multi_reduction <add>, %122, %cst_53 [1] : vector<32x16xf32> to vector<32xf32>
    %124 = vector.shape_cast %123 : vector<32xf32> to vector<32x1xf32>
    %cst_54 = arith.constant 1.000000e-30 : f32
    %125 = vector.broadcast %cst_54 : f32 to vector<32x1xf32>
    %126 = arith.addf %124, %125 : vector<32x1xf32>
    %127 = vector.broadcast %126 : vector<32x1xf32> to vector<32x16xf32>
    %128 = arith.divf %121, %127 : vector<32x16xf32>
    %129 = vector.extract_strided_slice %120 {offsets = [0, 16], sizes = [32, 16], strides = [1, 1]} : vector<32x64xf32> to vector<32x16xf32>
    %130 = vector.extract_strided_slice %120 {offsets = [0, 16], sizes = [32, 16], strides = [1, 1]} : vector<32x64xf32> to vector<32x16xf32>
    %cst_55 = arith.constant dense<0.000000e+00> : vector<32xf32>
    %131 = vector.multi_reduction <add>, %130, %cst_55 [1] : vector<32x16xf32> to vector<32xf32>
    %132 = vector.shape_cast %131 : vector<32xf32> to vector<32x1xf32>
    %cst_56 = arith.constant 1.000000e-30 : f32
    %133 = vector.broadcast %cst_56 : f32 to vector<32x1xf32>
    %134 = arith.addf %132, %133 : vector<32x1xf32>
    %135 = vector.broadcast %134 : vector<32x1xf32> to vector<32x16xf32>
    %136 = arith.divf %129, %135 : vector<32x16xf32>
    %137 = vector.extract_strided_slice %120 {offsets = [0, 32], sizes = [32, 16], strides = [1, 1]} : vector<32x64xf32> to vector<32x16xf32>
    %138 = vector.extract_strided_slice %120 {offsets = [0, 32], sizes = [32, 16], strides = [1, 1]} : vector<32x64xf32> to vector<32x16xf32>
    %cst_57 = arith.constant dense<0.000000e+00> : vector<32xf32>
    %139 = vector.multi_reduction <add>, %138, %cst_57 [1] : vector<32x16xf32> to vector<32xf32>
    %140 = vector.shape_cast %139 : vector<32xf32> to vector<32x1xf32>
    %cst_58 = arith.constant 1.000000e-30 : f32
    %141 = vector.broadcast %cst_58 : f32 to vector<32x1xf32>
    %142 = arith.addf %140, %141 : vector<32x1xf32>
    %143 = vector.broadcast %142 : vector<32x1xf32> to vector<32x16xf32>
    %144 = arith.divf %137, %143 : vector<32x16xf32>
    %145 = vector.extract_strided_slice %120 {offsets = [0, 48], sizes = [32, 16], strides = [1, 1]} : vector<32x64xf32> to vector<32x16xf32>
    %146 = vector.extract_strided_slice %120 {offsets = [0, 48], sizes = [32, 16], strides = [1, 1]} : vector<32x64xf32> to vector<32x16xf32>
    %cst_59 = arith.constant dense<0.000000e+00> : vector<32xf32>
    %147 = vector.multi_reduction <add>, %146, %cst_59 [1] : vector<32x16xf32> to vector<32xf32>
    %148 = vector.shape_cast %147 : vector<32xf32> to vector<32x1xf32>
    %cst_60 = arith.constant 1.000000e-30 : f32
    %149 = vector.broadcast %cst_60 : f32 to vector<32x1xf32>
    %150 = arith.addf %148, %149 : vector<32x1xf32>
    %151 = vector.broadcast %150 : vector<32x1xf32> to vector<32x16xf32>
    %152 = arith.divf %145, %151 : vector<32x16xf32>
    %153 = tpu.concatenate %128, %136, %144, %152 in 1 : vector<32x16xf32>, vector<32x16xf32>, vector<32x16xf32>, vector<32x16xf32> -> vector<32x64xf32>
    %154 = tpu.concatenate %153, %153 in 1 : vector<32x64xf32>, vector<32x64xf32> -> vector<32x128xf32>
    %155 = arith.truncf %154 : vector<32x128xf32> to vector<32x128xbf16>
    %156 = arith.mulf %155, %3 : vector<32x128xbf16>
    %cst_61 = arith.constant dense<0.000000e+00> : vector<32x64xf32>
    %157 = tpu.matmul %156, %113, %cst_61 {dimension_numbers = #tpu.dot_dimension_numbers<[1], [0], [0], [1], [0, 0, 1, 1], [], []>} : vector<32x128xbf16>, vector<128x64xbf16>, vector<32x64xf32> -> vector<32x64xf32>
    %c0_62 = arith.constant 0 : index
    %c0_63 = arith.constant 0 : index
    %c0_64 = arith.constant 0 : index
    %158 = vector.load %arg11[%c0_62, %c0_63, %c0_64] : memref<2x64x64xbf16, #tpu.memory_space<vmem>>, vector<1x64x64xbf16>
    %159 = vector.shape_cast %158 : vector<1x64x64xbf16> to vector<64x64xbf16>
    %160 = arith.truncf %157 : vector<32x64xf32> to vector<32x64xbf16>
    %cst_65 = arith.constant dense<0.000000e+00> : vector<32x64xf32>
    %161 = tpu.matmul %160, %159, %cst_65 {dimension_numbers = #tpu.dot_dimension_numbers<[1], [0], [0], [1], [0, 0, 1, 1], [], []>} : vector<32x64xbf16>, vector<64x64xbf16>, vector<32x64xf32> -> vector<32x64xf32>
    %162 = vector.extract_strided_slice %10 {offsets = [5, 0], sizes = [1, 64], strides = [1, 1]} : vector<15x64xf32> to vector<1x64xf32>
    %163 = vector.broadcast %162 : vector<1x64xf32> to vector<32x64xf32>
    %164 = arith.addf %161, %163 : vector<32x64xf32>
    %165 = arith.addf %59, %164 : vector<32x64xf32>
    %166 = vector.extract_strided_slice %10 {offsets = [6, 0], sizes = [1, 64], strides = [1, 1]} : vector<15x64xf32> to vector<1x64xf32>
    %167 = vector.extract_strided_slice %10 {offsets = [7, 0], sizes = [1, 64], strides = [1, 1]} : vector<15x64xf32> to vector<1x64xf32>
    %cst_66 = arith.constant dense<0.000000e+00> : vector<32xf32>
    %168 = vector.multi_reduction <add>, %165, %cst_66 [1] : vector<32x64xf32> to vector<32xf32>
    %169 = vector.shape_cast %168 : vector<32xf32> to vector<32x1xf32>
    %cst_67 = arith.constant 6.400000e+01 : f32
    %170 = vector.broadcast %cst_67 : f32 to vector<32x1xf32>
    %171 = arith.divf %169, %170 : vector<32x1xf32>
    %172 = vector.broadcast %171 : vector<32x1xf32> to vector<32x64xf32>
    %173 = arith.subf %165, %172 : vector<32x64xf32>
    %174 = arith.mulf %173, %173 : vector<32x64xf32>
    %cst_68 = arith.constant dense<0.000000e+00> : vector<32xf32>
    %175 = vector.multi_reduction <add>, %174, %cst_68 [1] : vector<32x64xf32> to vector<32xf32>
    %176 = vector.shape_cast %175 : vector<32xf32> to vector<32x1xf32>
    %cst_69 = arith.constant 6.400000e+01 : f32
    %177 = vector.broadcast %cst_69 : f32 to vector<32x1xf32>
    %178 = arith.divf %176, %177 : vector<32x1xf32>
    %179 = vector.broadcast %171 : vector<32x1xf32> to vector<32x64xf32>
    %180 = arith.subf %165, %179 : vector<32x64xf32>
    %cst_70 = arith.constant 9.99999974E-6 : f32
    %181 = vector.broadcast %cst_70 : f32 to vector<32x1xf32>
    %182 = arith.addf %178, %181 : vector<32x1xf32>
    %183 = math.rsqrt %182 : vector<32x1xf32>
    %184 = vector.broadcast %183 : vector<32x1xf32> to vector<32x64xf32>
    %185 = arith.mulf %180, %184 : vector<32x64xf32>
    %186 = vector.broadcast %166 : vector<1x64xf32> to vector<32x64xf32>
    %187 = arith.mulf %185, %186 : vector<32x64xf32>
    %188 = vector.broadcast %167 : vector<1x64xf32> to vector<32x64xf32>
    %189 = arith.addf %187, %188 : vector<32x64xf32>
    %c0_71 = arith.constant 0 : index
    %c0_72 = arith.constant 0 : index
    %c0_73 = arith.constant 0 : index
    %190 = vector.load %arg16[%c0_71, %c0_72, %c0_73] : memref<2x64x64xbf16, #tpu.memory_space<vmem>>, vector<1x64x64xbf16>
    %191 = vector.shape_cast %190 : vector<1x64x64xbf16> to vector<64x64xbf16>
    %192 = arith.truncf %189 : vector<32x64xf32> to vector<32x64xbf16>
    %cst_74 = arith.constant dense<0.000000e+00> : vector<32x64xf32>
    %193 = tpu.matmul %192, %191, %cst_74 {dimension_numbers = #tpu.dot_dimension_numbers<[1], [0], [0], [1], [0, 0, 1, 1], [], []>} : vector<32x64xbf16>, vector<64x64xbf16>, vector<32x64xf32> -> vector<32x64xf32>
    %c0_75 = arith.constant 0 : index
    %c0_76 = arith.constant 0 : index
    %c0_77 = arith.constant 0 : index
    %194 = vector.load %arg17[%c0_75, %c0_76, %c0_77] : memref<2x64x64xbf16, #tpu.memory_space<vmem>>, vector<1x64x64xbf16>
    %195 = vector.shape_cast %194 : vector<1x64x64xbf16> to vector<64x64xbf16>
    %196 = arith.truncf %189 : vector<32x64xf32> to vector<32x64xbf16>
    %cst_78 = arith.constant dense<0.000000e+00> : vector<32x64xf32>
    %197 = tpu.matmul %196, %195, %cst_78 {dimension_numbers = #tpu.dot_dimension_numbers<[1], [0], [0], [1], [0, 0, 1, 1], [], []>} : vector<32x64xbf16>, vector<64x64xbf16>, vector<32x64xf32> -> vector<32x64xf32>
    %198 = arith.negf %197 : vector<32x64xf32>
    %199 = math.exp %198 : vector<32x64xf32>
    %cst_79 = arith.constant 1.000000e+00 : f32
    %200 = vector.broadcast %cst_79 : f32 to vector<32x64xf32>
    %201 = arith.addf %200, %199 : vector<32x64xf32>
    %202 = arith.divf %200, %201 : vector<32x64xf32>
    %203 = arith.mulf %193, %202 : vector<32x64xf32>
    %c0_80 = arith.constant 0 : index
    %c0_81 = arith.constant 0 : index
    %c0_82 = arith.constant 0 : index
    %204 = vector.load %arg19[%c0_80, %c0_81, %c0_82] : memref<2x5x64xf32, #tpu.memory_space<vmem>>, vector<1x5x64xf32>
    %205 = vector.shape_cast %204 : vector<1x5x64xf32> to vector<5x64xf32>
    %206 = vector.extract_strided_slice %205 {offsets = [2, 0], sizes = [1, 64], strides = [1, 1]} : vector<5x64xf32> to vector<1x64xf32>
    %207 = vector.broadcast %206 : vector<1x64xf32> to vector<32x64xf32>
    %208 = arith.mulf %203, %207 : vector<32x64xf32>
    %209 = vector.extract_strided_slice %203 {offsets = [30, 0], sizes = [2, 64], strides = [1, 1]} : vector<32x64xf32> to vector<2x64xf32>
    %210 = vector.extract_strided_slice %203 {offsets = [0, 0], sizes = [30, 64], strides = [1, 1]} : vector<32x64xf32> to vector<30x64xf32>
    %211 = tpu.concatenate %209, %210 in 0 : vector<2x64xf32>, vector<30x64xf32> -> vector<32x64xf32>
    %212 = vector.extract_strided_slice %6 {offsets = [0, 0], sizes = [32, 1], strides = [1, 1]} : vector<32x5xf32> to vector<32x1xf32>
    %213 = vector.broadcast %212 : vector<32x1xf32> to vector<32x64xf32>
    %214 = arith.mulf %211, %213 : vector<32x64xf32>
    %215 = vector.extract_strided_slice %205 {offsets = [0, 0], sizes = [1, 64], strides = [1, 1]} : vector<5x64xf32> to vector<1x64xf32>
    %216 = vector.broadcast %215 : vector<1x64xf32> to vector<32x64xf32>
    %217 = arith.mulf %214, %216 : vector<32x64xf32>
    %218 = arith.addf %208, %217 : vector<32x64xf32>
    %219 = vector.extract_strided_slice %203 {offsets = [31, 0], sizes = [1, 64], strides = [1, 1]} : vector<32x64xf32> to vector<1x64xf32>
    %220 = vector.extract_strided_slice %203 {offsets = [0, 0], sizes = [31, 64], strides = [1, 1]} : vector<32x64xf32> to vector<31x64xf32>
    %221 = tpu.concatenate %219, %220 in 0 : vector<1x64xf32>, vector<31x64xf32> -> vector<32x64xf32>
    %222 = vector.extract_strided_slice %6 {offsets = [0, 1], sizes = [32, 1], strides = [1, 1]} : vector<32x5xf32> to vector<32x1xf32>
    %223 = vector.broadcast %222 : vector<32x1xf32> to vector<32x64xf32>
    %224 = arith.mulf %221, %223 : vector<32x64xf32>
    %225 = vector.extract_strided_slice %205 {offsets = [1, 0], sizes = [1, 64], strides = [1, 1]} : vector<5x64xf32> to vector<1x64xf32>
    %226 = vector.broadcast %225 : vector<1x64xf32> to vector<32x64xf32>
    %227 = arith.mulf %224, %226 : vector<32x64xf32>
    %228 = arith.addf %218, %227 : vector<32x64xf32>
    %229 = vector.extract_strided_slice %203 {offsets = [1, 0], sizes = [31, 64], strides = [1, 1]} : vector<32x64xf32> to vector<31x64xf32>
    %230 = vector.extract_strided_slice %203 {offsets = [0, 0], sizes = [1, 64], strides = [1, 1]} : vector<32x64xf32> to vector<1x64xf32>
    %231 = tpu.concatenate %229, %230 in 0 : vector<31x64xf32>, vector<1x64xf32> -> vector<32x64xf32>
    %232 = vector.extract_strided_slice %6 {offsets = [0, 3], sizes = [32, 1], strides = [1, 1]} : vector<32x5xf32> to vector<32x1xf32>
    %233 = vector.broadcast %232 : vector<32x1xf32> to vector<32x64xf32>
    %234 = arith.mulf %231, %233 : vector<32x64xf32>
    %235 = vector.extract_strided_slice %205 {offsets = [3, 0], sizes = [1, 64], strides = [1, 1]} : vector<5x64xf32> to vector<1x64xf32>
    %236 = vector.broadcast %235 : vector<1x64xf32> to vector<32x64xf32>
    %237 = arith.mulf %234, %236 : vector<32x64xf32>
    %238 = arith.addf %228, %237 : vector<32x64xf32>
    %239 = vector.extract_strided_slice %203 {offsets = [2, 0], sizes = [30, 64], strides = [1, 1]} : vector<32x64xf32> to vector<30x64xf32>
    %240 = vector.extract_strided_slice %203 {offsets = [0, 0], sizes = [2, 64], strides = [1, 1]} : vector<32x64xf32> to vector<2x64xf32>
    %241 = tpu.concatenate %239, %240 in 0 : vector<30x64xf32>, vector<2x64xf32> -> vector<32x64xf32>
    %242 = vector.extract_strided_slice %6 {offsets = [0, 4], sizes = [32, 1], strides = [1, 1]} : vector<32x5xf32> to vector<32x1xf32>
    %243 = vector.broadcast %242 : vector<32x1xf32> to vector<32x64xf32>
    %244 = arith.mulf %241, %243 : vector<32x64xf32>
    %245 = vector.extract_strided_slice %205 {offsets = [4, 0], sizes = [1, 64], strides = [1, 1]} : vector<5x64xf32> to vector<1x64xf32>
    %246 = vector.broadcast %245 : vector<1x64xf32> to vector<32x64xf32>
    %247 = arith.mulf %244, %246 : vector<32x64xf32>
    %248 = arith.addf %238, %247 : vector<32x64xf32>
    %249 = vector.extract_strided_slice %10 {offsets = [8, 0], sizes = [1, 64], strides = [1, 1]} : vector<15x64xf32> to vector<1x64xf32>
    %250 = vector.broadcast %249 : vector<1x64xf32> to vector<32x64xf32>
    %251 = arith.mulf %248, %250 : vector<32x64xf32>
    %252 = vector.extract_strided_slice %10 {offsets = [9, 0], sizes = [1, 64], strides = [1, 1]} : vector<15x64xf32> to vector<1x64xf32>
    %253 = vector.broadcast %252 : vector<1x64xf32> to vector<32x64xf32>
    %254 = arith.addf %251, %253 : vector<32x64xf32>
    %255 = arith.negf %254 : vector<32x64xf32>
    %256 = math.exp %255 : vector<32x64xf32>
    %cst_83 = arith.constant 1.000000e+00 : f32
    %257 = vector.broadcast %cst_83 : f32 to vector<32x64xf32>
    %258 = arith.addf %257, %256 : vector<32x64xf32>
    %259 = arith.divf %257, %258 : vector<32x64xf32>
    %260 = arith.mulf %254, %259 : vector<32x64xf32>
    %c0_84 = arith.constant 0 : index
    %c0_85 = arith.constant 0 : index
    %c0_86 = arith.constant 0 : index
    %261 = vector.load %arg18[%c0_84, %c0_85, %c0_86] : memref<2x64x64xbf16, #tpu.memory_space<vmem>>, vector<1x64x64xbf16>
    %262 = vector.shape_cast %261 : vector<1x64x64xbf16> to vector<64x64xbf16>
    %263 = arith.truncf %260 : vector<32x64xf32> to vector<32x64xbf16>
    %cst_87 = arith.constant dense<0.000000e+00> : vector<32x64xf32>
    %264 = tpu.matmul %263, %262, %cst_87 {dimension_numbers = #tpu.dot_dimension_numbers<[1], [0], [0], [1], [0, 0, 1, 1], [], []>} : vector<32x64xbf16>, vector<64x64xbf16>, vector<32x64xf32> -> vector<32x64xf32>
    %265 = arith.addf %165, %264 : vector<32x64xf32>
    %266 = vector.extract_strided_slice %10 {offsets = [10, 0], sizes = [1, 64], strides = [1, 1]} : vector<15x64xf32> to vector<1x64xf32>
    %267 = vector.extract_strided_slice %10 {offsets = [11, 0], sizes = [1, 64], strides = [1, 1]} : vector<15x64xf32> to vector<1x64xf32>
    %c0_88 = arith.constant 0 : index
    %c0_89 = arith.constant 0 : index
    %c0_90 = arith.constant 0 : index
    %268 = vector.load %arg14[%c0_88, %c0_89, %c0_90] : memref<2x64x128xbf16, #tpu.memory_space<vmem>>, vector<1x64x128xbf16>
    %269 = vector.shape_cast %268 : vector<1x64x128xbf16> to vector<64x128xbf16>
    %270 = vector.extract_strided_slice %12 {offsets = [1, 0], sizes = [1, 128], strides = [1, 1]} : vector<2x128xf32> to vector<1x128xf32>
    %c0_91 = arith.constant 0 : index
    %c0_92 = arith.constant 0 : index
    %c0_93 = arith.constant 0 : index
    %271 = vector.load %arg15[%c0_91, %c0_92, %c0_93] : memref<2x128x64xbf16, #tpu.memory_space<vmem>>, vector<1x128x64xbf16>
    %272 = vector.shape_cast %271 : vector<1x128x64xbf16> to vector<128x64xbf16>
    %273 = vector.extract_strided_slice %10 {offsets = [12, 0], sizes = [1, 64], strides = [1, 1]} : vector<15x64xf32> to vector<1x64xf32>
    %cst_94 = arith.constant dense<0.000000e+00> : vector<32xf32>
    %274 = vector.multi_reduction <add>, %265, %cst_94 [1] : vector<32x64xf32> to vector<32xf32>
    %275 = vector.shape_cast %274 : vector<32xf32> to vector<32x1xf32>
    %cst_95 = arith.constant 6.400000e+01 : f32
    %276 = vector.broadcast %cst_95 : f32 to vector<32x1xf32>
    %277 = arith.divf %275, %276 : vector<32x1xf32>
    %278 = vector.broadcast %277 : vector<32x1xf32> to vector<32x64xf32>
    %279 = arith.subf %265, %278 : vector<32x64xf32>
    %280 = arith.mulf %279, %279 : vector<32x64xf32>
    %cst_96 = arith.constant dense<0.000000e+00> : vector<32xf32>
    %281 = vector.multi_reduction <add>, %280, %cst_96 [1] : vector<32x64xf32> to vector<32xf32>
    %282 = vector.shape_cast %281 : vector<32xf32> to vector<32x1xf32>
    %cst_97 = arith.constant 6.400000e+01 : f32
    %283 = vector.broadcast %cst_97 : f32 to vector<32x1xf32>
    %284 = arith.divf %282, %283 : vector<32x1xf32>
    %285 = vector.broadcast %277 : vector<32x1xf32> to vector<32x64xf32>
    %286 = arith.subf %265, %285 : vector<32x64xf32>
    %cst_98 = arith.constant 9.99999974E-6 : f32
    %287 = vector.broadcast %cst_98 : f32 to vector<32x1xf32>
    %288 = arith.addf %284, %287 : vector<32x1xf32>
    %289 = math.rsqrt %288 : vector<32x1xf32>
    %290 = vector.broadcast %289 : vector<32x1xf32> to vector<32x64xf32>
    %291 = arith.mulf %286, %290 : vector<32x64xf32>
    %292 = vector.broadcast %266 : vector<1x64xf32> to vector<32x64xf32>
    %293 = arith.mulf %291, %292 : vector<32x64xf32>
    %294 = vector.broadcast %267 : vector<1x64xf32> to vector<32x64xf32>
    %295 = arith.addf %293, %294 : vector<32x64xf32>
    %296 = arith.truncf %295 : vector<32x64xf32> to vector<32x64xbf16>
    %cst_99 = arith.constant dense<0.000000e+00> : vector<32x128xf32>
    %297 = tpu.matmul %296, %269, %cst_99 {dimension_numbers = #tpu.dot_dimension_numbers<[1], [0], [0], [1], [0, 0, 1, 1], [], []>} : vector<32x64xbf16>, vector<64x128xbf16>, vector<32x128xf32> -> vector<32x128xf32>
    %298 = vector.broadcast %270 : vector<1x128xf32> to vector<32x128xf32>
    %299 = arith.addf %297, %298 : vector<32x128xf32>
    %300 = arith.negf %299 : vector<32x128xf32>
    %301 = math.exp %300 : vector<32x128xf32>
    %cst_100 = arith.constant 1.000000e+00 : f32
    %302 = vector.broadcast %cst_100 : f32 to vector<32x128xf32>
    %303 = arith.addf %302, %301 : vector<32x128xf32>
    %304 = arith.divf %302, %303 : vector<32x128xf32>
    %305 = arith.mulf %299, %304 : vector<32x128xf32>
    %306 = arith.truncf %305 : vector<32x128xf32> to vector<32x128xbf16>
    %cst_101 = arith.constant dense<0.000000e+00> : vector<32x64xf32>
    %307 = tpu.matmul %306, %272, %cst_101 {dimension_numbers = #tpu.dot_dimension_numbers<[1], [0], [0], [1], [0, 0, 1, 1], [], []>} : vector<32x128xbf16>, vector<128x64xbf16>, vector<32x64xf32> -> vector<32x64xf32>
    %308 = vector.broadcast %273 : vector<1x64xf32> to vector<32x64xf32>
    %309 = arith.addf %307, %308 : vector<32x64xf32>
    %cst_102 = arith.constant 5.000000e-01 : f32
    %310 = vector.broadcast %cst_102 : f32 to vector<32x64xf32>
    %311 = arith.mulf %310, %309 : vector<32x64xf32>
    %312 = arith.addf %265, %311 : vector<32x64xf32>
    %313 = vector.extract_strided_slice %10 {offsets = [13, 0], sizes = [1, 64], strides = [1, 1]} : vector<15x64xf32> to vector<1x64xf32>
    %314 = vector.extract_strided_slice %10 {offsets = [14, 0], sizes = [1, 64], strides = [1, 1]} : vector<15x64xf32> to vector<1x64xf32>
    %cst_103 = arith.constant dense<0.000000e+00> : vector<32xf32>
    %315 = vector.multi_reduction <add>, %312, %cst_103 [1] : vector<32x64xf32> to vector<32xf32>
    %316 = vector.shape_cast %315 : vector<32xf32> to vector<32x1xf32>
    %cst_104 = arith.constant 6.400000e+01 : f32
    %317 = vector.broadcast %cst_104 : f32 to vector<32x1xf32>
    %318 = arith.divf %316, %317 : vector<32x1xf32>
    %319 = vector.broadcast %318 : vector<32x1xf32> to vector<32x64xf32>
    %320 = arith.subf %312, %319 : vector<32x64xf32>
    %321 = arith.mulf %320, %320 : vector<32x64xf32>
    %cst_105 = arith.constant dense<0.000000e+00> : vector<32xf32>
    %322 = vector.multi_reduction <add>, %321, %cst_105 [1] : vector<32x64xf32> to vector<32xf32>
    %323 = vector.shape_cast %322 : vector<32xf32> to vector<32x1xf32>
    %cst_106 = arith.constant 6.400000e+01 : f32
    %324 = vector.broadcast %cst_106 : f32 to vector<32x1xf32>
    %325 = arith.divf %323, %324 : vector<32x1xf32>
    %326 = vector.broadcast %318 : vector<32x1xf32> to vector<32x64xf32>
    %327 = arith.subf %312, %326 : vector<32x64xf32>
    %cst_107 = arith.constant 9.99999974E-6 : f32
    %328 = vector.broadcast %cst_107 : f32 to vector<32x1xf32>
    %329 = arith.addf %325, %328 : vector<32x1xf32>
    %330 = math.rsqrt %329 : vector<32x1xf32>
    %331 = vector.broadcast %330 : vector<32x1xf32> to vector<32x64xf32>
    %332 = arith.mulf %327, %331 : vector<32x64xf32>
    %333 = vector.broadcast %313 : vector<1x64xf32> to vector<32x64xf32>
    %334 = arith.mulf %332, %333 : vector<32x64xf32>
    %335 = vector.broadcast %314 : vector<1x64xf32> to vector<32x64xf32>
    %336 = arith.addf %334, %335 : vector<32x64xf32>
    %c1 = arith.constant 1 : index
    %c0_108 = arith.constant 0 : index
    %c0_109 = arith.constant 0 : index
    %337 = vector.load %arg20[%c1, %c0_108, %c0_109] : memref<2x15x64xf32, #tpu.memory_space<vmem>>, vector<1x15x64xf32>
    %338 = vector.shape_cast %337 : vector<1x15x64xf32> to vector<15x64xf32>
    %c1_110 = arith.constant 1 : index
    %c0_111 = arith.constant 0 : index
    %c0_112 = arith.constant 0 : index
    %339 = vector.load %arg21[%c1_110, %c0_111, %c0_112] : memref<2x2x128xf32, #tpu.memory_space<vmem>>, vector<1x2x128xf32>
    %340 = vector.shape_cast %339 : vector<1x2x128xf32> to vector<2x128xf32>
    %341 = vector.extract_strided_slice %338 {offsets = [0, 0], sizes = [1, 64], strides = [1, 1]} : vector<15x64xf32> to vector<1x64xf32>
    %342 = vector.extract_strided_slice %338 {offsets = [1, 0], sizes = [1, 64], strides = [1, 1]} : vector<15x64xf32> to vector<1x64xf32>
    %c1_113 = arith.constant 1 : index
    %c0_114 = arith.constant 0 : index
    %c0_115 = arith.constant 0 : index
    %343 = vector.load %arg12[%c1_113, %c0_114, %c0_115] : memref<2x64x128xbf16, #tpu.memory_space<vmem>>, vector<1x64x128xbf16>
    %344 = vector.shape_cast %343 : vector<1x64x128xbf16> to vector<64x128xbf16>
    %345 = vector.extract_strided_slice %340 {offsets = [0, 0], sizes = [1, 128], strides = [1, 1]} : vector<2x128xf32> to vector<1x128xf32>
    %c1_116 = arith.constant 1 : index
    %c0_117 = arith.constant 0 : index
    %c0_118 = arith.constant 0 : index
    %346 = vector.load %arg13[%c1_116, %c0_117, %c0_118] : memref<2x128x64xbf16, #tpu.memory_space<vmem>>, vector<1x128x64xbf16>
    %347 = vector.shape_cast %346 : vector<1x128x64xbf16> to vector<128x64xbf16>
    %348 = vector.extract_strided_slice %338 {offsets = [2, 0], sizes = [1, 64], strides = [1, 1]} : vector<15x64xf32> to vector<1x64xf32>
    %cst_119 = arith.constant dense<0.000000e+00> : vector<32xf32>
    %349 = vector.multi_reduction <add>, %336, %cst_119 [1] : vector<32x64xf32> to vector<32xf32>
    %350 = vector.shape_cast %349 : vector<32xf32> to vector<32x1xf32>
    %cst_120 = arith.constant 6.400000e+01 : f32
    %351 = vector.broadcast %cst_120 : f32 to vector<32x1xf32>
    %352 = arith.divf %350, %351 : vector<32x1xf32>
    %353 = vector.broadcast %352 : vector<32x1xf32> to vector<32x64xf32>
    %354 = arith.subf %336, %353 : vector<32x64xf32>
    %355 = arith.mulf %354, %354 : vector<32x64xf32>
    %cst_121 = arith.constant dense<0.000000e+00> : vector<32xf32>
    %356 = vector.multi_reduction <add>, %355, %cst_121 [1] : vector<32x64xf32> to vector<32xf32>
    %357 = vector.shape_cast %356 : vector<32xf32> to vector<32x1xf32>
    %cst_122 = arith.constant 6.400000e+01 : f32
    %358 = vector.broadcast %cst_122 : f32 to vector<32x1xf32>
    %359 = arith.divf %357, %358 : vector<32x1xf32>
    %360 = vector.broadcast %352 : vector<32x1xf32> to vector<32x64xf32>
    %361 = arith.subf %336, %360 : vector<32x64xf32>
    %cst_123 = arith.constant 9.99999974E-6 : f32
    %362 = vector.broadcast %cst_123 : f32 to vector<32x1xf32>
    %363 = arith.addf %359, %362 : vector<32x1xf32>
    %364 = math.rsqrt %363 : vector<32x1xf32>
    %365 = vector.broadcast %364 : vector<32x1xf32> to vector<32x64xf32>
    %366 = arith.mulf %361, %365 : vector<32x64xf32>
    %367 = vector.broadcast %341 : vector<1x64xf32> to vector<32x64xf32>
    %368 = arith.mulf %366, %367 : vector<32x64xf32>
    %369 = vector.broadcast %342 : vector<1x64xf32> to vector<32x64xf32>
    %370 = arith.addf %368, %369 : vector<32x64xf32>
    %371 = arith.truncf %370 : vector<32x64xf32> to vector<32x64xbf16>
    %cst_124 = arith.constant dense<0.000000e+00> : vector<32x128xf32>
    %372 = tpu.matmul %371, %344, %cst_124 {dimension_numbers = #tpu.dot_dimension_numbers<[1], [0], [0], [1], [0, 0, 1, 1], [], []>} : vector<32x64xbf16>, vector<64x128xbf16>, vector<32x128xf32> -> vector<32x128xf32>
    %373 = vector.broadcast %345 : vector<1x128xf32> to vector<32x128xf32>
    %374 = arith.addf %372, %373 : vector<32x128xf32>
    %375 = arith.negf %374 : vector<32x128xf32>
    %376 = math.exp %375 : vector<32x128xf32>
    %cst_125 = arith.constant 1.000000e+00 : f32
    %377 = vector.broadcast %cst_125 : f32 to vector<32x128xf32>
    %378 = arith.addf %377, %376 : vector<32x128xf32>
    %379 = arith.divf %377, %378 : vector<32x128xf32>
    %380 = arith.mulf %374, %379 : vector<32x128xf32>
    %381 = arith.truncf %380 : vector<32x128xf32> to vector<32x128xbf16>
    %cst_126 = arith.constant dense<0.000000e+00> : vector<32x64xf32>
    %382 = tpu.matmul %381, %347, %cst_126 {dimension_numbers = #tpu.dot_dimension_numbers<[1], [0], [0], [1], [0, 0, 1, 1], [], []>} : vector<32x128xbf16>, vector<128x64xbf16>, vector<32x64xf32> -> vector<32x64xf32>
    %383 = vector.broadcast %348 : vector<1x64xf32> to vector<32x64xf32>
    %384 = arith.addf %382, %383 : vector<32x64xf32>
    %cst_127 = arith.constant 5.000000e-01 : f32
    %385 = vector.broadcast %cst_127 : f32 to vector<32x64xf32>
    %386 = arith.mulf %385, %384 : vector<32x64xf32>
    %387 = arith.addf %336, %386 : vector<32x64xf32>
    %388 = vector.extract_strided_slice %338 {offsets = [3, 0], sizes = [1, 64], strides = [1, 1]} : vector<15x64xf32> to vector<1x64xf32>
    %389 = vector.extract_strided_slice %338 {offsets = [4, 0], sizes = [1, 64], strides = [1, 1]} : vector<15x64xf32> to vector<1x64xf32>
    %cst_128 = arith.constant dense<0.000000e+00> : vector<32xf32>
    %390 = vector.multi_reduction <add>, %387, %cst_128 [1] : vector<32x64xf32> to vector<32xf32>
    %391 = vector.shape_cast %390 : vector<32xf32> to vector<32x1xf32>
    %cst_129 = arith.constant 6.400000e+01 : f32
    %392 = vector.broadcast %cst_129 : f32 to vector<32x1xf32>
    %393 = arith.divf %391, %392 : vector<32x1xf32>
    %394 = vector.broadcast %393 : vector<32x1xf32> to vector<32x64xf32>
    %395 = arith.subf %387, %394 : vector<32x64xf32>
    %396 = arith.mulf %395, %395 : vector<32x64xf32>
    %cst_130 = arith.constant dense<0.000000e+00> : vector<32xf32>
    %397 = vector.multi_reduction <add>, %396, %cst_130 [1] : vector<32x64xf32> to vector<32xf32>
    %398 = vector.shape_cast %397 : vector<32xf32> to vector<32x1xf32>
    %cst_131 = arith.constant 6.400000e+01 : f32
    %399 = vector.broadcast %cst_131 : f32 to vector<32x1xf32>
    %400 = arith.divf %398, %399 : vector<32x1xf32>
    %401 = vector.broadcast %393 : vector<32x1xf32> to vector<32x64xf32>
    %402 = arith.subf %387, %401 : vector<32x64xf32>
    %cst_132 = arith.constant 9.99999974E-6 : f32
    %403 = vector.broadcast %cst_132 : f32 to vector<32x1xf32>
    %404 = arith.addf %400, %403 : vector<32x1xf32>
    %405 = math.rsqrt %404 : vector<32x1xf32>
    %406 = vector.broadcast %405 : vector<32x1xf32> to vector<32x64xf32>
    %407 = arith.mulf %402, %406 : vector<32x64xf32>
    %408 = vector.broadcast %388 : vector<1x64xf32> to vector<32x64xf32>
    %409 = arith.mulf %407, %408 : vector<32x64xf32>
    %410 = vector.broadcast %389 : vector<1x64xf32> to vector<32x64xf32>
    %411 = arith.addf %409, %410 : vector<32x64xf32>
    %c1_133 = arith.constant 1 : index
    %c0_134 = arith.constant 0 : index
    %c0_135 = arith.constant 0 : index
    %412 = vector.load %arg9[%c1_133, %c0_134, %c0_135] : memref<2x64x320xbf16, #tpu.memory_space<vmem>>, vector<1x64x320xbf16>
    %413 = vector.shape_cast %412 : vector<1x64x320xbf16> to vector<64x320xbf16>
    %414 = arith.truncf %411 : vector<32x64xf32> to vector<32x64xbf16>
    %cst_136 = arith.constant dense<0.000000e+00> : vector<32x320xf32>
    %415 = tpu.matmul %414, %413, %cst_136 {dimension_numbers = #tpu.dot_dimension_numbers<[1], [0], [0], [1], [0, 0, 1, 1], [], []>} : vector<32x64xbf16>, vector<64x320xbf16>, vector<32x320xf32> -> vector<32x320xf32>
    %c1_137 = arith.constant 1 : index
    %c0_138 = arith.constant 0 : index
    %c0_139 = arith.constant 0 : index
    %416 = vector.load %arg10[%c1_137, %c0_138, %c0_139] : memref<2x1x320xf32, #tpu.memory_space<vmem>>, vector<1x1x320xf32>
    %417 = vector.shape_cast %416 : vector<1x1x320xf32> to vector<1x320xf32>
    %418 = vector.broadcast %417 : vector<1x320xf32> to vector<32x320xf32>
    %419 = arith.addf %415, %418 : vector<32x320xf32>
    %420 = vector.extract_strided_slice %419 {offsets = [0, 0], sizes = [32, 64], strides = [1, 1]} : vector<32x320xf32> to vector<32x64xf32>
    %421 = arith.mulf %420, %0 : vector<32x64xf32>
    %422 = vector.extract_strided_slice %419 {offsets = [0, 64], sizes = [32, 64], strides = [1, 1]} : vector<32x320xf32> to vector<32x64xf32>
    %423 = arith.mulf %422, %1 : vector<32x64xf32>
    %424 = arith.addf %421, %423 : vector<32x64xf32>
    %425 = vector.extract_strided_slice %419 {offsets = [0, 128], sizes = [32, 64], strides = [1, 1]} : vector<32x320xf32> to vector<32x64xf32>
    %426 = arith.mulf %425, %0 : vector<32x64xf32>
    %427 = vector.extract_strided_slice %419 {offsets = [0, 192], sizes = [32, 64], strides = [1, 1]} : vector<32x320xf32> to vector<32x64xf32>
    %428 = arith.mulf %427, %1 : vector<32x64xf32>
    %429 = arith.addf %426, %428 : vector<32x64xf32>
    %430 = vector.extract_strided_slice %419 {offsets = [0, 256], sizes = [32, 64], strides = [1, 1]} : vector<32x320xf32> to vector<32x64xf32>
    %431 = tpu.concatenate %424, %424 in 1 : vector<32x64xf32>, vector<32x64xf32> -> vector<32x128xf32>
    %432 = arith.truncf %431 : vector<32x128xf32> to vector<32x128xbf16>
    %433 = arith.mulf %432, %3 : vector<32x128xbf16>
    %434 = arith.truncf %429 : vector<32x64xf32> to vector<32x64xbf16>
    %cst_140 = arith.constant dense<0.000000e+00> : vector<128x64xf32>
    %435 = tpu.matmul %4, %434, %cst_140 {dimension_numbers = #tpu.dot_dimension_numbers<[1], [0], [0], [1], [0, 0, 1, 1], [], []>} : vector<128x32xbf16>, vector<32x64xbf16>, vector<128x64xf32> -> vector<128x64xf32>
    %436 = arith.truncf %435 : vector<128x64xf32> to vector<128x64xbf16>
    %437 = arith.mulf %436, %5 : vector<128x64xbf16>
    %438 = arith.truncf %430 : vector<32x64xf32> to vector<32x64xbf16>
    %cst_141 = arith.constant dense<0.000000e+00> : vector<128x64xf32>
    %439 = tpu.matmul %4, %438, %cst_141 {dimension_numbers = #tpu.dot_dimension_numbers<[1], [0], [0], [1], [0, 0, 1, 1], [], []>} : vector<128x32xbf16>, vector<32x64xbf16>, vector<128x64xf32> -> vector<128x64xf32>
    %440 = arith.truncf %439 : vector<128x64xf32> to vector<128x64xbf16>
    %441 = arith.mulf %440, %5 : vector<128x64xbf16>
    %cst_142 = arith.constant dense<0.000000e+00> : vector<32x64xf32>
    %442 = tpu.matmul %433, %437, %cst_142 {dimension_numbers = #tpu.dot_dimension_numbers<[1], [0], [0], [1], [0, 0, 1, 1], [], []>} : vector<32x128xbf16>, vector<128x64xbf16>, vector<32x64xf32> -> vector<32x64xf32>
    %443 = arith.addf %442, %2 : vector<32x64xf32>
    %cst_143 = arith.constant dense<0xFF800000> : vector<32xf32>
    %444 = vector.multi_reduction <maximumf>, %443, %cst_143 [1] : vector<32x64xf32> to vector<32xf32>
    %445 = vector.shape_cast %444 : vector<32xf32> to vector<32x1xf32>
    %446 = vector.broadcast %445 : vector<32x1xf32> to vector<32x64xf32>
    %447 = arith.subf %443, %446 : vector<32x64xf32>
    %448 = math.exp %447 : vector<32x64xf32>
    %449 = vector.extract_strided_slice %448 {offsets = [0, 0], sizes = [32, 16], strides = [1, 1]} : vector<32x64xf32> to vector<32x16xf32>
    %450 = vector.extract_strided_slice %448 {offsets = [0, 0], sizes = [32, 16], strides = [1, 1]} : vector<32x64xf32> to vector<32x16xf32>
    %cst_144 = arith.constant dense<0.000000e+00> : vector<32xf32>
    %451 = vector.multi_reduction <add>, %450, %cst_144 [1] : vector<32x16xf32> to vector<32xf32>
    %452 = vector.shape_cast %451 : vector<32xf32> to vector<32x1xf32>
    %cst_145 = arith.constant 1.000000e-30 : f32
    %453 = vector.broadcast %cst_145 : f32 to vector<32x1xf32>
    %454 = arith.addf %452, %453 : vector<32x1xf32>
    %455 = vector.broadcast %454 : vector<32x1xf32> to vector<32x16xf32>
    %456 = arith.divf %449, %455 : vector<32x16xf32>
    %457 = vector.extract_strided_slice %448 {offsets = [0, 16], sizes = [32, 16], strides = [1, 1]} : vector<32x64xf32> to vector<32x16xf32>
    %458 = vector.extract_strided_slice %448 {offsets = [0, 16], sizes = [32, 16], strides = [1, 1]} : vector<32x64xf32> to vector<32x16xf32>
    %cst_146 = arith.constant dense<0.000000e+00> : vector<32xf32>
    %459 = vector.multi_reduction <add>, %458, %cst_146 [1] : vector<32x16xf32> to vector<32xf32>
    %460 = vector.shape_cast %459 : vector<32xf32> to vector<32x1xf32>
    %cst_147 = arith.constant 1.000000e-30 : f32
    %461 = vector.broadcast %cst_147 : f32 to vector<32x1xf32>
    %462 = arith.addf %460, %461 : vector<32x1xf32>
    %463 = vector.broadcast %462 : vector<32x1xf32> to vector<32x16xf32>
    %464 = arith.divf %457, %463 : vector<32x16xf32>
    %465 = vector.extract_strided_slice %448 {offsets = [0, 32], sizes = [32, 16], strides = [1, 1]} : vector<32x64xf32> to vector<32x16xf32>
    %466 = vector.extract_strided_slice %448 {offsets = [0, 32], sizes = [32, 16], strides = [1, 1]} : vector<32x64xf32> to vector<32x16xf32>
    %cst_148 = arith.constant dense<0.000000e+00> : vector<32xf32>
    %467 = vector.multi_reduction <add>, %466, %cst_148 [1] : vector<32x16xf32> to vector<32xf32>
    %468 = vector.shape_cast %467 : vector<32xf32> to vector<32x1xf32>
    %cst_149 = arith.constant 1.000000e-30 : f32
    %469 = vector.broadcast %cst_149 : f32 to vector<32x1xf32>
    %470 = arith.addf %468, %469 : vector<32x1xf32>
    %471 = vector.broadcast %470 : vector<32x1xf32> to vector<32x16xf32>
    %472 = arith.divf %465, %471 : vector<32x16xf32>
    %473 = vector.extract_strided_slice %448 {offsets = [0, 48], sizes = [32, 16], strides = [1, 1]} : vector<32x64xf32> to vector<32x16xf32>
    %474 = vector.extract_strided_slice %448 {offsets = [0, 48], sizes = [32, 16], strides = [1, 1]} : vector<32x64xf32> to vector<32x16xf32>
    %cst_150 = arith.constant dense<0.000000e+00> : vector<32xf32>
    %475 = vector.multi_reduction <add>, %474, %cst_150 [1] : vector<32x16xf32> to vector<32xf32>
    %476 = vector.shape_cast %475 : vector<32xf32> to vector<32x1xf32>
    %cst_151 = arith.constant 1.000000e-30 : f32
    %477 = vector.broadcast %cst_151 : f32 to vector<32x1xf32>
    %478 = arith.addf %476, %477 : vector<32x1xf32>
    %479 = vector.broadcast %478 : vector<32x1xf32> to vector<32x16xf32>
    %480 = arith.divf %473, %479 : vector<32x16xf32>
    %481 = tpu.concatenate %456, %464, %472, %480 in 1 : vector<32x16xf32>, vector<32x16xf32>, vector<32x16xf32>, vector<32x16xf32> -> vector<32x64xf32>
    %482 = tpu.concatenate %481, %481 in 1 : vector<32x64xf32>, vector<32x64xf32> -> vector<32x128xf32>
    %483 = arith.truncf %482 : vector<32x128xf32> to vector<32x128xbf16>
    %484 = arith.mulf %483, %3 : vector<32x128xbf16>
    %cst_152 = arith.constant dense<0.000000e+00> : vector<32x64xf32>
    %485 = tpu.matmul %484, %441, %cst_152 {dimension_numbers = #tpu.dot_dimension_numbers<[1], [0], [0], [1], [0, 0, 1, 1], [], []>} : vector<32x128xbf16>, vector<128x64xbf16>, vector<32x64xf32> -> vector<32x64xf32>
    %c1_153 = arith.constant 1 : index
    %c0_154 = arith.constant 0 : index
    %c0_155 = arith.constant 0 : index
    %486 = vector.load %arg11[%c1_153, %c0_154, %c0_155] : memref<2x64x64xbf16, #tpu.memory_space<vmem>>, vector<1x64x64xbf16>
    %487 = vector.shape_cast %486 : vector<1x64x64xbf16> to vector<64x64xbf16>
    %488 = arith.truncf %485 : vector<32x64xf32> to vector<32x64xbf16>
    %cst_156 = arith.constant dense<0.000000e+00> : vector<32x64xf32>
    %489 = tpu.matmul %488, %487, %cst_156 {dimension_numbers = #tpu.dot_dimension_numbers<[1], [0], [0], [1], [0, 0, 1, 1], [], []>} : vector<32x64xbf16>, vector<64x64xbf16>, vector<32x64xf32> -> vector<32x64xf32>
    %490 = vector.extract_strided_slice %338 {offsets = [5, 0], sizes = [1, 64], strides = [1, 1]} : vector<15x64xf32> to vector<1x64xf32>
    %491 = vector.broadcast %490 : vector<1x64xf32> to vector<32x64xf32>
    %492 = arith.addf %489, %491 : vector<32x64xf32>
    %493 = arith.addf %387, %492 : vector<32x64xf32>
    %494 = vector.extract_strided_slice %338 {offsets = [6, 0], sizes = [1, 64], strides = [1, 1]} : vector<15x64xf32> to vector<1x64xf32>
    %495 = vector.extract_strided_slice %338 {offsets = [7, 0], sizes = [1, 64], strides = [1, 1]} : vector<15x64xf32> to vector<1x64xf32>
    %cst_157 = arith.constant dense<0.000000e+00> : vector<32xf32>
    %496 = vector.multi_reduction <add>, %493, %cst_157 [1] : vector<32x64xf32> to vector<32xf32>
    %497 = vector.shape_cast %496 : vector<32xf32> to vector<32x1xf32>
    %cst_158 = arith.constant 6.400000e+01 : f32
    %498 = vector.broadcast %cst_158 : f32 to vector<32x1xf32>
    %499 = arith.divf %497, %498 : vector<32x1xf32>
    %500 = vector.broadcast %499 : vector<32x1xf32> to vector<32x64xf32>
    %501 = arith.subf %493, %500 : vector<32x64xf32>
    %502 = arith.mulf %501, %501 : vector<32x64xf32>
    %cst_159 = arith.constant dense<0.000000e+00> : vector<32xf32>
    %503 = vector.multi_reduction <add>, %502, %cst_159 [1] : vector<32x64xf32> to vector<32xf32>
    %504 = vector.shape_cast %503 : vector<32xf32> to vector<32x1xf32>
    %cst_160 = arith.constant 6.400000e+01 : f32
    %505 = vector.broadcast %cst_160 : f32 to vector<32x1xf32>
    %506 = arith.divf %504, %505 : vector<32x1xf32>
    %507 = vector.broadcast %499 : vector<32x1xf32> to vector<32x64xf32>
    %508 = arith.subf %493, %507 : vector<32x64xf32>
    %cst_161 = arith.constant 9.99999974E-6 : f32
    %509 = vector.broadcast %cst_161 : f32 to vector<32x1xf32>
    %510 = arith.addf %506, %509 : vector<32x1xf32>
    %511 = math.rsqrt %510 : vector<32x1xf32>
    %512 = vector.broadcast %511 : vector<32x1xf32> to vector<32x64xf32>
    %513 = arith.mulf %508, %512 : vector<32x64xf32>
    %514 = vector.broadcast %494 : vector<1x64xf32> to vector<32x64xf32>
    %515 = arith.mulf %513, %514 : vector<32x64xf32>
    %516 = vector.broadcast %495 : vector<1x64xf32> to vector<32x64xf32>
    %517 = arith.addf %515, %516 : vector<32x64xf32>
    %c1_162 = arith.constant 1 : index
    %c0_163 = arith.constant 0 : index
    %c0_164 = arith.constant 0 : index
    %518 = vector.load %arg16[%c1_162, %c0_163, %c0_164] : memref<2x64x64xbf16, #tpu.memory_space<vmem>>, vector<1x64x64xbf16>
    %519 = vector.shape_cast %518 : vector<1x64x64xbf16> to vector<64x64xbf16>
    %520 = arith.truncf %517 : vector<32x64xf32> to vector<32x64xbf16>
    %cst_165 = arith.constant dense<0.000000e+00> : vector<32x64xf32>
    %521 = tpu.matmul %520, %519, %cst_165 {dimension_numbers = #tpu.dot_dimension_numbers<[1], [0], [0], [1], [0, 0, 1, 1], [], []>} : vector<32x64xbf16>, vector<64x64xbf16>, vector<32x64xf32> -> vector<32x64xf32>
    %c1_166 = arith.constant 1 : index
    %c0_167 = arith.constant 0 : index
    %c0_168 = arith.constant 0 : index
    %522 = vector.load %arg17[%c1_166, %c0_167, %c0_168] : memref<2x64x64xbf16, #tpu.memory_space<vmem>>, vector<1x64x64xbf16>
    %523 = vector.shape_cast %522 : vector<1x64x64xbf16> to vector<64x64xbf16>
    %524 = arith.truncf %517 : vector<32x64xf32> to vector<32x64xbf16>
    %cst_169 = arith.constant dense<0.000000e+00> : vector<32x64xf32>
    %525 = tpu.matmul %524, %523, %cst_169 {dimension_numbers = #tpu.dot_dimension_numbers<[1], [0], [0], [1], [0, 0, 1, 1], [], []>} : vector<32x64xbf16>, vector<64x64xbf16>, vector<32x64xf32> -> vector<32x64xf32>
    %526 = arith.negf %525 : vector<32x64xf32>
    %527 = math.exp %526 : vector<32x64xf32>
    %cst_170 = arith.constant 1.000000e+00 : f32
    %528 = vector.broadcast %cst_170 : f32 to vector<32x64xf32>
    %529 = arith.addf %528, %527 : vector<32x64xf32>
    %530 = arith.divf %528, %529 : vector<32x64xf32>
    %531 = arith.mulf %521, %530 : vector<32x64xf32>
    %c1_171 = arith.constant 1 : index
    %c0_172 = arith.constant 0 : index
    %c0_173 = arith.constant 0 : index
    %532 = vector.load %arg19[%c1_171, %c0_172, %c0_173] : memref<2x5x64xf32, #tpu.memory_space<vmem>>, vector<1x5x64xf32>
    %533 = vector.shape_cast %532 : vector<1x5x64xf32> to vector<5x64xf32>
    %534 = vector.extract_strided_slice %533 {offsets = [2, 0], sizes = [1, 64], strides = [1, 1]} : vector<5x64xf32> to vector<1x64xf32>
    %535 = vector.broadcast %534 : vector<1x64xf32> to vector<32x64xf32>
    %536 = arith.mulf %531, %535 : vector<32x64xf32>
    %537 = vector.extract_strided_slice %531 {offsets = [30, 0], sizes = [2, 64], strides = [1, 1]} : vector<32x64xf32> to vector<2x64xf32>
    %538 = vector.extract_strided_slice %531 {offsets = [0, 0], sizes = [30, 64], strides = [1, 1]} : vector<32x64xf32> to vector<30x64xf32>
    %539 = tpu.concatenate %537, %538 in 0 : vector<2x64xf32>, vector<30x64xf32> -> vector<32x64xf32>
    %540 = vector.extract_strided_slice %6 {offsets = [0, 0], sizes = [32, 1], strides = [1, 1]} : vector<32x5xf32> to vector<32x1xf32>
    %541 = vector.broadcast %540 : vector<32x1xf32> to vector<32x64xf32>
    %542 = arith.mulf %539, %541 : vector<32x64xf32>
    %543 = vector.extract_strided_slice %533 {offsets = [0, 0], sizes = [1, 64], strides = [1, 1]} : vector<5x64xf32> to vector<1x64xf32>
    %544 = vector.broadcast %543 : vector<1x64xf32> to vector<32x64xf32>
    %545 = arith.mulf %542, %544 : vector<32x64xf32>
    %546 = arith.addf %536, %545 : vector<32x64xf32>
    %547 = vector.extract_strided_slice %531 {offsets = [31, 0], sizes = [1, 64], strides = [1, 1]} : vector<32x64xf32> to vector<1x64xf32>
    %548 = vector.extract_strided_slice %531 {offsets = [0, 0], sizes = [31, 64], strides = [1, 1]} : vector<32x64xf32> to vector<31x64xf32>
    %549 = tpu.concatenate %547, %548 in 0 : vector<1x64xf32>, vector<31x64xf32> -> vector<32x64xf32>
    %550 = vector.extract_strided_slice %6 {offsets = [0, 1], sizes = [32, 1], strides = [1, 1]} : vector<32x5xf32> to vector<32x1xf32>
    %551 = vector.broadcast %550 : vector<32x1xf32> to vector<32x64xf32>
    %552 = arith.mulf %549, %551 : vector<32x64xf32>
    %553 = vector.extract_strided_slice %533 {offsets = [1, 0], sizes = [1, 64], strides = [1, 1]} : vector<5x64xf32> to vector<1x64xf32>
    %554 = vector.broadcast %553 : vector<1x64xf32> to vector<32x64xf32>
    %555 = arith.mulf %552, %554 : vector<32x64xf32>
    %556 = arith.addf %546, %555 : vector<32x64xf32>
    %557 = vector.extract_strided_slice %531 {offsets = [1, 0], sizes = [31, 64], strides = [1, 1]} : vector<32x64xf32> to vector<31x64xf32>
    %558 = vector.extract_strided_slice %531 {offsets = [0, 0], sizes = [1, 64], strides = [1, 1]} : vector<32x64xf32> to vector<1x64xf32>
    %559 = tpu.concatenate %557, %558 in 0 : vector<31x64xf32>, vector<1x64xf32> -> vector<32x64xf32>
    %560 = vector.extract_strided_slice %6 {offsets = [0, 3], sizes = [32, 1], strides = [1, 1]} : vector<32x5xf32> to vector<32x1xf32>
    %561 = vector.broadcast %560 : vector<32x1xf32> to vector<32x64xf32>
    %562 = arith.mulf %559, %561 : vector<32x64xf32>
    %563 = vector.extract_strided_slice %533 {offsets = [3, 0], sizes = [1, 64], strides = [1, 1]} : vector<5x64xf32> to vector<1x64xf32>
    %564 = vector.broadcast %563 : vector<1x64xf32> to vector<32x64xf32>
    %565 = arith.mulf %562, %564 : vector<32x64xf32>
    %566 = arith.addf %556, %565 : vector<32x64xf32>
    %567 = vector.extract_strided_slice %531 {offsets = [2, 0], sizes = [30, 64], strides = [1, 1]} : vector<32x64xf32> to vector<30x64xf32>
    %568 = vector.extract_strided_slice %531 {offsets = [0, 0], sizes = [2, 64], strides = [1, 1]} : vector<32x64xf32> to vector<2x64xf32>
    %569 = tpu.concatenate %567, %568 in 0 : vector<30x64xf32>, vector<2x64xf32> -> vector<32x64xf32>
    %570 = vector.extract_strided_slice %6 {offsets = [0, 4], sizes = [32, 1], strides = [1, 1]} : vector<32x5xf32> to vector<32x1xf32>
    %571 = vector.broadcast %570 : vector<32x1xf32> to vector<32x64xf32>
    %572 = arith.mulf %569, %571 : vector<32x64xf32>
    %573 = vector.extract_strided_slice %533 {offsets = [4, 0], sizes = [1, 64], strides = [1, 1]} : vector<5x64xf32> to vector<1x64xf32>
    %574 = vector.broadcast %573 : vector<1x64xf32> to vector<32x64xf32>
    %575 = arith.mulf %572, %574 : vector<32x64xf32>
    %576 = arith.addf %566, %575 : vector<32x64xf32>
    %577 = vector.extract_strided_slice %338 {offsets = [8, 0], sizes = [1, 64], strides = [1, 1]} : vector<15x64xf32> to vector<1x64xf32>
    %578 = vector.broadcast %577 : vector<1x64xf32> to vector<32x64xf32>
    %579 = arith.mulf %576, %578 : vector<32x64xf32>
    %580 = vector.extract_strided_slice %338 {offsets = [9, 0], sizes = [1, 64], strides = [1, 1]} : vector<15x64xf32> to vector<1x64xf32>
    %581 = vector.broadcast %580 : vector<1x64xf32> to vector<32x64xf32>
    %582 = arith.addf %579, %581 : vector<32x64xf32>
    %583 = arith.negf %582 : vector<32x64xf32>
    %584 = math.exp %583 : vector<32x64xf32>
    %cst_174 = arith.constant 1.000000e+00 : f32
    %585 = vector.broadcast %cst_174 : f32 to vector<32x64xf32>
    %586 = arith.addf %585, %584 : vector<32x64xf32>
    %587 = arith.divf %585, %586 : vector<32x64xf32>
    %588 = arith.mulf %582, %587 : vector<32x64xf32>
    %c1_175 = arith.constant 1 : index
    %c0_176 = arith.constant 0 : index
    %c0_177 = arith.constant 0 : index
    %589 = vector.load %arg18[%c1_175, %c0_176, %c0_177] : memref<2x64x64xbf16, #tpu.memory_space<vmem>>, vector<1x64x64xbf16>
    %590 = vector.shape_cast %589 : vector<1x64x64xbf16> to vector<64x64xbf16>
    %591 = arith.truncf %588 : vector<32x64xf32> to vector<32x64xbf16>
    %cst_178 = arith.constant dense<0.000000e+00> : vector<32x64xf32>
    %592 = tpu.matmul %591, %590, %cst_178 {dimension_numbers = #tpu.dot_dimension_numbers<[1], [0], [0], [1], [0, 0, 1, 1], [], []>} : vector<32x64xbf16>, vector<64x64xbf16>, vector<32x64xf32> -> vector<32x64xf32>
    %593 = arith.addf %493, %592 : vector<32x64xf32>
    %594 = vector.extract_strided_slice %338 {offsets = [10, 0], sizes = [1, 64], strides = [1, 1]} : vector<15x64xf32> to vector<1x64xf32>
    %595 = vector.extract_strided_slice %338 {offsets = [11, 0], sizes = [1, 64], strides = [1, 1]} : vector<15x64xf32> to vector<1x64xf32>
    %c1_179 = arith.constant 1 : index
    %c0_180 = arith.constant 0 : index
    %c0_181 = arith.constant 0 : index
    %596 = vector.load %arg14[%c1_179, %c0_180, %c0_181] : memref<2x64x128xbf16, #tpu.memory_space<vmem>>, vector<1x64x128xbf16>
    %597 = vector.shape_cast %596 : vector<1x64x128xbf16> to vector<64x128xbf16>
    %598 = vector.extract_strided_slice %340 {offsets = [1, 0], sizes = [1, 128], strides = [1, 1]} : vector<2x128xf32> to vector<1x128xf32>
    %c1_182 = arith.constant 1 : index
    %c0_183 = arith.constant 0 : index
    %c0_184 = arith.constant 0 : index
    %599 = vector.load %arg15[%c1_182, %c0_183, %c0_184] : memref<2x128x64xbf16, #tpu.memory_space<vmem>>, vector<1x128x64xbf16>
    %600 = vector.shape_cast %599 : vector<1x128x64xbf16> to vector<128x64xbf16>
    %601 = vector.extract_strided_slice %338 {offsets = [12, 0], sizes = [1, 64], strides = [1, 1]} : vector<15x64xf32> to vector<1x64xf32>
    %cst_185 = arith.constant dense<0.000000e+00> : vector<32xf32>
    %602 = vector.multi_reduction <add>, %593, %cst_185 [1] : vector<32x64xf32> to vector<32xf32>
    %603 = vector.shape_cast %602 : vector<32xf32> to vector<32x1xf32>
    %cst_186 = arith.constant 6.400000e+01 : f32
    %604 = vector.broadcast %cst_186 : f32 to vector<32x1xf32>
    %605 = arith.divf %603, %604 : vector<32x1xf32>
    %606 = vector.broadcast %605 : vector<32x1xf32> to vector<32x64xf32>
    %607 = arith.subf %593, %606 : vector<32x64xf32>
    %608 = arith.mulf %607, %607 : vector<32x64xf32>
    %cst_187 = arith.constant dense<0.000000e+00> : vector<32xf32>
    %609 = vector.multi_reduction <add>, %608, %cst_187 [1] : vector<32x64xf32> to vector<32xf32>
    %610 = vector.shape_cast %609 : vector<32xf32> to vector<32x1xf32>
    %cst_188 = arith.constant 6.400000e+01 : f32
    %611 = vector.broadcast %cst_188 : f32 to vector<32x1xf32>
    %612 = arith.divf %610, %611 : vector<32x1xf32>
    %613 = vector.broadcast %605 : vector<32x1xf32> to vector<32x64xf32>
    %614 = arith.subf %593, %613 : vector<32x64xf32>
    %cst_189 = arith.constant 9.99999974E-6 : f32
    %615 = vector.broadcast %cst_189 : f32 to vector<32x1xf32>
    %616 = arith.addf %612, %615 : vector<32x1xf32>
    %617 = math.rsqrt %616 : vector<32x1xf32>
    %618 = vector.broadcast %617 : vector<32x1xf32> to vector<32x64xf32>
    %619 = arith.mulf %614, %618 : vector<32x64xf32>
    %620 = vector.broadcast %594 : vector<1x64xf32> to vector<32x64xf32>
    %621 = arith.mulf %619, %620 : vector<32x64xf32>
    %622 = vector.broadcast %595 : vector<1x64xf32> to vector<32x64xf32>
    %623 = arith.addf %621, %622 : vector<32x64xf32>
    %624 = arith.truncf %623 : vector<32x64xf32> to vector<32x64xbf16>
    %cst_190 = arith.constant dense<0.000000e+00> : vector<32x128xf32>
    %625 = tpu.matmul %624, %597, %cst_190 {dimension_numbers = #tpu.dot_dimension_numbers<[1], [0], [0], [1], [0, 0, 1, 1], [], []>} : vector<32x64xbf16>, vector<64x128xbf16>, vector<32x128xf32> -> vector<32x128xf32>
    %626 = vector.broadcast %598 : vector<1x128xf32> to vector<32x128xf32>
    %627 = arith.addf %625, %626 : vector<32x128xf32>
    %628 = arith.negf %627 : vector<32x128xf32>
    %629 = math.exp %628 : vector<32x128xf32>
    %cst_191 = arith.constant 1.000000e+00 : f32
    %630 = vector.broadcast %cst_191 : f32 to vector<32x128xf32>
    %631 = arith.addf %630, %629 : vector<32x128xf32>
    %632 = arith.divf %630, %631 : vector<32x128xf32>
    %633 = arith.mulf %627, %632 : vector<32x128xf32>
    %634 = arith.truncf %633 : vector<32x128xf32> to vector<32x128xbf16>
    %cst_192 = arith.constant dense<0.000000e+00> : vector<32x64xf32>
    %635 = tpu.matmul %634, %600, %cst_192 {dimension_numbers = #tpu.dot_dimension_numbers<[1], [0], [0], [1], [0, 0, 1, 1], [], []>} : vector<32x128xbf16>, vector<128x64xbf16>, vector<32x64xf32> -> vector<32x64xf32>
    %636 = vector.broadcast %601 : vector<1x64xf32> to vector<32x64xf32>
    %637 = arith.addf %635, %636 : vector<32x64xf32>
    %cst_193 = arith.constant 5.000000e-01 : f32
    %638 = vector.broadcast %cst_193 : f32 to vector<32x64xf32>
    %639 = arith.mulf %638, %637 : vector<32x64xf32>
    %640 = arith.addf %593, %639 : vector<32x64xf32>
    %641 = vector.extract_strided_slice %338 {offsets = [13, 0], sizes = [1, 64], strides = [1, 1]} : vector<15x64xf32> to vector<1x64xf32>
    %642 = vector.extract_strided_slice %338 {offsets = [14, 0], sizes = [1, 64], strides = [1, 1]} : vector<15x64xf32> to vector<1x64xf32>
    %cst_194 = arith.constant dense<0.000000e+00> : vector<32xf32>
    %643 = vector.multi_reduction <add>, %640, %cst_194 [1] : vector<32x64xf32> to vector<32xf32>
    %644 = vector.shape_cast %643 : vector<32xf32> to vector<32x1xf32>
    %cst_195 = arith.constant 6.400000e+01 : f32
    %645 = vector.broadcast %cst_195 : f32 to vector<32x1xf32>
    %646 = arith.divf %644, %645 : vector<32x1xf32>
    %647 = vector.broadcast %646 : vector<32x1xf32> to vector<32x64xf32>
    %648 = arith.subf %640, %647 : vector<32x64xf32>
    %649 = arith.mulf %648, %648 : vector<32x64xf32>
    %cst_196 = arith.constant dense<0.000000e+00> : vector<32xf32>
    %650 = vector.multi_reduction <add>, %649, %cst_196 [1] : vector<32x64xf32> to vector<32xf32>
    %651 = vector.shape_cast %650 : vector<32xf32> to vector<32x1xf32>
    %cst_197 = arith.constant 6.400000e+01 : f32
    %652 = vector.broadcast %cst_197 : f32 to vector<32x1xf32>
    %653 = arith.divf %651, %652 : vector<32x1xf32>
    %654 = vector.broadcast %646 : vector<32x1xf32> to vector<32x64xf32>
    %655 = arith.subf %640, %654 : vector<32x64xf32>
    %cst_198 = arith.constant 9.99999974E-6 : f32
    %656 = vector.broadcast %cst_198 : f32 to vector<32x1xf32>
    %657 = arith.addf %653, %656 : vector<32x1xf32>
    %658 = math.rsqrt %657 : vector<32x1xf32>
    %659 = vector.broadcast %658 : vector<32x1xf32> to vector<32x64xf32>
    %660 = arith.mulf %655, %659 : vector<32x64xf32>
    %661 = vector.broadcast %641 : vector<1x64xf32> to vector<32x64xf32>
    %662 = arith.mulf %660, %661 : vector<32x64xf32>
    %663 = vector.broadcast %642 : vector<1x64xf32> to vector<32x64xf32>
    %664 = arith.addf %662, %663 : vector<32x64xf32>
    %665 = vector.extract_strided_slice %7 {offsets = [0, 0], sizes = [1, 64], strides = [1, 1]} : vector<2x64xf32> to vector<1x64xf32>
    %666 = vector.extract_strided_slice %7 {offsets = [1, 0], sizes = [1, 64], strides = [1, 1]} : vector<2x64xf32> to vector<1x64xf32>
    %cst_199 = arith.constant dense<0.000000e+00> : vector<32xf32>
    %667 = vector.multi_reduction <add>, %664, %cst_199 [1] : vector<32x64xf32> to vector<32xf32>
    %668 = vector.shape_cast %667 : vector<32xf32> to vector<32x1xf32>
    %cst_200 = arith.constant 6.400000e+01 : f32
    %669 = vector.broadcast %cst_200 : f32 to vector<32x1xf32>
    %670 = arith.divf %668, %669 : vector<32x1xf32>
    %671 = vector.broadcast %670 : vector<32x1xf32> to vector<32x64xf32>
    %672 = arith.subf %664, %671 : vector<32x64xf32>
    %673 = arith.mulf %672, %672 : vector<32x64xf32>
    %cst_201 = arith.constant dense<0.000000e+00> : vector<32xf32>
    %674 = vector.multi_reduction <add>, %673, %cst_201 [1] : vector<32x64xf32> to vector<32xf32>
    %675 = vector.shape_cast %674 : vector<32xf32> to vector<32x1xf32>
    %cst_202 = arith.constant 6.400000e+01 : f32
    %676 = vector.broadcast %cst_202 : f32 to vector<32x1xf32>
    %677 = arith.divf %675, %676 : vector<32x1xf32>
    %678 = vector.broadcast %670 : vector<32x1xf32> to vector<32x64xf32>
    %679 = arith.subf %664, %678 : vector<32x64xf32>
    %cst_203 = arith.constant 9.99999974E-6 : f32
    %680 = vector.broadcast %cst_203 : f32 to vector<32x1xf32>
    %681 = arith.addf %677, %680 : vector<32x1xf32>
    %682 = math.rsqrt %681 : vector<32x1xf32>
    %683 = vector.broadcast %682 : vector<32x1xf32> to vector<32x64xf32>
    %684 = arith.mulf %679, %683 : vector<32x64xf32>
    %685 = vector.broadcast %665 : vector<1x64xf32> to vector<32x64xf32>
    %686 = arith.mulf %684, %685 : vector<32x64xf32>
    %687 = vector.broadcast %666 : vector<1x64xf32> to vector<32x64xf32>
    %688 = arith.addf %686, %687 : vector<32x64xf32>
    %c0_204 = arith.constant 0 : index
    %c0_205 = arith.constant 0 : index
    %689 = vector.load %arg22[%c0_204, %c0_205] : memref<32x64xf32, #tpu.memory_space<vmem>>, vector<32x64xf32>
    tpu.vector_store %arg22[%c0_204, %c0_205], %688 {strides = array<i32>} : memref<32x64xf32, #tpu.memory_space<vmem>>, vector<32x64xf32>,
    return
  }
}

</mosaic_0001>

<bundles_post_ra>
// kernel: tpu_custom_call.1
= control target key start
LH: loop header
LB: loop body
LE: loop exit
PB: predicated region body
PF: predicated region fallthrough
CT: control target
= control target key end

     0   :  { %s8295_s0 = inlined_call_operand.hbm [shape: f32[32,64], index: 0, kind: input, shape index: {}]   ;;  %s8296_s1 = inlined_call_operand.hbm [shape: f32[32,64], index: 1, kind: input, shape index: {}]   ;;  %s8297_s2 = inlined_call_operand.hbm [shape: f32[32,64], index: 2, kind: input, shape index: {}]   ;;  %s8298_s3 = inlined_call_operand.hbm [shape: f32[32,64], index: 3, kind: input, shape index: {}]   ;;  %s8299_s4 = inlined_call_operand.hbm [shape: bf16[32,128], index: 4, kind: input, shape index: {}]   ;;  %s8300_s5 = inlined_call_operand.vmem [shape: bf16[128,32], index: 5, kind: input, shape index: {}]   ;;  %s8301_s6 = inlined_call_operand.vmem [shape: bf16[128,64], index: 6, kind: input, shape index: {}]   ;;  %s8302_s7 = inlined_call_operand.vmem [shape: f32[32,5], index: 7, kind: input, shape index: {}]   ;;  %s8303_s8 = inlined_call_operand.hbm [shape: f32[2,64], index: 8, kind: input, shape index: {}]   ;;  %s8304_s9 = inlined_call_operand.vmem [shape: bf16[2,64,320], index: 9, kind: input, shape index: {}]   ;;  %s8305_s10 = inlined_call_operand.hbm [shape: f32[2,1,320], index: 10, kind: input, shape index: {}]   ;;  %s8306_s11 = inlined_call_operand.vmem [shape: bf16[2,64,64], index: 11, kind: input, shape index: {}]   ;;  %s8307_s12 = inlined_call_operand.vmem [shape: bf16[2,64,128], index: 12, kind: input, shape index: {}]   ;;  %s8308_s13 = inlined_call_operand.vmem [shape: bf16[2,128,64], index: 13, kind: input, shape index: {}]   ;;  %s8309_s14 = inlined_call_operand.vmem [shape: bf16[2,64,128], index: 14, kind: input, shape index: {}]   ;;  %s8310_s15 = inlined_call_operand.vmem [shape: bf16[2,128,64], index: 15, kind: input, shape index: {}]   ;;  %s8311_s16 = inlined_call_operand.vmem [shape: bf16[2,64,64], index: 16, kind: input, shape index: {}]   ;;  %s8312_s17 = inlined_call_operand.vmem [shape: bf16[2,64,64], index: 17, kind: input, shape index: {}]   ;;  %s8313_s18 = inlined_call_operand.vmem [shape: bf16[2,64,64], index: 18, kind: input, shape index: {}]   ;;  %s8314_s19 = inlined_call_operand.vmem [shape: f32[2,5,64], index: 19, kind: input, shape index: {}]   ;;  %s8315_s20 = inlined_call_operand.vmem [shape: f32[2,15,64], index: 20, kind: input, shape index: {}]   ;;  %s8316_s21 = inlined_call_operand.vmem [shape: f32[2,2,128], index: 21, kind: input, shape index: {}]   ;;  %s8317_s22 = inlined_call_operand.hbm [shape: f32[32,64], index: 22, kind: output, shape index: {}]  }
   0x1   :  { %8328 = sst [smem:[#allocation25_spill]] %s8295_s0 }
   0x2   :  { %8329 = sst [smem:[#allocation26_spill]] %s8296_s1 }
   0x3   :  { %8330 = sst [smem:[#allocation27_spill]] %s8297_s2 }
   0x4   :  { %8331 = sst [smem:[#allocation28_spill]] %s8298_s3 }
   0x5   :  { %8332 = sst [smem:[#allocation29_spill]] %s8299_s4 }
   0x6   :  { %8333 = sst [smem:[#allocation30_spill]] %s8300_s5 }
   0x7   :  { %8334 = sst [smem:[#allocation31_spill]] %s8301_s6 }
   0x8   :  { %27 = vsyncpa [#allocation3], 0 }
   0x9   :  { %28 = vsyncpa [#allocation6], 0 }
   0xa   :  { %29 = vsyncpa [#allocation9], 0 }
   0xb   :  { %30 = vsyncpa [#allocation12], 0 }
   0xc   :  { %31 = vsyncpa [#allocation4], 0  ;;  %s6591_s3 = smov [#allocation5]   ;;  %s6592_s29 = smov [#allocation8]  }
   0xd   :  { %s49_s28 = sshll.u32 %s6591_s3, 4  ;;  %s73_s30 = sshll.u32 %s6592_s29, 4  ;;  %s50_s28 = int_to_ptr.vmem [resolvable:$true] %s49_s28  ;;  %s74_s30 = int_to_ptr.vmem [resolvable:$true] %s73_s30 }
   0xe   :  { %s6429_s4 = scalar_lea.vmem %s50_s28, 512  ;;  %p6434_p1 = scmp.lt.s32.totalorder %s50_s28, %s50_s28 }
   0xf   :  { %p6430_p0 = scmp.ne.s32.totalorder %s50_s28, %s6429_s4  ;;  %p6435_p2 = scmp.lt.s32.totalorder %s6429_s4, %s6429_s4 }
  0x11   :  { %p6436_p3 = por %p6435_p2, %p6434_p1 }
  0x13   :  { %p6437_p4 = pnand %p6436_p3, %p6430_p0 }
  0x15   :  { %6440 = shalt.err (!%p6437_p4)
}
  0x16   :  { %s6593_s0 = smov 128   ;;  %s6594_s23 = smov 8  }
  0x17   :  { %s8335_s24 = sld [smem:[#allocation26_spill]]  ;;  %s6449_s6 = scalar_lea.vmem %s74_s30, 512 }
  0x18   :  { %p6450_p5 = scmp.ne.s32.totalorder %s74_s30, %s6449_s6  ;;  %p6454_p6 = scmp.lt.s32.totalorder %s74_s30, %s74_s30 }
  0x19   :  { %p6455_p7 = scmp.lt.s32.totalorder %s6449_s6, %s6449_s6 }
  0x1b   :  { %p6456_p8 = por %p6455_p7, %p6454_p6 }
  0x1d   :  { %55 = dma.hbm_to_vmem [thread:$0]  %s8335_s24, 512, %s50_s28, [#allocation6], %s6593_s0, %s6593_s0, %s6594_s23  }
  0x1e   :  { %p6457_p9 = pnand %p6456_p8, %p6450_p5 }
  0x20   :  { %6460 = shalt.err (!%p6457_p9)
}
  0x21   :  { %s8336_s2 = sld [smem:[#allocation28_spill]]  ;;  %s6595_s27 = smov [#allocation11]  }
  0x22   :  { %s104_s3 = sshll.u32 %s6595_s27, 4  ;;  %s6596_s29 = smov [#allocation2]   ;;  %s105_s3 = int_to_ptr.vmem [resolvable:$true] %s104_s3 }
  0x23   :  { %s37_s4 = sshll.u32 %s6596_s29, 4  ;;  %s6469_s28 = scalar_lea.vmem %s105_s3, 32  ;;  %s38_s4 = int_to_ptr.vmem [resolvable:$true] %s37_s4 }
  0x24   :  { %p6470_p10 = scmp.ne.s32.totalorder %s105_s3, %s6469_s28  ;;  %p6474_p11 = scmp.lt.s32.totalorder %s105_s3, %s105_s3 }
  0x25   :  { %p6475_p12 = scmp.lt.s32.totalorder %s6469_s28, %s6469_s28 }
  0x27   :  { %79 = dma.hbm_to_vmem [thread:$0]  %s8336_s2, 512, %s74_s30, [#allocation9], %s6593_s0, %s6593_s0, %s6594_s23  }
  0x28   :  { %p6476_p13 = por %p6475_p12, %p6474_p11 }
  0x2a   :  { %p6477_p0 = pnand %p6476_p13, %p6470_p10 }
  0x2c   :  { %6480 = shalt.err (!%p6477_p0)
}
  0x2d   :  { %107 = dma.hbm_to_vmem [thread:$0]  %s8303_s8, 32, %s105_s3, [#allocation12]  }
  0x2e   :  { %s6489_s24 = scalar_lea.vmem %s38_s4, 512  ;;  %p6494_p2 = scmp.lt.s32.totalorder %s38_s4, %s38_s4 }
  0x2f   :  { %p6490_p1 = scmp.ne.s32.totalorder %s38_s4, %s6489_s24  ;;  %p6495_p3 = scmp.lt.s32.totalorder %s6489_s24, %s6489_s24 }
  0x31   :  { %p6496_p4 = por %p6495_p3, %p6494_p2 }
  0x33   :  { %p6497_p5 = pnand %p6496_p4, %p6490_p1 }
  0x35   :  { %6500 = shalt.err (!%p6497_p5)
}
  0x36   :  { %s8337_s25 = sld [smem:[#allocation25_spill]]  ;;  %s6597_s26 = smov [#allocation7]  }
  0x37   :  { %s61_s2 = sshll.u32 %s6597_s26, 4  ;;  %s6598_s27 = smov [#allocation10]   ;;  %s62_s2 = int_to_ptr.vmem [resolvable:$true] %s61_s2 }
  0x38   :  { %s85_s29 = sshll.u32 %s6598_s27, 4  ;;  %s6509_s8 = scalar_lea.vmem %s62_s2, 512  ;;  %s86_s29 = int_to_ptr.vmem [resolvable:$true] %s85_s29 }
  0x39   :  { %p6510_p6 = scmp.ne.s32.totalorder %s62_s2, %s6509_s8  ;;  %p6514_p7 = scmp.lt.s32.totalorder %s62_s2, %s62_s2 }
  0x3a   :  { %p6515_p8 = scmp.lt.s32.totalorder %s6509_s8, %s6509_s8 }
  0x3c   :  { %43 = dma.hbm_to_vmem [thread:$0]  %s8337_s25, 512, %s38_s4, [#allocation3], %s6593_s0, %s6593_s0, %s6594_s23  }
  0x3d   :  { %p6516_p9 = por %p6515_p8, %p6514_p7 }
  0x3f   :  { %p6517_p10 = pnand %p6516_p9, %p6510_p6 }
  0x41   :  { %6520 = shalt.err (!%p6517_p10)
}
  0x42   :  { %s8338_s1 = sld [smem:[#allocation27_spill]]  ;;  %s6529_s4 = scalar_lea.vmem %s86_s29, 256 }
  0x43   :  { %p6530_p11 = scmp.ne.s32.totalorder %s86_s29, %s6529_s4  ;;  %p6534_p12 = scmp.lt.s32.totalorder %s86_s29, %s86_s29 }
  0x44   :  { %p6535_p13 = scmp.lt.s32.totalorder %s6529_s4, %s6529_s4 }
  0x46   :  { %p6536_p0 = por %p6535_p13, %p6534_p12 }
  0x48   :  { %67 = dma.hbm_to_vmem [thread:$0]  %s8338_s1, 512, %s62_s2, [#allocation6], %s6593_s0, %s6593_s0, %s6594_s23  }
  0x49   :  { %p6537_p1 = pnand %p6536_p0, %p6530_p11 }
  0x4b   :  { %6540 = shalt.err (!%p6537_p1)
}
  0x4c   :  { %s6599_s5 = smov 64   ;;  %s6600_s24 = smov 4  }
  0x4d   :  { %s8339_s25 = sld [smem:[#allocation29_spill]]  ;;  %s6601_s26 = smov [#allocation13]  }
  0x4e   :  { %s115_s27 = sshll.u32 %s6601_s26, 4  ;;  %s116_s27 = int_to_ptr.vmem [resolvable:$true] %s115_s27 }
  0x4f   :  { %s6549_s8 = scalar_lea.vmem %s116_s27, 96  ;;  %p6554_p3 = scmp.lt.s32.totalorder %s116_s27, %s116_s27 }
  0x50   :  { %p6550_p2 = scmp.ne.s32.totalorder %s116_s27, %s6549_s8  ;;  %p6555_p4 = scmp.lt.s32.totalorder %s6549_s8, %s6549_s8 }
  0x52   :  { %p6556_p5 = por %p6555_p4, %p6554_p3 }
  0x53   :  { %91 = dma.hbm_to_vmem [thread:$0]  %s8339_s25, 256, %s86_s29, [#allocation9], %s6599_s5, %s6599_s5, %s6600_s24  }
  0x54   :  { %p6557_p6 = pnand %p6556_p5, %p6550_p2 }
  0x56   :  { %6560 = shalt.err (!%p6557_p6)
}
  0x57   :  { %s6602_s2 = smov 48   ;;  %s6603_s3 = smov 3  }
  0x58   :  { %121 = dma.hbm_to_vmem [thread:$0]  %s8305_s10, 96, %s116_s27, [#allocation12], %s6602_s2, %s6602_s2, %s6603_s3  }
  0x59   :  { %6581 = dma.done.wait [#allocation3], 512  }
  0x5a   :  { %6582 = vsyncadd [#allocation3], 4294966784 }
  0x5b   :  { %6583 = dma.done.wait [#allocation6], 1024  }
  0x5c   :  { %6584 = vsyncadd [#allocation6], 4294966272 }
  0x5d   :  { %6585 = dma.done.wait [#allocation9], 768  }
  0x5e   :  { %6586 = vsyncadd [#allocation9], 4294966528 }
  0x5f   :  { %6587 = dma.done.wait [#allocation12], 128  }
  0x60   :  { %6588 = vsyncadd [#allocation12], 4294967168  ;;  %vm250_vm0 = vcmask 523264   ;;  %v6762_v0 = vld [vmem:[#allocation2] sm:$0xff]  ;;  %v6764_v1 = vld [vmem:[#allocation2 + $0x10] sm:$0xff]  ;;  %v304_v41 = vlaneseq  ;;  %s8341_s28 = sld [smem:[#allocation30_spill]] }
  0x61   :  { %v6766_v2 = vld [vmem:[#allocation2 + $0x8] sm:$0xff]  ;;  %v251_v3 = vsel %vm250_vm0, %v6762_v0, 0.0  ;;  %v257_v4 = vsel %vm250_vm0, %v6764_v1, 0.0  ;;  %v6774_v6 = vld [vmem:[#allocation2 + $0x18] sm:$0xff]  ;;  %v5966_v29 = vld [vmem:[%s8307_s12 + $0x10] sm:$0xff]   ;;  %vm969_vm1 = vcmask 261120  }
  0x62   :  { %v254_v5 = vsel %vm250_vm0, %v6766_v2, 0.0  ;;  %252 = vadd.xlane.f32.xlu0 %v251_v3  ;;  %258 = vadd.xlane.f32.xlu1 %v257_v4  ;;  %v260_v7 = vsel %vm250_vm0, %v6774_v6, 0.0  ;;  %v5965_v28 = vld [vmem:[%s8307_s12 + $0x18] sm:$0xff]   ;;  %v5967_v30 = vld [vmem:[%s8307_s12 + $0x8] sm:$0xff]   ;;  %v5968_v31 = vld [vmem:[%s8307_s12] sm:$0xff]   ;;  %v6798_v45 = vshrl.u32 %v304_v41, 7 }
  0x63   :  { %5489 = vmatprep.subr.bf16.mxu1 %v5965_v28  ;;  %v6806_v47 = vld [vmem:[%s8315_s20] sm:$0xff]  ;;  %s8342_s4 = sld [smem:[#allocation31_spill]]  ;;  %s6605_s6 = smov 96   ;;  %vm1343_vm2 = vcmask 130048   ;;  %vm1488_vm3 = vcmask 392192   ;;  %vm1994_vm4 = vcmask 1040384  }
  0x64   :  { %5490 = vmatpush3.bf16.msra.mxu1 %v5965_v28  ;;  %8340 = vst [vmem:[#allocation20_spill] sm:$0xff] %v6798_v45  ;;  %v6801_v46 = vsub.s32 0, %v6798_v45  ;;  %v6811_v51 = vsub.s32 1, %v6798_v45  ;;  %s6606_s25 = smov 112   ;;  %s6607_s26 = smov 80   ;;  %vm1944_vm5 = vcmask 1041408  }
  0x65   :  { %5491 = vmatprep.subr.bf16.mxu1 %v5966_v29  ;;  %vm2038_vm6 = vcmask 1046528   ;;  %vm2084_vm7 = vcmask 1045504  }
  0x66   :  { %255 = vadd.xlane.f32.xlu0 %v254_v5  ;;  %261 = vadd.xlane.f32.xlu1 %v260_v7  ;;  %v307_v50 = vrot.slane %v6806_v47, %v6801_v46  ;;  %v315_v56 = vrot.slane %v6806_v47, %v6811_v51 }
  0x68   :  { %5492 = vmatpush3.bf16.msra.mxu1 %v5966_v29 }
  0x69   :  { %5493 = vmatprep.subr.bf16.mxu1 %v5967_v30 }
  0x6c   :  { %5494 = vmatpush3.bf16.msra.mxu1 %v5967_v30 }
  0x6d   :  { %5495 = vmatprep.subr.bf16.mxu1 %v5968_v31 }
  0x70   :  { %5496 = vmatpush3.bf16.msra.mxu1 %v5968_v31 }
  0xeb   :  { %v253_v8 = vpop.xlane.xlu0 %252  ;;  %v259_v9 = vpop.xlane.xlu1 %258 }
  0xec   :  { %v264_v10 = vmul.f32 0.015625, %v253_v8  ;;  %v266_v11 = vmul.f32 0.015625, %v259_v9  ;;  %v5969_v9 = vld [vmem:[%s8308_s13 + $0x38] sm:$0xff]  }
  0xed   :  { %5501 = vmatprep.subr.bf16.mxu1 %v5969_v9 }
  0xee   :  { %v268_v12 = vsub.f32 %v6762_v0, %v264_v10  ;;  %v270_v13 = vsub.f32 %v6764_v1, %v266_v11  ;;  %v5970_v10 = vld [vmem:[%s8308_s13 + $0x30] sm:$0xff]   ;;  %v5971_v11 = vld [vmem:[%s8308_s13 + $0x28] sm:$0xff]  }
  0xef   :  { %v256_v14 = vpop.xlane.xlu0 %255  ;;  %v262_v15 = vpop.xlane.xlu1 %261 }
  0xf0   :  { %v265_v16 = vmul.f32 0.015625, %v256_v14  ;;  %v267_v17 = vmul.f32 0.015625, %v262_v15  ;;  %v272_v18 = vmul.f32 %v268_v12, %v268_v12  ;;  %v274_v19 = vmul.f32 %v270_v13, %v270_v13  ;;  %v5974_v14 = vld [vmem:[%s8308_s13 + $0x10] sm:$0xff]   ;;  %v5975_v15 = vld [vmem:[%s8308_s13 + $0x8] sm:$0xff]  }
  0xf2   :  { %v269_v20 = vsub.f32 %v6766_v2, %v265_v16  ;;  %v271_v21 = vsub.f32 %v6774_v6, %v267_v17  ;;  %v276_v22 = vsel %vm250_vm0, %v272_v18, 0.0  ;;  %v282_v23 = vsel %vm250_vm0, %v274_v19, 0.0  ;;  %v5976_v16 = vld [vmem:[%s8308_s13] sm:$0xff]  }
  0xf3   :  { %277 = vadd.xlane.f32.xlu0 %v276_v22  ;;  %v225_v17 = vld [vmem:[%s8316_s21] sm:$0x3] }
  0xf4   :  { %v273_v24 = vmul.f32 %v269_v20, %v269_v20  ;;  %v275_v25 = vmul.f32 %v271_v21, %v271_v21  ;;  %v325_v18 = vrot.slane %v225_v17, %v6801_v46 }
  0xf6   :  { %v279_v26 = vsel %vm250_vm0, %v273_v24, 0.0  ;;  %v285_v27 = vsel %vm250_vm0, %v275_v25, 0.0 }
  0xf7   :  { %283 = vadd.xlane.f32.xlu0 %v282_v23  ;;  %280 = vadd.xlane.f32.xlu1 %v279_v26 }
  0xfb   :  { %286 = vadd.xlane.f32.xlu1 %v285_v27 }
 0x17c   :  { %v278_v32 = vpop.xlane.xlu0 %277 }
 0x17d   :  { %v288_v33 = vmul.f32 0.015625, %v278_v32 }
 0x17f   :  { %v292_v34 = vadd.f32 1e-05, %v288_v33 }
 0x180   :  { %v281_v35 = vpop.xlane.xlu1 %280  ;;  %v284_v36 = vpop.xlane.xlu0 %283 }
 0x181   :  { %6095 = vrsqrt.f32 %v292_v34  ;;  %v289_v37 = vmul.f32 0.015625, %v281_v35  ;;  %v290_v38 = vmul.f32 0.015625, %v284_v36 }
 0x183   :  { %v293_v39 = vadd.f32 1e-05, %v289_v37  ;;  %v294_v40 = vadd.f32 1e-05, %v290_v38 }
 0x184   :  { %v287_v42 = vpop.xlane.xlu1 %286 }
 0x185   :  { %6097 = vrsqrt.f32 %v293_v39  ;;  %v291_v43 = vmul.f32 0.015625, %v287_v42 }
 0x186   :  { %6099 = vrsqrt.f32 %v294_v40 }
 0x187   :  { %v295_v44 = vadd.f32 1e-05, %v291_v43 }
 0x189   :  { %6101 = vrsqrt.f32 %v295_v44 }
 0x18e   :  { %v6096_v48 = vpop.eup %6095 }
 0x18f   :  { %v300_v49 = vmul.f32 %v6096_v48, %v268_v12  ;;  %v5972_v12 = vld [vmem:[%s8308_s13 + $0x20] sm:$0xff]  }
 0x191   :  { %v308_v55 = vmul.f32 %v307_v50, %v300_v49 }
 0x192   :  { %v6098_v52 = vpop.eup %6097 }
 0x193   :  { %v6100_v53 = vpop.eup %6099  ;;  %v301_v54 = vmul.f32 %v6098_v52, %v269_v20  ;;  %v316_v60 = vadd.f32 %v315_v56, %v308_v55 }
 0x194   :  { %v302_v57 = vmul.f32 %v6100_v53, %v270_v13  ;;  %v5973_v13 = vld [vmem:[%s8308_s13 + $0x18] sm:$0xff]   ;;  %v6846_v53 = vsub.s32 2, %v6798_v45 }
 0x195   :  { %v309_v58 = vmul.f32 %v307_v50, %v301_v54 }
 0x196   :  { %v6102_v59 = vpop.eup %6101  ;;  %v310_v63 = vmul.f32 %v307_v50, %v302_v57  ;;  %v438_v54 = vrot.slane %v6806_v47, %v6846_v53 }
 0x197   :  { %v317_v61 = vadd.f32 %v315_v56, %v309_v58  ;;  %v303_v62 = vmul.f32 %v6102_v59, %v271_v21 }
 0x198   :  { %v318_v5 = vadd.f32 %v315_v56, %v310_v63 }
 0x199   :  { %v320_v3 = vpack.c.bf16 %v317_v61, %v316_v60  ;;  %v311_v4 = vmul.f32 %v307_v50, %v303_v62 }
 0x19b   :  { %5497 = vmatprep.mubr.msk.bf16.mxu1 %vm250_vm0, %v320_v3  ;;  %v319_v7 = vadd.f32 %v315_v56, %v311_v4 }
 0x19d   :  { %v321_v8 = vpack.c.bf16 %v319_v7, %v318_v5 }
 0x19f   :  { %5498 = vmatmul.mubr.msk.bf16.vlgmr.msra.gmra.mxu1 %vm250_vm0, %v321_v8 }
 0x1a0   :  { %5502 = vmatpush3.bf16.msra.mxu1 %v5969_v9 }
 0x1a1   :  { %5503 = vmatprep.subr.bf16.mxu1 %v5970_v10 }
 0x1a4   :  { %5504 = vmatpush3.bf16.msra.mxu1 %v5970_v10 }
 0x1a5   :  { %5505 = vmatprep.subr.bf16.mxu1 %v5971_v11 }
 0x1a8   :  { %5506 = vmatpush3.bf16.msra.mxu1 %v5971_v11 }
 0x1a9   :  { %5507 = vmatprep.subr.bf16.mxu1 %v5972_v12 }
 0x1ac   :  { %5508 = vmatpush3.bf16.msra.mxu1 %v5972_v12 }
 0x1ad   :  { %5509 = vmatprep.subr.bf16.mxu1 %v5973_v13 }
 0x1b0   :  { %5510 = vmatpush3.bf16.msra.mxu1 %v5973_v13 }
 0x1b1   :  { %5511 = vmatprep.subr.bf16.mxu1 %v5974_v14 }
 0x1b4   :  { %5512 = vmatpush3.bf16.msra.mxu1 %v5974_v14 }
 0x1b5   :  { %5513 = vmatprep.subr.bf16.mxu1 %v5975_v15 }
 0x1b8   :  { %5514 = vmatpush3.bf16.msra.mxu1 %v5975_v15 }
 0x1b9   :  { %5515 = vmatprep.subr.bf16.mxu1 %v5976_v16 }
 0x1bc   :  { %5516 = vmatpush3.bf16.msra.mxu1 %v5976_v16 }
 0x25f   :  { %v5499_v19 = vpop.f32.mrf.mxu1 }
 0x260   :  { %v399_v20 = vadd.f32 %v5499_v19, %v325_v18 }
 0x261   :  { %v390_v21 = vpop.f32.mrf.mxu1 }
 0x262   :  { %v4975_v22 = vmul.f32 -1.442695, %v399_v20  ;;  %v391_v23 = vadd.f32 %v390_v21, %v325_v18 }
 0x263   :  { %v5500_v24 = vpop.f32.mrf.mxu1 }
 0x264   :  { %v4973_v25 = vmul.f32 -1.442695, %v391_v23  ;;  %v402_v26 = vadd.f32 %v5500_v24, %v325_v18  ;;  %6103 = vpow2.f32 %v4975_v22 }
 0x265   :  { %v393_v27 = vpop.f32.mrf.mxu1 }
 0x266   :  { %6105 = vpow2.f32 %v4973_v25  ;;  %v4976_v28 = vmul.f32 -1.442695, %v402_v26  ;;  %v394_v29 = vadd.f32 %v393_v27, %v325_v18 }
 0x268   :  { %6107 = vpow2.f32 %v4976_v28  ;;  %v4974_v30 = vmul.f32 -1.442695, %v394_v29 }
 0x26a   :  { %6109 = vpow2.f32 %v4974_v30 }
 0x271   :  { %v6104_v31 = vpop.eup %6103 }
 0x272   :  { %v419_v35 = vadd.f32 1.0, %v6104_v31  ;;  %v5977_v31 = vld [vmem:[%s8304_s9 + $0x4c] ss:$12 sps:$4 sm:$0xff]  }
 0x273   :  { %v6106_v32 = vpop.eup %6105  ;;  %725 = vmatprep.subr.bf16.mxu0 %v5977_v31  ;;  %v630_v31 = vld [vmem:[#allocation13] sm:$0x7] }
 0x274   :  { %v417_v33 = vadd.f32 1.0, %v6106_v32  ;;  %v5979_v32 = vld [vmem:[%s8304_s9 + $0x48] ss:$12 sps:$4 sm:$0xff]  }
 0x275   :  { %v6108_v34 = vpop.eup %6107  ;;  %726 = vmatpush1.bf16.msra.mxu0 %v5979_v32 }
 0x276   :  { %v420_v36 = vadd.f32 1.0, %v6108_v34  ;;  %6111 = vrcp.f32 %v417_v33  ;;  %v5980_v33 = vld [vmem:[%s8304_s9 + $0x34] ss:$12 sps:$4 sm:$0xff]   ;;  %v5982_v34 = vld [vmem:[%s8304_s9 + $0x30] ss:$12 sps:$4 sm:$0xff]  }
 0x277   :  { %v6110_v37 = vpop.eup %6109  ;;  %727 = vmatprep.subr.bf16.mxu0 %v5980_v33  ;;  %v639_v33 = vrot.slane %v630_v31, %v6811_v51 }
 0x278   :  { %6113 = vrcp.f32 %v420_v36  ;;  %v418_v38 = vadd.f32 1.0, %v6110_v37  ;;  %v5983_v36 = vld [vmem:[%s8304_s9 + $0x1c] ss:$12 sps:$4 sm:$0xff]   ;;  %v5985_v37 = vld [vmem:[%s8304_s9 + $0x18] ss:$12 sps:$4 sm:$0xff]  }
 0x279   :  { %6115 = vrcp.f32 %v419_v35  ;;  %v8321_v35 = vmov 0   ;;  %728 = vmatpush1.bf16.msra.mxu0 %v5982_v34 }
 0x27a   :  { %6117 = vrcp.f32 %v418_v38  ;;  %749 = vmatprep.mubr.bf16.mxu0 %v8321_v35  ;;  %5939 = vset.pattern.permute.xlu1 %v8321_v35  ;;  %v5986_v38 = vld [vmem:[%s8304_s9 + $0x4] ss:$12 sps:$4 sm:$0xff]  }
 0x27b   :  { %5938 = vset.pattern.permute.xlu0 %v8321_v35  ;;  %729 = vmatprep.subr.bf16.mxu0 %v5983_v36 }
 0x27d   :  { %730 = vmatpush1.bf16.msra.mxu0 %v5985_v37  ;;  %v635_v37 = vrot.slane %v630_v31, %v6801_v46 }
 0x27e   :  { %731 = vmatprep.subr.bf16.mxu0 %v5986_v38 }
 0x283   :  { %v6112_v39 = vpop.eup %6111 }
 0x284   :  { %v429_v44 = vmul.f32 %v6112_v39, %v391_v23  ;;  %v5988_v39 = vld [vmem:[%s8304_s9] ss:$12 sps:$4 sm:$0xff]  }
 0x285   :  { %v6114_v40 = vpop.eup %6113  ;;  %732 = vmatpush1.bf16.msra.mxu0 %v5988_v39 }
 0x286   :  { %v6116_v41 = vpop.eup %6115  ;;  %v432_v43 = vmul.f32 %v6114_v40, %v402_v26  ;;  %v5989_v40 = vld [vmem:[%s8304_s9 + $0x50] ss:$12 sps:$4 sm:$0xff]  }
 0x287   :  { %v6118_v42 = vpop.eup %6117  ;;  %v431_v49 = vmul.f32 %v6116_v41, %v399_v20  ;;  %5521 = vmatprep.subr.bf16.mxu0 %v5989_v40  ;;  %v173_v41 = vld [vmem:[#allocation7 + $0x18] sm:$0xff] }
 0x288   :  { %v430_v48 = vmul.f32 %v6118_v42, %v394_v29  ;;  %v172_v42 = vld [vmem:[#allocation7 + $0x10] sm:$0xff] }
 0x289   :  { %v434_v52 = vpack.c.bf16 %v432_v43, %v431_v49  ;;  %v170_v43 = vld [vmem:[#allocation7] sm:$0xff] }
 0x28a   :  { %v433_v50 = vpack.c.bf16 %v430_v48, %v429_v44  ;;  %v171_v44 = vld [vmem:[#allocation7 + $0x8] sm:$0xff] }
 0x28c   :  { %5517 = vmatprep.mubr.bf16.mxu1 %v433_v50 }
 0x28d   :  { %5518 = vmatmul.mubr.bf16.vlgmr.msra.gmra.mxu1 %v434_v52 }
 0x34d   :  { %v5519_v55 = vpop.f32.mrf.mxu1 }
 0x34e   :  { %v530_v56 = vadd.f32 %v5519_v55, %v438_v54 }
 0x34f   :  { %v521_v57 = vpop.f32.mrf.mxu1 }
 0x350   :  { %v522_v58 = vadd.f32 %v521_v57, %v438_v54  ;;  %v538_v60 = vmul.f32 0.5, %v530_v56 }
 0x351   :  { %v5520_v59 = vpop.f32.mrf.mxu1 }
 0x352   :  { %v536_v61 = vmul.f32 0.5, %v522_v58  ;;  %v533_v62 = vadd.f32 %v5520_v59, %v438_v54  ;;  %v6854_v5 = vadd.f32 %v538_v60, %v6764_v1 }
 0x353   :  { %v524_v63 = vpop.f32.mrf.mxu1 }
 0x354   :  { %v6851_v3 = vadd.f32 %v536_v61, %v6762_v0  ;;  %v525_v4 = vadd.f32 %v524_v63, %v438_v54  ;;  %v539_v7 = vmul.f32 0.5, %v533_v62  ;;  %v550_v12 = vsel %vm250_vm0, %v6854_v5, 0.0 }
 0x355   :  { %v6929_v62 = vsub.s32 3, %v6798_v45 }
 0x356   :  { %v537_v8 = vmul.f32 0.5, %v525_v4  ;;  %v544_v9 = vsel %vm250_vm0, %v6851_v3, 0.0  ;;  %v6862_v11 = vadd.f32 %v539_v7, %v6774_v6 }
 0x357   :  { %545 = vadd.xlane.f32.xlu0 %v544_v9  ;;  %v599_v7 = vrot.slane %v6806_v47, %v6929_v62 }
 0x358   :  { %v6859_v10 = vadd.f32 %v537_v8, %v6766_v2  ;;  %v553_v1 = vsel %vm250_vm0, %v6862_v11, 0.0  ;;  %v6935_v8 = vsub.s32 4, %v6798_v45 }
 0x35a   :  { %v547_v0 = vsel %vm250_vm0, %v6859_v10, 0.0 }
 0x35b   :  { %548 = vadd.xlane.f32.xlu1 %v547_v0  ;;  %551 = vadd.xlane.f32.xlu0 %v550_v12 }
 0x35f   :  { %554 = vadd.xlane.f32.xlu1 %v553_v1  ;;  %v607_v1 = vrot.slane %v6806_v47, %v6935_v8 }
 0x3e0   :  { %v546_v13 = vpop.xlane.xlu0 %545 }
 0x3e1   :  { %v556_v14 = vmul.f32 0.015625, %v546_v13 }
 0x3e3   :  { %v6871_v2 = vsub.f32 %v6851_v3, %v556_v14 }
 0x3e4   :  { %v549_v15 = vpop.xlane.xlu1 %548  ;;  %v552_v6 = vpop.xlane.xlu0 %551 }
 0x3e5   :  { %v557_v16 = vmul.f32 0.015625, %v549_v15  ;;  %v558_v17 = vmul.f32 0.015625, %v552_v6  ;;  %v564_v18 = vmul.f32 %v6871_v2, %v6871_v2 }
 0x3e7   :  { %v6876_v19 = vsub.f32 %v6859_v10, %v557_v16  ;;  %v6879_v20 = vsub.f32 %v6854_v5, %v558_v17  ;;  %v568_v21 = vsel %vm250_vm0, %v564_v18, 0.0 }
 0x3e8   :  { %v555_v22 = vpop.xlane.xlu1 %554  ;;  %569 = vadd.xlane.f32.xlu0 %v568_v21  ;;  %v5990_v21 = vld [vmem:[%s8304_s9 + $0x38] ss:$12 sps:$4 sm:$0xff]  }
 0x3e9   :  { %v559_v23 = vmul.f32 0.015625, %v555_v22  ;;  %v565_v24 = vmul.f32 %v6876_v19, %v6876_v19  ;;  %v566_v25 = vmul.f32 %v6879_v20, %v6879_v20 }
 0x3eb   :  { %v6887_v26 = vsub.f32 %v6862_v11, %v559_v23  ;;  %v571_v27 = vsel %vm250_vm0, %v565_v24, 0.0  ;;  %v574_v28 = vsel %vm250_vm0, %v566_v25, 0.0  ;;  %v5992_v25 = vld [vmem:[%s8304_s9 + $0x8] ss:$12 sps:$4 sm:$0xff]  }
 0x3ec   :  { %572 = vadd.xlane.f32.xlu1 %v571_v27  ;;  %575 = vadd.xlane.f32.xlu0 %v574_v28 }
 0x3ed   :  { %v567_v29 = vmul.f32 %v6887_v26, %v6887_v26 }
 0x3ef   :  { %v577_v30 = vsel %vm250_vm0, %v567_v29, 0.0 }
 0x3f0   :  { %578 = vadd.xlane.f32.xlu1 %v577_v30 }
 0x401   :  { %833 = vrot.lane.b32.xlu1 %v173_v41, %s6599_s5 }
 0x402   :  { %831 = vrot.lane.b32.xlu0 %v172_v42, %s6599_s5 }
 0x405   :  { %827 = vrot.lane.b32.xlu1 %v170_v43, %s6599_s5 }
 0x409   :  { %829 = vrot.lane.b32.xlu1 %v171_v44, %s6599_s5 }
 0x471   :  { %v570_v48 = vpop.xlane.xlu0 %569 }
 0x472   :  { %v580_v49 = vmul.f32 0.015625, %v570_v48  ;;  %v5993_v48 = vld [vmem:[%s8341_s28] sm:$0xff]  }
 0x473   :  { %5537 = vmatprep.mubr.msk.bf16.mxu1 %vm969_vm1, %v5993_v48 }
 0x474   :  { %v584_v50 = vadd.f32 1e-05, %v580_v49 }
 0x475   :  { %v573_v52 = vpop.xlane.xlu1 %572  ;;  %v576_v54 = vpop.xlane.xlu0 %575 }
 0x476   :  { %6119 = vrsqrt.f32 %v584_v50  ;;  %v581_v55 = vmul.f32 0.015625, %v573_v52  ;;  %v582_v56 = vmul.f32 0.015625, %v576_v54  ;;  %v643_v50 = vrot.slane %v630_v31, %v6846_v53 }
 0x478   :  { %v585_v57 = vadd.f32 1e-05, %v581_v55  ;;  %v586_v58 = vadd.f32 1e-05, %v582_v56 }
 0x479   :  { %v579_v59 = vpop.xlane.xlu1 %578  ;;  %v6962_v38 = vpop.permute.xlu0 %831 }
 0x47a   :  { %6121 = vrsqrt.f32 %v585_v57  ;;  %v583_v60 = vmul.f32 0.015625, %v579_v59 }
 0x47b   :  { %6123 = vrsqrt.f32 %v586_v58 }
 0x47c   :  { %v587_v61 = vadd.f32 1e-05, %v583_v60 }
 0x47d   :  { %v6956_v30 = vpop.permute.xlu1 %833 }
 0x47e   :  { %6125 = vrsqrt.f32 %v587_v61 }
 0x481   :  { %v6968_v42 = vpop.permute.xlu1 %827 }
 0x483   :  { %v6120_v63 = vpop.eup %6119 }
 0x484   :  { %v592_v4 = vmul.f32 %v6120_v63, %v6871_v2 }
 0x485   :  { %v6984_v58 = vpop.permute.xlu1 %829 }
 0x486   :  { %v600_v12 = vmul.f32 %v599_v7, %v592_v4 }
 0x487   :  { %v6122_v9 = vpop.eup %6121 }
 0x488   :  { %v593_v0 = vmul.f32 %v6122_v9, %v6876_v19  ;;  %v6124_v13 = vpop.eup %6123  ;;  %v608_v6 = vadd.f32 %v607_v1, %v600_v12 }
 0x489   :  { %v594_v2 = vmul.f32 %v6124_v13, %v6879_v20  ;;  %v5991_v20 = vld [vmem:[%s8304_s9 + $0x20] ss:$12 sps:$4 sm:$0xff]  }
 0x48a   :  { %v601_v14 = vmul.f32 %v599_v7, %v593_v0 }
 0x48b   :  { %v6126_v15 = vpop.eup %6125  ;;  %v602_v19 = vmul.f32 %v599_v7, %v594_v2 }
 0x48c   :  { %v609_v16 = vadd.f32 %v607_v1, %v601_v14  ;;  %v595_v17 = vmul.f32 %v6126_v15, %v6887_v26 }
 0x48d   :  { %v610_v23 = vadd.f32 %v607_v1, %v602_v19  ;;  %v5998_v19 = vld [vmem:[%s8341_s28 + $0x28] sm:$0xff]  }
 0x48e   :  { %v628_v18 = vpack.c.bf16 %v609_v16, %v608_v6  ;;  %v603_v22 = vmul.f32 %v599_v7, %v595_v17  ;;  %v5994_v17 = vld [vmem:[%s8341_s28 + $0x8] sm:$0xff]  }
 0x490   :  { %4997 = vmatmul.mubr.msk.bf16.vlgmr.msra.gmra.mxu0 %vm250_vm0, %v628_v18  ;;  %v611_v47 = vadd.f32 %v607_v1, %v603_v22  ;;  %v5997_v22 = vld [vmem:[%s8341_s28 + $0x20] sm:$0xff]  }
 0x491   :  { %5522 = vmatpush3.bf16.msra.mxu0 %v5989_v40  ;;  %759 = vmatprep.mubr.bf16.mxu0 %v8321_v35 }
 0x492   :  { %5523 = vmatprep.subr.bf16.mxu0 %v5990_v21  ;;  %v629_v24 = vpack.c.bf16 %v611_v47, %v610_v23  ;;  %v5999_v47 = vld [vmem:[%s8341_s28 + $0x30] sm:$0xff]  }
 0x495   :  { %5524 = vmatpush3.bf16.msra.mxu0 %v5990_v21  ;;  %v5996_v21 = vld [vmem:[%s8341_s28 + $0x18] sm:$0xff]  }
 0x496   :  { %5525 = vmatprep.subr.bf16.mxu0 %v5991_v20 }
 0x498   :  { %4998 = vmatmul.mubr.msk.bf16.gmra.mxu0 %vm250_vm0, %v629_v24 }
 0x499   :  { %5526 = vmatpush3.bf16.msra.mxu0 %v5991_v20  ;;  %5529 = vmatprep.mubr.msk.bf16.mxu0 %vm250_vm0, %v628_v18  ;;  %v5995_v18 = vld [vmem:[%s8341_s28 + $0x10] sm:$0xff]   ;;  %v6000_v20 = vld [vmem:[%s8341_s28 + $0x38] sm:$0xff]  }
 0x49a   :  { %5527 = vmatprep.subr.bf16.mxu0 %v5992_v25 }
 0x49d   :  { %5528 = vmatpush3.bf16.msra.mxu0 %v5992_v25  ;;  %v169_v25 = vld [vmem:[#allocation5 + $0x18] sm:$0xff] }
 0x4a0   :  { %5530 = vmatmul.mubr.msk.bf16.vlgmr.msra.gmra.mxu0 %vm250_vm0, %v629_v24  ;;  %v168_v24 = vld [vmem:[#allocation5 + $0x10] sm:$0xff] }
 0x4a1   :  { %5557 = vmatprep.mubr.msk.bf16.mxu0 %vm969_vm1, %v5993_v48 }
 0x550   :  { %v751_v26 = vpop.f32.mrf.mxu0 }
 0x551   :  { %v6974_v49 = vadd.f32 %v751_v26, %v635_v37 }
 0x552   :  { %v753_v27 = vpop.f32.mrf.mxu0 }
 0x553   :  { %v6964_v40 = vadd.f32 %v753_v27, %v639_v33  ;;  %v839_v60 = vmul.f32 %v6968_v42, %v6974_v49 }
 0x554   :  { %v755_v28 = vpop.f32.mrf.mxu0 }
 0x555   :  { %v867_v56 = vmul.f32 %v6968_v42, %v6964_v40  ;;  %v756_v9 = vadd.f32 %v755_v28, %v635_v37 }
 0x556   :  { %v757_v29 = vpop.f32.mrf.mxu0 }
 0x557   :  { %v758_v54 = vadd.f32 %v757_v29, %v639_v33  ;;  %v840_v16 = vmul.f32 %v6984_v58, %v756_v9 }
 0x558   :  { %v761_v32 = vpop.f32.mrf.mxu0 }
 0x559   :  { %v6988_v61 = vadd.f32 %v761_v32, %v635_v37  ;;  %v868_v7 = vmul.f32 %v6984_v58, %v758_v54 }
 0x55a   :  { %v763_v34 = vpop.f32.mrf.mxu0 }
 0x55b   :  { %v6959_v36 = vadd.f32 %v763_v34, %v639_v33  ;;  %v841_v15 = vmul.f32 %v6962_v38, %v6988_v61  ;;  %v167_v34 = vld [vmem:[#allocation5 + $0x8] sm:$0xff] }
 0x55c   :  { %v765_v39 = vpop.f32.mrf.mxu0 }
 0x55d   :  { %v869_v41 = vmul.f32 %v6962_v38, %v6959_v36  ;;  %v766_v6 = vadd.f32 %v765_v39, %v635_v37  ;;  %v865_v26 = vmul.f32 %v6959_v36, %v168_v24  ;;  %v864_v39 = vmul.f32 %v758_v54, %v167_v34 }
 0x55e   :  { %v767_v43 = vpop.f32.mrf.mxu0 }
 0x55f   :  { %v768_v44 = vadd.f32 %v767_v43, %v639_v33  ;;  %879 = vrot.lane.b32.xlu0 %v869_v41, %s6599_s5  ;;  %v842_v2 = vmul.f32 %v6956_v30, %v766_v6  ;;  %v166_v33 = vld [vmem:[#allocation5] sm:$0xff]  ;;  %v822_v54 = vmul.f32 %v766_v6, %v169_v25 }
 0x560   :  { %v5531_v52 = vpop.f32.mrf.mxu0  ;;  %v863_v37 = vmul.f32 %v6964_v40, %v166_v33  ;;  %v819_v36 = vmul.f32 %v6974_v49, %v166_v33  ;;  %v821_v40 = vmul.f32 %v6988_v61, %v168_v24 }
 0x561   :  { %v870_v55 = vmul.f32 %v6956_v30, %v768_v44  ;;  %v813_v63 = vadd.f32 %v5531_v52, %v643_v50  ;;  %v866_v27 = vmul.f32 %v768_v44, %v169_v25  ;;  %v820_v44 = vmul.f32 %v756_v9, %v167_v34 }
 0x562   :  { %v804_v57 = vpop.f32.mrf.mxu0 }
 0x563   :  { %881 = vrot.lane.b32.xlu1 %v870_v55, %s6599_s5  ;;  %875 = vrot.lane.b32.xlu0 %v867_v56, %s6599_s5  ;;  %v805_v12 = vadd.f32 %v804_v57, %v643_v50 }
 0x564   :  { %v5532_v59 = vpop.f32.mrf.mxu0 }
 0x565   :  { %v816_v4 = vadd.f32 %v5532_v59, %v643_v50 }
 0x566   :  { %v807_v0 = vpop.f32.mrf.mxu0 }
 0x567   :  { %v1156_v1 = vpack.c.bf16 %v816_v4, %v813_v63  ;;  %v808_v13 = vadd.f32 %v807_v0, %v643_v50  ;;  %847 = vrot.lane.b32.xlu0 %v839_v60, %s6599_s5  ;;  %877 = vrot.lane.b32.xlu1 %v868_v7, %s6599_s5 }
 0x569   :  { %v1155_v14 = vpack.c.bf16 %v808_v13, %v805_v12  ;;  %5553 = vmatprep.subr.bf16.mxu0 %v1156_v1 }
 0x56a   :  { %5554 = vmatpush3.bf16.msra.mxu0 %v1156_v1  ;;  %v7047_v1 = vld [vmem:[#allocation10] sm:$0xff]  }
 0x56b   :  { %5555 = vmatprep.subr.bf16.mxu0 %v1155_v14  ;;  %851 = vrot.lane.b32.xlu0 %v841_v15, %s6599_s5 }
 0x56c   :  { %849 = vrot.lane.b32.xlu1 %v840_v16, %s6599_s5 }
 0x56e   :  { %5556 = vmatpush3.bf16.msra.mxu0 %v1155_v14 }
 0x570   :  { %853 = vrot.lane.b32.xlu1 %v842_v2, %s6599_s5 }
 0x571   :  { %5558 = vmatmul.mubr.msk.bf16.vlgmr.msra.gmra.mxu0 %vm969_vm1, %v5994_v17 }
 0x572   :  { %5561 = vmatprep.mubr.msk.bf16.mxu0 %vm969_vm1, %v5995_v18 }
 0x579   :  { %5562 = vmatmul.mubr.msk.bf16.gmra.mxu0 %vm969_vm1, %v5996_v21 }
 0x57a   :  { %5565 = vmatprep.mubr.msk.bf16.mxu0 %vm969_vm1, %v5997_v22 }
 0x581   :  { %5566 = vmatmul.mubr.msk.bf16.gmra.mxu0 %vm969_vm1, %v5998_v19 }
 0x582   :  { %5569 = vmatprep.mubr.msk.bf16.mxu0 %vm969_vm1, %v5999_v47 }
 0x589   :  { %5570 = vmatmul.mubr.msk.bf16.gmra.mxu0 %vm969_vm1, %v6000_v20 }
 0x5d1   :  { %v880_v23 = vpop.permute.xlu0 %879 }
 0x5d2   :  { %v889_v31 = vadd.f32 %v880_v23, %v865_v26 }
 0x5d5   :  { %v876_v28 = vpop.permute.xlu0 %875  ;;  %v882_v29 = vpop.permute.xlu1 %881 }
 0x5d6   :  { %v890_v32 = vadd.f32 %v882_v29, %v866_v27  ;;  %v887_v48 = vadd.f32 %v876_v28, %v863_v37  ;;  %v7055_v28 = vld [vmem:[%s8342_s4 + $0x38] sm:$0xff]  }
 0x5d8   :  { %v928_v41 = vpack.c.bf16 %v890_v32, %v889_v31  ;;  %v7060_v32 = vld [vmem:[%s8342_s4 + $0x30] sm:$0xff]  }
 0x5d9   :  { %v878_v43 = vpop.permute.xlu1 %877  ;;  %v848_v50 = vpop.permute.xlu0 %847 }
 0x5da   :  { %v888_v52 = vadd.f32 %v878_v43, %v864_v39  ;;  %5533 = vmatprep.subr.bf16.mxu1 %v928_v41  ;;  %v859_v57 = vadd.f32 %v848_v50, %v819_v36  ;;  %v7078_v36 = vld [vmem:[%s8342_s4 + $0x18] sm:$0xff]  }
 0x5db   :  { %5534 = vmatpush3.bf16.msra.mxu1 %v928_v41  ;;  %v7066_v41 = vld [vmem:[%s8342_s4 + $0x28] sm:$0xff]  }
 0x5dc   :  { %v927_v55 = vpack.c.bf16 %v888_v52, %v887_v48  ;;  %v7073_v52 = vld [vmem:[%s8342_s4 + $0x20] sm:$0xff]  }
 0x5dd   :  { %v852_v60 = vpop.permute.xlu0 %851 }
 0x5de   :  { %v850_v56 = vpop.permute.xlu1 %849  ;;  %5535 = vmatprep.subr.bf16.mxu1 %v927_v55  ;;  %v7033_v7 = vadd.f32 %v852_v60, %v821_v40 }
 0x5df   :  { %v860_v59 = vadd.f32 %v850_v56, %v820_v44  ;;  %5536 = vmatpush3.bf16.msra.mxu1 %v927_v55 }
 0x5e1   :  { %v5918_v63 = vpack.i.bf16 %v860_v59, %v859_v57 }
 0x5e2   :  { %v854_v4 = vpop.permute.xlu1 %853  ;;  %5538 = vmatmul.mubr.msk.bf16.vlgmr.msra.gmra.mxu1 %vm969_vm1, %v5994_v17 }
 0x5e3   :  { %v7035_v0 = vadd.f32 %v854_v4, %v822_v54  ;;  %5919 = vrot.lane.b32.xlu0 %v5918_v63, %s6599_s5  ;;  %5541 = vmatprep.mubr.msk.bf16.mxu1 %vm969_vm1, %v5995_v18  ;;  %v7090_v54 = vld [vmem:[%s8342_s4 + $0x8] sm:$0xff]  }
 0x5e5   :  { %v5923_v49 = vpack.i.bf16 %v7035_v0, %v7033_v7 }
 0x5e7   :  { %5924 = vrot.lane.b32.xlu1 %v5923_v49, %s6599_s5 }
 0x5ea   :  { %5542 = vmatmul.mubr.msk.bf16.gmra.mxu1 %vm969_vm1, %v5996_v21 }
 0x5eb   :  { %5545 = vmatprep.mubr.msk.bf16.mxu1 %vm969_vm1, %v5997_v22 }
 0x5f2   :  { %5546 = vmatmul.mubr.msk.bf16.gmra.mxu1 %vm969_vm1, %v5998_v19 }
 0x5f3   :  { %5549 = vmatprep.mubr.msk.bf16.mxu1 %vm969_vm1, %v5999_v47 }
 0x5fa   :  { %5550 = vmatmul.mubr.msk.bf16.gmra.mxu1 %vm969_vm1, %v6000_v20 }
 0x655   :  { %v5920_v61 = vpop.permute.xlu0 %5919 }
 0x656   :  { %v5922_v9 = vunpack.i.h.bf16 %v5920_v61  ;;  %v5921_v12 = vunpack.i.l.bf16 %v5920_v61 }
 0x658   :  { %v907_v13 = vsel %vm250_vm0, %v859_v57, %v5921_v12  ;;  %v908_v14 = vsel %vm250_vm0, %v860_v59, %v5922_v9  ;;  %v7085_v59 = vld [vmem:[%s8342_s4 + $0x10] sm:$0xff]   ;;  %v7097_v12 = vld [vmem:[%s8342_s4] sm:$0xff]  }
 0x659   :  { %v911_v15 = vpack.c.bf16 %v908_v14, %v907_v13  ;;  %v5925_v60 = vpop.permute.xlu1 %5924 }
 0x65a   :  { %v5927_v4 = vunpack.i.h.bf16 %v5925_v60  ;;  %v5926_v49 = vunpack.i.l.bf16 %v5925_v60 }
 0x65b   :  { %v925_v6 = vmul.bf16 %v7047_v1, %v911_v15 }
 0x65c   :  { %v910_v13 = vsel %vm250_vm0, %v7035_v0, %v5927_v4  ;;  %v909_v14 = vsel %vm250_vm0, %v7033_v7, %v5926_v49 }
 0x65d   :  { %5589 = vmatprep.mubr.bf16.mxu1 %v925_v6  ;;  %v7104_v6 = vld [vmem:[#allocation10 + $0x8] sm:$0xff]  }
 0x6a2   :  { %v5539_v16 = vpop.f32.mrf.mxu1 }
 0x6a4   :  { %v1028_v2 = vpop.f32.mrf.mxu1 }
 0x6a6   :  { %v5540_v17 = vpop.f32.mrf.mxu1 }
 0x6a7   :  { %v1092_v40 = vpack.c.bf16 %v5540_v17, %v5539_v16  ;;  %v912_v16 = vpack.c.bf16 %v910_v13, %v909_v14 }
 0x6a8   :  { %v1031_v18 = vpop.f32.mrf.mxu1 }
 0x6a9   :  { %v1148_v61 = vmul.bf16 %v7090_v54, %v1092_v40  ;;  %v1091_v9 = vpack.c.bf16 %v1031_v18, %v1028_v2  ;;  %v926_v2 = vmul.bf16 %v7104_v6, %v912_v16  ;;  %v174_v18 = vld [vmem:[#allocation8] sm:$0xff] }
 0x6aa   :  { %v5543_v21 = vpop.f32.mrf.mxu1 }
 0x6ab   :  { %v1147_v15 = vmul.bf16 %v7097_v12, %v1091_v9 }
 0x6ac   :  { %v1044_v22 = vpop.f32.mrf.mxu1 }
 0x6ae   :  { %v5544_v19 = vpop.f32.mrf.mxu1 }
 0x6af   :  { %v1094_v55 = vpack.c.bf16 %v5544_v19, %v5543_v21  ;;  %v176_v21 = vld [vmem:[#allocation8 + $0x10] sm:$0xff] }
 0x6b0   :  { %v1047_v47 = vpop.f32.mrf.mxu1 }
 0x6b1   :  { %v1150_v56 = vmul.bf16 %v7078_v36, %v1094_v55  ;;  %v1093_v57 = vpack.c.bf16 %v1047_v47, %v1044_v22  ;;  %v175_v47 = vld [vmem:[#allocation8 + $0x8] sm:$0xff] }
 0x6b2   :  { %v5547_v20 = vpop.f32.mrf.mxu1 }
 0x6b3   :  { %v1149_v63 = vmul.bf16 %v7085_v59, %v1093_v57 }
 0x6b4   :  { %v1060_v23 = vpop.f32.mrf.mxu1 }
 0x6b6   :  { %v5548_v24 = vpop.f32.mrf.mxu1 }
 0x6b7   :  { %v1096_v39 = vpack.c.bf16 %v5548_v24, %v5547_v20 }
 0x6b8   :  { %v1063_v25 = vpop.f32.mrf.mxu1 }
 0x6b9   :  { %v1152_v48 = vmul.bf16 %v7066_v41, %v1096_v39  ;;  %v1095_v50 = vpack.c.bf16 %v1063_v25, %v1060_v23  ;;  %v177_v23 = vld [vmem:[#allocation8 + $0x18] sm:$0xff] }
 0x6ba   :  { %v5551_v26 = vpop.f32.mrf.mxu1 }
 0x6bb   :  { %v1151_v44 = vmul.bf16 %v7073_v52, %v1095_v50 }
 0x6bc   :  { %v1076_v27 = vpop.f32.mrf.mxu1 }
 0x6be   :  { %v5552_v29 = vpop.f32.mrf.mxu1 }
 0x6bf   :  { %v1098_v31 = vpack.c.bf16 %v5552_v29, %v5551_v26 }
 0x6c0   :  { %v1079_v33 = vpop.f32.mrf.mxu1 }
 0x6c1   :  { %v1154_v34 = vmul.bf16 %v7055_v28, %v1098_v31  ;;  %v1097_v37 = vpack.c.bf16 %v1079_v33, %v1076_v27 }
 0x6c3   :  { %v1153_v43 = vmul.bf16 %v7060_v32, %v1097_v37  ;;  %5573 = vmatprep.subr.bf16.mxu1 %v1154_v34 }
 0x6c4   :  { %5574 = vmatpush3.bf16.msra.mxu1 %v1154_v34 }
 0x6c5   :  { %5575 = vmatprep.subr.bf16.mxu1 %v1153_v43 }
 0x6c8   :  { %5576 = vmatpush3.bf16.msra.mxu1 %v1153_v43 }
 0x6c9   :  { %5577 = vmatprep.subr.bf16.mxu1 %v1152_v48 }
 0x6cc   :  { %5578 = vmatpush3.bf16.msra.mxu1 %v1152_v48 }
 0x6cd   :  { %5579 = vmatprep.subr.bf16.mxu1 %v1151_v44 }
 0x6d0   :  { %5580 = vmatpush3.bf16.msra.mxu1 %v1151_v44 }
 0x6d1   :  { %5581 = vmatprep.subr.bf16.mxu1 %v1150_v56 }
 0x6d4   :  { %5582 = vmatpush3.bf16.msra.mxu1 %v1150_v56 }
 0x6d5   :  { %5583 = vmatprep.subr.bf16.mxu1 %v1149_v63 }
 0x6d8   :  { %5584 = vmatpush3.bf16.msra.mxu1 %v1149_v63 }
 0x6d9   :  { %5585 = vmatprep.subr.bf16.mxu1 %v1148_v61 }
 0x6dc   :  { %5586 = vmatpush3.bf16.msra.mxu1 %v1148_v61 }
 0x6dd   :  { %5587 = vmatprep.subr.bf16.mxu1 %v1147_v15 }
 0x6e0   :  { %5588 = vmatpush3.bf16.msra.mxu1 %v1147_v15 }
 0x6e3   :  { %5590 = vmatmul.mubr.bf16.vlgmr.msra.gmra.mxu1 %v926_v2 }
 0x7a3   :  { %v5591_v17 = vpop.f32.mrf.mxu1 }
 0x7a4   :  { %v1313_v20 = vadd.f32 %v5591_v17, %v176_v21 }
 0x7a5   :  { %v1304_v22 = vpop.f32.mrf.mxu1 }
 0x7a6   :  { %v1305_v19 = vadd.f32 %v1304_v22, %v174_v18  ;;  %v1325_v29 = vsel %vm250_vm0, %v1313_v20, -inf }
 0x7a7   :  { %v5592_v0 = vpop.f32.mrf.mxu1 }
 0x7a8   :  { %v1319_v7 = vsel %vm250_vm0, %v1305_v19, -inf  ;;  %v1316_v26 = vadd.f32 %v5592_v0, %v177_v23 }
 0x7a9   :  { %v1307_v24 = vpop.f32.mrf.mxu1  ;;  %1320 = vmax.xlane.f32.xlu0 %v1319_v7 }
 0x7aa   :  { %v1308_v25 = vadd.f32 %v1307_v24, %v175_v47  ;;  %v1328_v31 = vsel %vm250_vm0, %v1316_v26, -inf }
 0x7ac   :  { %v1322_v27 = vsel %vm250_vm0, %v1308_v25, -inf }
 0x7ad   :  { %1323 = vmax.xlane.f32.xlu1 %v1322_v27  ;;  %1326 = vmax.xlane.f32.xlu0 %v1325_v29 }
 0x7b1   :  { %1329 = vmax.xlane.f32.xlu0 %v1328_v31 }
 0x832   :  { %v1321_v33 = vpop.xlane.xlu0 %1320 }
 0x833   :  { %v1331_v39 = vsub.f32 %v1305_v19, %v1321_v33 }
 0x835   :  { %v1335_v55 = vmul.f32 1.442695, %v1331_v39 }
 0x836   :  { %v1327_v34 = vpop.xlane.xlu0 %1326  ;;  %v1324_v44 = vpop.xlane.xlu1 %1323 }
 0x837   :  { %v1333_v37 = vsub.f32 %v1313_v20, %v1327_v34  ;;  %v1332_v57 = vsub.f32 %v1308_v25, %v1324_v44 }
 0x839   :  { %v1339_v43 = vmul.f32 1.442695, %v1333_v37  ;;  %v1337_v60 = vmul.f32 1.442695, %v1332_v57 }
 0x83a   :  { %v1330_v48 = vpop.xlane.xlu0 %1329 }
 0x83b   :  { %v1334_v50 = vsub.f32 %v1316_v26, %v1330_v48  ;;  %6127 = vpow2.f32 %v1339_v43  ;;  %v5559_v48 = vpop.f32.mrf.mxu0 }
 0x83d   :  { %v1341_v56 = vmul.f32 1.442695, %v1334_v50  ;;  %v1191_v50 = vpop.f32.mrf.mxu0 }
 0x83f   :  { %6129 = vpow2.f32 %v1341_v56 }
 0x840   :  { %6131 = vpow2.f32 %v1335_v55  ;;  %v5560_v55 = vpop.f32.mrf.mxu0 }
 0x841   :  { %6133 = vpow2.f32 %v1337_v60 }
 0x842   :  { %v1194_v44 = vpop.f32.mrf.mxu0 }
 0x844   :  { %v5563_v56 = vpop.f32.mrf.mxu0 }
 0x846   :  { %v1207_v57 = vpop.f32.mrf.mxu0 }
 0x848   :  { %v7111_v40 = vpop.eup %6127  ;;  %v5564_v60 = vpop.f32.mrf.mxu0 }
 0x849   :  { %1412 = vrot.lane.b32.xlu0 %v7111_v40, %s6605_s6  ;;  %1376 = vrot.lane.b32.xlu1 %v7111_v40, %s6606_s25  ;;  %v1350_v9 = vsel %vm1343_vm2, %v7111_v40, 0.0 }
 0x84c   :  { %v7117_v63 = vpop.eup %6129 }
 0x84d   :  { %v7119_v4 = vpop.eup %6131  ;;  %1378 = vrot.lane.b32.xlu1 %v7117_v63, %s6606_s25  ;;  %v1353_v13 = vsel %vm1343_vm2, %v7117_v63, 0.0 }
 0x84e   :  { %1372 = vrot.lane.b32.xlu0 %v7119_v4, %s6606_s25  ;;  %v7129_v49 = vpop.eup %6133  ;;  %v1344_v61 = vsel %vm1343_vm2, %v7119_v4, 0.0 }
 0x84f   :  { %v1347_v14 = vsel %vm1343_vm2, %v7129_v49, 0.0 }
 0x851   :  { %1414 = vrot.lane.b32.xlu1 %v7117_v63, %s6605_s6 }
 0x852   :  { %1408 = vrot.lane.b32.xlu0 %v7119_v4, %s6605_s6 }
 0x855   :  { %1374 = vrot.lane.b32.xlu1 %v7129_v49, %s6606_s25 }
 0x856   :  { %1444 = vrot.lane.b32.xlu0 %v7119_v4, %s6607_s26 }
 0x859   :  { %1410 = vrot.lane.b32.xlu1 %v7129_v49, %s6605_s6 }
 0x85a   :  { %1448 = vrot.lane.b32.xlu0 %v7111_v40, %s6607_s26 }
 0x85d   :  { %1446 = vrot.lane.b32.xlu1 %v7129_v49, %s6607_s26 }
 0x861   :  { %1450 = vrot.lane.b32.xlu1 %v7117_v63, %s6607_s26 }
 0x879   :  { %1345 = vadd.xlane.f32.xlu0 %v1344_v61  ;;  %v1210_v61 = vpop.f32.mrf.mxu0 }
 0x87d   :  { %1351 = vadd.xlane.f32.xlu0 %v1350_v9  ;;  %v5567_v9 = vpop.f32.mrf.mxu0 }
 0x885   :  { %1354 = vadd.xlane.f32.xlu1 %v1353_v13  ;;  %v1223_v13 = vpop.f32.mrf.mxu0 }
 0x889   :  { %1348 = vadd.xlane.f32.xlu1 %v1347_v14  ;;  %v5568_v14 = vpop.f32.mrf.mxu0 }
 0x8bb   :  { %v1377_v15 = vpop.permute.xlu1 %1376  ;;  %v1413_v16 = vpop.permute.xlu0 %1412 }
 0x8bc   :  { %v1390_v2 = vsel %vm1343_vm2, %v1377_v15, 0.0  ;;  %v1426_v22 = vsel %vm1343_vm2, %v1413_v16, 0.0  ;;  %v1226_v15 = vpop.f32.mrf.mxu0 }
 0x8bd   :  { %1391 = vadd.xlane.f32.xlu0 %v1390_v2 }
 0x8be   :  { %v5571_v16 = vpop.f32.mrf.mxu0 }
 0x8bf   :  { %v1379_v17 = vpop.permute.xlu1 %1378 }
 0x8c0   :  { %v1373_v18 = vpop.permute.xlu0 %1372  ;;  %v1393_v21 = vsel %vm1343_vm2, %v1379_v17, 0.0  ;;  %v1239_v2 = vpop.f32.mrf.mxu0 }
 0x8c1   :  { %1394 = vadd.xlane.f32.xlu1 %v1393_v21  ;;  %1427 = vadd.xlane.f32.xlu0 %v1426_v22  ;;  %v1384_v20 = vsel %vm1343_vm2, %v1373_v18, 0.0  ;;  %v1259_v22 = vpack.c.bf16 %v5568_v14, %v5567_v9 }
 0x8c2   :  { %v5572_v17 = vpop.f32.mrf.mxu0 }
 0x8c3   :  { %v1415_v19 = vpop.permute.xlu1 %1414  ;;  %v1261_v18 = vpack.c.bf16 %v5572_v17, %v5571_v16 }
 0x8c4   :  { %v1409_v0 = vpop.permute.xlu0 %1408  ;;  %v1429_v47 = vsel %vm1343_vm2, %v1415_v19, 0.0  ;;  %v1242_v21 = vpop.f32.mrf.mxu0 }
 0x8c5   :  { %1430 = vadd.xlane.f32.xlu1 %v1429_v47  ;;  %1385 = vadd.xlane.f32.xlu0 %v1384_v20  ;;  %v1420_v23 = vsel %vm1343_vm2, %v1409_v0, 0.0  ;;  %v1269_v19 = vmul.bf16 %v7055_v28, %v1261_v18  ;;  %v1260_v0 = vpack.c.bf16 %v1242_v21, %v1239_v2  ;;  %v1267_v20 = vmul.bf16 %v7066_v41, %v1259_v22 }
 0x8c6   :  { %v1255_v28 = vpack.c.bf16 %v5560_v55, %v5559_v48 }
 0x8c7   :  { %v1375_v7 = vpop.permute.xlu1 %1374  ;;  %v1268_v47 = vmul.bf16 %v7060_v32, %v1260_v0  ;;  %5593 = vmatprep.subr.bf16.mxu0 %v1269_v19 }
 0x8c8   :  { %v1445_v24 = vpop.permute.xlu0 %1444  ;;  %v1387_v33 = vsel %vm1343_vm2, %v1375_v7, 0.0  ;;  %5594 = vmatpush3.bf16.msra.mxu0 %v1269_v19  ;;  %v1258_v7 = vpack.c.bf16 %v1226_v15, %v1223_v13  ;;  %v1263_v41 = vmul.bf16 %v7090_v54, %v1255_v28 }
 0x8c9   :  { %1421 = vadd.xlane.f32.xlu0 %v1420_v23  ;;  %v1456_v27 = vsel %vm1343_vm2, %v1445_v24, 0.0  ;;  %5595 = vmatprep.subr.bf16.mxu0 %v1268_v47  ;;  %v1257_v23 = vpack.c.bf16 %v5564_v60, %v5563_v56 }
 0x8ca   :  { %v1266_v24 = vmul.bf16 %v7073_v52, %v1258_v7 }
 0x8cb   :  { %v1411_v25 = vpop.permute.xlu1 %1410 }
 0x8cc   :  { %v1423_v26 = vsel %vm1343_vm2, %v1411_v25, 0.0  ;;  %v1449_v34 = vpop.permute.xlu0 %1448  ;;  %5596 = vmatpush3.bf16.msra.mxu0 %v1268_v47  ;;  %v1265_v25 = vmul.bf16 %v7078_v36, %v1257_v23 }
 0x8cd   :  { %1424 = vadd.xlane.f32.xlu1 %v1423_v26  ;;  %1457 = vadd.xlane.f32.xlu0 %v1456_v27  ;;  %v1462_v43 = vsel %vm1343_vm2, %v1449_v34, 0.0  ;;  %v1256_v26 = vpack.c.bf16 %v1210_v61, %v1207_v57  ;;  %v1254_v27 = vpack.c.bf16 %v1194_v44, %v1191_v50 }
 0x8ce   :  { %5597 = vmatprep.subr.bf16.mxu0 %v1267_v20 }
 0x8cf   :  { %v1447_v29 = vpop.permute.xlu1 %1446  ;;  %v1264_v32 = vmul.bf16 %v7085_v59, %v1256_v26 }
 0x8d0   :  { %v1459_v31 = vsel %vm1343_vm2, %v1447_v29, 0.0  ;;  %5598 = vmatpush3.bf16.msra.mxu0 %v1267_v20  ;;  %v1262_v29 = vmul.bf16 %v7097_v12, %v1254_v27 }
 0x8d1   :  { %1460 = vadd.xlane.f32.xlu1 %v1459_v31  ;;  %1388 = vadd.xlane.f32.xlu0 %v1387_v33 }
 0x8d2   :  { %5599 = vmatprep.subr.bf16.mxu0 %v1266_v24 }
 0x8d3   :  { %v1451_v37 = vpop.permute.xlu1 %1450 }
 0x8d4   :  { %v1465_v39 = vsel %vm1343_vm2, %v1451_v37, 0.0  ;;  %5600 = vmatpush3.bf16.msra.mxu0 %v1266_v24 }
 0x8d5   :  { %1466 = vadd.xlane.f32.xlu1 %v1465_v39  ;;  %1463 = vadd.xlane.f32.xlu0 %v1462_v43 }
 0x8d6   :  { %5601 = vmatprep.subr.bf16.mxu0 %v1265_v25 }
 0x8d8   :  { %5602 = vmatpush3.bf16.msra.mxu0 %v1265_v25 }
 0x8d9   :  { %5603 = vmatprep.subr.bf16.mxu0 %v1264_v32 }
 0x8dc   :  { %5604 = vmatpush3.bf16.msra.mxu0 %v1264_v32 }
 0x8dd   :  { %5605 = vmatprep.subr.bf16.mxu0 %v1263_v41 }
 0x8e0   :  { %5606 = vmatpush3.bf16.msra.mxu0 %v1263_v41 }
 0x8e1   :  { %5607 = vmatprep.subr.bf16.mxu0 %v1262_v29 }
 0x8e4   :  { %5608 = vmatpush3.bf16.msra.mxu0 %v1262_v29 }
 0x902   :  { %v1346_v52 = vpop.xlane.xlu0 %1345 }
 0x903   :  { %v1356_v39 = vadd.f32 1e-30, %v1346_v52 }
 0x905   :  { %6135 = vrcp.f32 %v1356_v39 }
 0x906   :  { %v1352_v31 = vpop.xlane.xlu0 %1351 }
 0x907   :  { %v1358_v43 = vadd.f32 1e-30, %v1352_v31 }
 0x909   :  { %6137 = vrcp.f32 %v1358_v43 }
 0x90e   :  { %v1355_v36 = vpop.xlane.xlu1 %1354 }
 0x90f   :  { %v1359_v54 = vadd.f32 1e-30, %v1355_v36 }
 0x911   :  { %6139 = vrcp.f32 %v1359_v54 }
 0x912   :  { %v1349_v34 = vpop.xlane.xlu1 %1348  ;;  %v6136_v22 = vpop.eup %6135 }
 0x913   :  { %v1357_v50 = vadd.f32 1e-30, %v1349_v34 }
 0x915   :  { %6141 = vrcp.f32 %v1357_v50 }
 0x916   :  { %v6138_v47 = vpop.eup %6137 }
 0x917   :  { %v1365_v39 = vmul.f32 %v6138_v47, %v7111_v40 }
 0x91e   :  { %v6140_v23 = vpop.eup %6139 }
 0x922   :  { %v6142_v24 = vpop.eup %6141 }
 0x946   :  { %v1392_v33 = vpop.xlane.xlu0 %1391 }
 0x947   :  { %v1398_v55 = vadd.f32 1e-30, %v1392_v33 }
 0x949   :  { %6143 = vrcp.f32 %v1398_v55 }
 0x94a   :  { %v1428_v37 = vpop.xlane.xlu0 %1427  ;;  %v1395_v59 = vpop.xlane.xlu1 %1394 }
 0x94b   :  { %v1399_v12 = vadd.f32 1e-30, %v1395_v59  ;;  %v1434_v57 = vadd.f32 1e-30, %v1428_v37  ;;  %v1361_v37 = vmul.f32 %v6136_v22, %v7119_v4 }
 0x94d   :  { %6145 = vrcp.f32 %v1399_v12  ;;  %v1367_v12 = vmul.f32 %v6140_v23, %v7117_v63 }
 0x94e   :  { %v1386_v48 = vpop.xlane.xlu0 %1385  ;;  %v1431_v44 = vpop.xlane.xlu1 %1430  ;;  %6147 = vrcp.f32 %v1434_v57 }
 0x94f   :  { %v1435_v60 = vadd.f32 1e-30, %v1431_v44  ;;  %v1396_v61 = vadd.f32 1e-30, %v1386_v48  ;;  %v1363_v48 = vmul.f32 %v6142_v24, %v7129_v49 }
 0x951   :  { %6149 = vrcp.f32 %v1435_v60 }
 0x952   :  { %v1422_v56 = vpop.xlane.xlu0 %1421  ;;  %6151 = vrcp.f32 %v1396_v61 }
 0x953   :  { %v1432_v9 = vadd.f32 1e-30, %v1422_v56 }
 0x955   :  { %6153 = vrcp.f32 %v1432_v9 }
 0x956   :  { %v1425_v13 = vpop.xlane.xlu1 %1424  ;;  %v1458_v14 = vpop.xlane.xlu0 %1457 }
 0x957   :  { %v1433_v15 = vadd.f32 1e-30, %v1425_v13  ;;  %v1468_v16 = vadd.f32 1e-30, %v1458_v14  ;;  %v6144_v25 = vpop.eup %6143 }
 0x958   :  { %v1405_v33 = vmul.f32 %v6144_v25, %v7111_v40 }
 0x959   :  { %6155 = vrcp.f32 %v1433_v15 }
 0x95a   :  { %v1461_v2 = vpop.xlane.xlu1 %1460  ;;  %v1389_v17 = vpop.xlane.xlu0 %1388  ;;  %6157 = vrcp.f32 %v1468_v16  ;;  %v1482_v13 = vsel %vm1343_vm2, %v1365_v39, %v1405_v33 }
 0x95b   :  { %v1469_v18 = vadd.f32 1e-30, %v1461_v2  ;;  %v1397_v21 = vadd.f32 1e-30, %v1389_v17  ;;  %v6146_v26 = vpop.eup %6145  ;;  %v6011_v17 = vld [vmem:[%s8306_s11 + $0x18] sm:$0xff]  }
 0x95c   :  { %v6148_v28 = vpop.eup %6147  ;;  %v1407_v43 = vmul.f32 %v6146_v26, %v7117_v63  ;;  %5613 = vmatprep.subr.bf16.mxu1 %v6011_v17 }
 0x95d   :  { %6159 = vrcp.f32 %v1469_v18  ;;  %v1441_v56 = vmul.f32 %v6148_v28, %v7111_v40  ;;  %5614 = vmatpush3.bf16.msra.mxu1 %v6011_v17 }
 0x95e   :  { %6161 = vrcp.f32 %v1397_v21  ;;  %v1467_v19 = vpop.xlane.xlu1 %1466  ;;  %v1464_v0 = vpop.xlane.xlu0 %1463  ;;  %v1483_v2 = vsel %vm1343_vm2, %v1367_v12, %v1407_v43 }
 0x95f   :  { %v1471_v20 = vadd.f32 1e-30, %v1467_v19  ;;  %v1470_v7 = vadd.f32 1e-30, %v1464_v0  ;;  %v6150_v32 = vpop.eup %6149 }
 0x960   :  { %v6152_v41 = vpop.eup %6151  ;;  %v1443_v55 = vmul.f32 %v6150_v32, %v7117_v63 }
 0x961   :  { %6163 = vrcp.f32 %v1471_v20  ;;  %v1401_v31 = vmul.f32 %v6152_v41, %v7119_v4 }
 0x962   :  { %6165 = vrcp.f32 %v1470_v7  ;;  %v6154_v27 = vpop.eup %6153  ;;  %v1487_v19 = vsel %vm969_vm1, %v1483_v2, %v1443_v55  ;;  %v7227_v55 = vld [vmem:[%s8315_s20] sm:$0xff] }
 0x963   :  { %v1437_v59 = vmul.f32 %v6154_v27, %v7119_v4  ;;  %v1480_v61 = vsel %vm1343_vm2, %v1361_v37, %v1401_v31  ;;  %v6014_v37 = vld [vmem:[%s8306_s11] sm:$0xff]  }
 0x966   :  { %v6156_v29 = vpop.eup %6155 }
 0x967   :  { %v6158_v52 = vpop.eup %6157  ;;  %v1439_v44 = vmul.f32 %v6156_v29, %v7129_v49 }
 0x968   :  { %v1473_v50 = vmul.f32 %v6158_v52, %v7119_v4  ;;  %v1484_v4 = vsel %vm969_vm1, %v1480_v61, %v1437_v59 }
 0x96a   :  { %v6160_v36 = vpop.eup %6159  ;;  %v1489_v18 = vsel %vm1488_vm3, %v1484_v4, %v1473_v50 }
 0x96b   :  { %v6162_v34 = vpop.eup %6161  ;;  %v1475_v60 = vmul.f32 %v6160_v36, %v7129_v49 }
 0x96c   :  { %v1403_v54 = vmul.f32 %v6162_v34, %v7129_v49  ;;  %v6012_v49 = vld [vmem:[%s8306_s11 + $0x10] sm:$0xff]   ;;  %v6013_v34 = vld [vmem:[%s8306_s11 + $0x8] sm:$0xff]  }
 0x96d   :  { %5615 = vmatprep.subr.bf16.mxu1 %v6012_v49 }
 0x96e   :  { %v6164_v57 = vpop.eup %6163  ;;  %v1481_v9 = vsel %vm1343_vm2, %v1363_v48, %v1403_v54  ;;  %5616 = vmatpush3.bf16.msra.mxu1 %v6012_v49  ;;  %v7222_v54 = vsub.s32 5, %v6798_v45 }
 0x96f   :  { %v6166_v14 = vpop.eup %6165  ;;  %v1485_v15 = vsel %vm969_vm1, %v1481_v9, %v1439_v44  ;;  %v1479_v16 = vmul.f32 %v6164_v57, %v7117_v63  ;;  %v1486_v63 = vsel %vm969_vm1, %v1482_v13, %v1441_v56  ;;  %5617 = vmatprep.subr.bf16.mxu1 %v6013_v34 }
 0x970   :  { %v1490_v21 = vsel %vm1488_vm3, %v1485_v15, %v1475_v60  ;;  %v1477_v22 = vmul.f32 %v6166_v14, %v7111_v40  ;;  %v1579_v44 = vrot.slane %v7227_v55, %v7222_v54 }
 0x971   :  { %v5928_v0 = vpack.i.bf16 %v1490_v21, %v1489_v18  ;;  %v1492_v47 = vsel %vm1488_vm3, %v1487_v19, %v1479_v16 }
 0x972   :  { %v1491_v20 = vsel %vm1488_vm3, %v1486_v63, %v1477_v22  ;;  %5618 = vmatpush3.bf16.msra.mxu1 %v6013_v34  ;;  %v6021_v34 = vld [vmem:[%s8311_s16] sm:$0xff]  }
 0x973   :  { %5929 = vrot.lane.b32.xlu0 %v5928_v0, %s6599_s5  ;;  %v5933_v7 = vpack.i.bf16 %v1492_v47, %v1491_v20  ;;  %5619 = vmatprep.subr.bf16.mxu1 %v6014_v37 }
 0x975   :  { %5934 = vrot.lane.b32.xlu1 %v5933_v7, %s6599_s5 }
 0x976   :  { %5620 = vmatpush3.bf16.msra.mxu1 %v6014_v37  ;;  %v6022_v37 = vld [vmem:[%s8312_s17] sm:$0xff]  }
 0x9e5   :  { %v5930_v23 = vpop.permute.xlu0 %5929 }
 0x9e6   :  { %v5932_v40 = vunpack.i.h.bf16 %v5930_v23  ;;  %v5931_v24 = vunpack.i.l.bf16 %v5930_v23 }
 0x9e7   :  { %v5935_v25 = vpop.permute.xlu1 %5934 }
 0x9e8   :  { %v5937_v26 = vunpack.i.h.bf16 %v5935_v25  ;;  %v5936_v28 = vunpack.i.l.bf16 %v5935_v25  ;;  %v1509_v32 = vsel %vm250_vm0, %v1489_v18, %v5931_v24  ;;  %v1510_v41 = vsel %vm250_vm0, %v1490_v21, %v5932_v40 }
 0x9e9   :  { %v1513_v27 = vpack.c.bf16 %v1510_v41, %v1509_v32 }
 0x9ea   :  { %v1512_v29 = vsel %vm250_vm0, %v1492_v47, %v5937_v26  ;;  %v1511_v52 = vsel %vm250_vm0, %v1491_v20, %v5936_v28 }
 0x9eb   :  { %v1514_v36 = vpack.c.bf16 %v1512_v29, %v1511_v52  ;;  %v1515_v31 = vmul.bf16 %v7047_v1, %v1513_v27  ;;  %v6015_v27 = vld [vmem:[%s8311_s16 + $0x18] sm:$0xff]   ;;  %v6017_v52 = vld [vmem:[%s8311_s16 + $0x10] sm:$0xff]  }
 0x9ec   :  { %v6016_v29 = vld [vmem:[%s8312_s17 + $0x18] sm:$0xff]   ;;  %5625 = vmatprep.subr.bf16.mxu0 %v6015_v27 }
 0x9ed   :  { %v1516_v33 = vmul.bf16 %v7104_v6, %v1514_v36  ;;  %5609 = vmatprep.mubr.bf16.mxu0 %v1515_v31  ;;  %5637 = vmatprep.subr.bf16.mxu1 %v6016_v29  ;;  %v6018_v36 = vld [vmem:[%s8312_s17 + $0x10] sm:$0xff]   ;;  %v6019_v31 = vld [vmem:[%s8311_s16 + $0x8] sm:$0xff]  }
 0x9ef   :  { %5610 = vmatmul.mubr.bf16.vlgmr.msra.gmra.mxu0 %v1516_v33  ;;  %v6020_v33 = vld [vmem:[%s8312_s17 + $0x8] sm:$0xff]  }
 0x9f0   :  { %5626 = vmatpush3.bf16.msra.mxu0 %v6015_v27 }
 0x9f1   :  { %5627 = vmatprep.subr.bf16.mxu0 %v6017_v52 }
 0x9f4   :  { %5628 = vmatpush3.bf16.msra.mxu0 %v6017_v52 }
 0x9f5   :  { %5629 = vmatprep.subr.bf16.mxu0 %v6019_v31 }
 0x9f8   :  { %5630 = vmatpush3.bf16.msra.mxu0 %v6019_v31  ;;  %v6026_v31 = vld [vmem:[%s8313_s18] sm:$0xff]  }
 0x9f9   :  { %5631 = vmatprep.subr.bf16.mxu0 %v6021_v34 }
 0x9fc   :  { %5632 = vmatpush3.bf16.msra.mxu0 %v6021_v34 }
 0xaaf   :  { %v5611_v59 = vpop.f32.mrf.mxu0 }
 0xab1   :  { %v1551_v39 = vpop.f32.mrf.mxu0 }
 0xab3   :  { %v5612_v43 = vpop.f32.mrf.mxu0 }
 0xab4   :  { %v1575_v6 = vpack.c.bf16 %v5612_v43, %v5611_v59  ;;  %v215_v59 = vld [vmem:[%s8302_s7 + $0x8] sm:$0xff]  ;;  %v216_v43 = vld [vmem:[%s8302_s7 + $0x10] sm:$0xff] }
 0xab5   :  { %v1554_v1 = vpop.f32.mrf.mxu0 }
 0xab6   :  { %v1574_v48 = vpack.c.bf16 %v1554_v1, %v1551_v39  ;;  %v214_v39 = vld [vmem:[%s8302_s7] sm:$0xff]  ;;  %v217_v1 = vld [vmem:[%s8302_s7 + $0x18] sm:$0xff] }
 0xab8   :  { %5621 = vmatprep.mubr.msk.bf16.mxu1 %vm250_vm0, %v1574_v48  ;;  %v6608_v48 = vmov 3  }
 0xab9   :  { %5622 = vmatmul.mubr.msk.bf16.vlgmr.msra.gmra.mxu1 %vm250_vm0, %v1575_v6  ;;  %v6609_v6 = vmov 4  }
 0xaba   :  { %5638 = vmatpush3.bf16.msra.mxu1 %v6016_v29 }
 0xabb   :  { %5639 = vmatprep.subr.bf16.mxu1 %v6018_v36 }
 0xabe   :  { %5640 = vmatpush3.bf16.msra.mxu1 %v6018_v36 }
 0xabf   :  { %5641 = vmatprep.subr.bf16.mxu1 %v6020_v33 }
 0xac2   :  { %5642 = vmatpush3.bf16.msra.mxu1 %v6020_v33 }
 0xac3   :  { %5643 = vmatprep.subr.bf16.mxu1 %v6022_v37 }
 0xac6   :  { %5644 = vmatpush3.bf16.msra.mxu1 %v6022_v37 }
 0xb79   :  { %v5623_v50 = vpop.f32.mrf.mxu1 }
 0xb7a   :  { %v1653_v13 = vadd.f32 %v5623_v50, %v1579_v44  ;;  %v6610_v50 = vmov 1  }
 0xb7b   :  { %v1644_v12 = vpop.f32.mrf.mxu1 }
 0xb7c   :  { %v1645_v56 = vadd.f32 %v1644_v12, %v1579_v44  ;;  %v7243_v2 = vadd.f32 %v1653_v13, %v6854_v5 }
 0xb7d   :  { %v5624_v57 = vpop.f32.mrf.mxu1 }
 0xb7e   :  { %v7232_v60 = vadd.f32 %v1645_v56, %v6851_v3  ;;  %v1656_v61 = vadd.f32 %v5624_v57, %v1579_v44 }
 0xb7f   :  { %v1647_v9 = vpop.f32.mrf.mxu1 }
 0xb80   :  { %v7235_v14 = vadd.f32 %v1656_v61, %v6862_v11  ;;  %v1648_v4 = vadd.f32 %v1647_v9, %v1579_v44  ;;  %v1663_v15 = vsel %vm250_vm0, %v7232_v60, 0.0  ;;  %v1669_v11 = vsel %vm250_vm0, %v7243_v2, 0.0 }
 0xb81   :  { %1664 = vadd.xlane.f32.xlu1 %v1663_v15 }
 0xb82   :  { %v7240_v16 = vadd.f32 %v1648_v4, %v6859_v10  ;;  %v1672_v17 = vsel %vm250_vm0, %v7235_v14, 0.0 }
 0xb84   :  { %v1666_v3 = vsel %vm250_vm0, %v7240_v16, 0.0 }
 0xb85   :  { %1667 = vadd.xlane.f32.xlu0 %v1666_v3  ;;  %1673 = vadd.xlane.f32.xlu1 %v1672_v17 }
 0xb89   :  { %1670 = vadd.xlane.f32.xlu0 %v1669_v11 }
 0xc0a   :  { %v1665_v49 = vpop.xlane.xlu1 %1664 }
 0xc0b   :  { %v1675_v18 = vmul.f32 0.015625, %v1665_v49  ;;  %v7312_v49 = vsub.s32 6, %v6798_v45 }
 0xc0d   :  { %v7252_v10 = vsub.f32 %v7232_v60, %v1675_v18 }
 0xc0e   :  { %v1668_v21 = vpop.xlane.xlu0 %1667  ;;  %v1674_v5 = vpop.xlane.xlu1 %1673 }
 0xc0f   :  { %v1676_v22 = vmul.f32 0.015625, %v1668_v21  ;;  %v1678_v19 = vmul.f32 0.015625, %v1674_v5  ;;  %v1683_v0 = vmul.f32 %v7252_v10, %v7252_v10  ;;  %v1718_v5 = vrot.slane %v7227_v55, %v7312_v49 }
 0xc11   :  { %v7257_v63 = vsub.f32 %v7240_v16, %v1676_v22  ;;  %v7260_v47 = vsub.f32 %v7235_v14, %v1678_v19  ;;  %v1687_v20 = vsel %vm250_vm0, %v1683_v0, 0.0  ;;  %v8320_v22 = vsub.s32 7, %v6798_v45 }
 0xc12   :  { %v1671_v7 = vpop.xlane.xlu0 %1670  ;;  %1688 = vadd.xlane.f32.xlu0 %v1687_v20 }
 0xc13   :  { %v1677_v23 = vmul.f32 0.015625, %v1671_v7  ;;  %v1684_v40 = vmul.f32 %v7257_v63, %v7257_v63  ;;  %v1686_v26 = vmul.f32 %v7260_v47, %v7260_v47  ;;  %v1726_v7 = vrot.slane %v7227_v55, %v8320_v22  ;;  %v6023_v55 = vld [vmem:[%s8313_s18 + $0x18] sm:$0xff]  }
 0xc14   :  { %5649 = vmatprep.subr.bf16.mxu0 %v6023_v55 }
 0xc15   :  { %v7266_v24 = vsub.f32 %v7243_v2, %v1677_v23  ;;  %v1690_v25 = vsel %vm250_vm0, %v1684_v40, 0.0  ;;  %v1696_v41 = vsel %vm250_vm0, %v1686_v26, 0.0 }
 0xc16   :  { %1691 = vadd.xlane.f32.xlu1 %v1690_v25 }
 0xc17   :  { %v1685_v28 = vmul.f32 %v7266_v24, %v7266_v24 }
 0xc19   :  { %v1693_v32 = vsel %vm250_vm0, %v1685_v28, 0.0 }
 0xc1a   :  { %1694 = vadd.xlane.f32.xlu0 %v1693_v32  ;;  %1697 = vadd.xlane.f32.xlu1 %v1696_v41 }
 0xc2b   :  { %1963 = vperm.xlu1 %5939, %v215_v59  }
 0xc2f   :  { %1968 = vperm.xlu1 %5939, %v216_v43  }
 0xc30   :  { %1958 = vperm.xlu0 %5938, %v214_v39  }
 0xc33   :  { %1973 = vperm.xlu1 %5939, %v217_v1  }
 0xc34   :  { %5942 = vset.pattern.permute.xlu0 %v6608_v48 }
 0xc35   :  { %2057 = vperm.xlu0 %5942, %v215_v59  }
 0xc37   :  { %5940 = vset.pattern.permute.xlu1 %v6610_v50 }
 0xc38   :  { %2007 = vperm.xlu1 %5940, %v214_v39  }
 0xc39   :  { %5943 = vset.pattern.permute.xlu0 %v6609_v6 }
 0xc3a   :  { %2099 = vperm.xlu0 %5943, %v214_v39  }
 0xc3c   :  { %2011 = vperm.xlu1 %5940, %v215_v59  }
 0xc3e   :  { %2111 = vperm.xlu0 %5943, %v217_v1  }
 0xc40   :  { %2015 = vperm.xlu1 %5940, %v216_v43  }
 0xc44   :  { %2019 = vperm.xlu1 %5940, %v217_v1  }
 0xc48   :  { %5941 = vset.pattern.permute.xlu1 %v6608_v48 }
 0xc49   :  { %2053 = vperm.xlu1 %5941, %v214_v39  }
 0xc4d   :  { %2061 = vperm.xlu1 %5941, %v216_v43  }
 0xc51   :  { %2065 = vperm.xlu1 %5941, %v217_v1  }
 0xc55   :  { %5944 = vset.pattern.permute.xlu1 %v6609_v6 }
 0xc56   :  { %2103 = vperm.xlu1 %5944, %v215_v59  }
 0xc5a   :  { %2107 = vperm.xlu1 %5944, %v216_v43  }
 0xc9b   :  { %v1689_v44 = vpop.xlane.xlu0 %1688 }
 0xc9c   :  { %v1699_v12 = vmul.f32 0.015625, %v1689_v44 }
 0xc9e   :  { %v1703_v56 = vadd.f32 1e-05, %v1699_v12 }
 0xc9f   :  { %v1692_v57 = vpop.xlane.xlu1 %1691 }
 0xca0   :  { %6167 = vrsqrt.f32 %v1703_v56  ;;  %v1700_v61 = vmul.f32 0.015625, %v1692_v57 }
 0xca2   :  { %v1704_v9 = vadd.f32 1e-05, %v1700_v61 }
 0xca3   :  { %v1695_v13 = vpop.xlane.xlu0 %1694  ;;  %v1698_v4 = vpop.xlane.xlu1 %1697 }
 0xca4   :  { %6169 = vrsqrt.f32 %v1704_v9  ;;  %v1701_v15 = vmul.f32 0.015625, %v1695_v13  ;;  %v1702_v3 = vmul.f32 0.015625, %v1698_v4 }
 0xca6   :  { %v1705_v17 = vadd.f32 1e-05, %v1701_v15  ;;  %v1706_v11 = vadd.f32 1e-05, %v1702_v3 }
 0xca7   :  { %v7340_v33 = vpop.permute.xlu1 %1963 }
 0xca8   :  { %6171 = vrsqrt.f32 %v1705_v17 }
 0xca9   :  { %6173 = vrsqrt.f32 %v1706_v11 }
 0xcab   :  { %v7342_v34 = vpop.permute.xlu1 %1968 }
 0xcad   :  { %v6168_v18 = vpop.eup %6167 }
 0xcae   :  { %v1711_v21 = vmul.f32 %v6168_v18, %v7252_v10 }
 0xcaf   :  { %v7344_v59 = vpop.permute.xlu1 %1973 }
 0xcb0   :  { %v1719_v20 = vmul.f32 %v1718_v5, %v1711_v21  ;;  %8343 = vst [vmem:[#allocation21_spill] sm:$0xff] %v7344_v59 }
 0xcb1   :  { %v6170_v19 = vpop.eup %6169 }
 0xcb2   :  { %v1712_v0 = vmul.f32 %v6170_v19, %v7257_v63  ;;  %v1727_v28 = vadd.f32 %v1726_v7, %v1719_v20  ;;  %v1929_v19 = vld [vmem:[%s8314_s19] sm:$0x1f] }
 0xcb3   :  { %v7346_v50 = vpop.permute.xlu1 %2007 }
 0xcb4   :  { %v1720_v23 = vmul.f32 %v1718_v5, %v1712_v0  ;;  %8344 = vst [vmem:[#allocation22_spill] sm:$0xff] %v7346_v50 }
 0xcb5   :  { %v6172_v40 = vpop.eup %6171 }
 0xcb6   :  { %v6174_v25 = vpop.eup %6173  ;;  %v1713_v26 = vmul.f32 %v6172_v40, %v7266_v24  ;;  %v1728_v10 = vadd.f32 %v1726_v7, %v1720_v23  ;;  %v6025_v24 = vld [vmem:[%s8313_s18 + $0x8] sm:$0xff]   ;;  %v7362_v40 = vpop.permute.xlu0 %1958 }
 0xcb7   :  { %v1714_v32 = vmul.f32 %v6174_v25, %v7260_v47  ;;  %v6024_v47 = vld [vmem:[%s8313_s18 + $0x10] sm:$0xff]   ;;  %v7348_v56 = vpop.permute.xlu1 %2011 }
 0xcb8   :  { %v1739_v41 = vpack.c.bf16 %v1728_v10, %v1727_v28  ;;  %v1721_v27 = vmul.f32 %v1718_v5, %v1713_v26 }
 0xcb9   :  { %v1722_v29 = vmul.f32 %v1718_v5, %v1714_v32  ;;  %v2029_v32 = vrot.slane %v1929_v19, %v6811_v51 }
 0xcba   :  { %5633 = vmatprep.mubr.msk.bf16.mxu0 %vm250_vm0, %v1739_v41  ;;  %5645 = vmatprep.mubr.msk.bf16.mxu1 %vm250_vm0, %v1739_v41  ;;  %v1729_v63 = vadd.f32 %v1726_v7, %v1721_v27  ;;  %v7370_v41 = vrot.slane %v1929_v19, %v6801_v46 }
 0xcbb   :  { %v1730_v52 = vadd.f32 %v1726_v7, %v1722_v29  ;;  %v7350_v13 = vpop.permute.xlu1 %2015  ;;  %v1933_v7 = vrot.slane %v1929_v19, %v6846_v53 }
 0xcbc   :  { %8345 = vst [vmem:[#allocation23_spill] sm:$0xff] %v7350_v13 }
 0xcbd   :  { %v1740_v36 = vpack.c.bf16 %v1730_v52, %v1729_v63  ;;  %v7374_v63 = vrot.slane %v1929_v19, %v6929_v62  ;;  %v7377_v52 = vrot.slane %v1929_v19, %v6935_v8 }
 0xcbf   :  { %5634 = vmatmul.mubr.msk.bf16.vlgmr.msra.gmra.mxu0 %vm250_vm0, %v1740_v36  ;;  %5646 = vmatmul.mubr.msk.bf16.vlgmr.msra.gmra.mxu1 %vm250_vm0, %v1740_v36  ;;  %v7352_v18 = vpop.permute.xlu1 %2019 }
 0xcc0   :  { %5650 = vmatpush3.bf16.msra.mxu0 %v6023_v55  ;;  %8346 = vst [vmem:[#allocation24_spill] sm:$0xff] %v7352_v18 }
 0xcc1   :  { %5651 = vmatprep.subr.bf16.mxu0 %v6024_v47 }
 0xcc4   :  { %5652 = vmatpush3.bf16.msra.mxu0 %v6024_v47  ;;  %v7354_v5 = vpop.permute.xlu1 %2053 }
 0xcc5   :  { %5653 = vmatprep.subr.bf16.mxu0 %v6025_v24 }
 0xcc8   :  { %5654 = vmatpush3.bf16.msra.mxu0 %v6025_v24  ;;  %v7364_v28 = vpop.permute.xlu1 %2061 }
 0xcc9   :  { %5655 = vmatprep.subr.bf16.mxu0 %v6026_v31 }
 0xccc   :  { %5656 = vmatpush3.bf16.msra.mxu0 %v6026_v31 }
 0xd7f   :  { %v5647_v37 = vpop.f32.mrf.mxu1  ;;  %v5635_v21 = vpop.f32.mrf.mxu0 }
 0xd80   :  { %v5055_v39 = vmul.f32 -1.442695, %v5647_v37 }
 0xd81   :  { %v1886_v43 = vpop.f32.mrf.mxu1  ;;  %v1805_v0 = vpop.f32.mrf.mxu0 }
 0xd82   :  { %6175 = vpow2.f32 %v5055_v39  ;;  %v5053_v1 = vmul.f32 -1.442695, %v1886_v43 }
 0xd83   :  { %v5648_v48 = vpop.f32.mrf.mxu1  ;;  %v5636_v26 = vpop.f32.mrf.mxu0 }
 0xd84   :  { %6177 = vpow2.f32 %v5053_v1  ;;  %v5056_v6 = vmul.f32 -1.442695, %v5648_v48 }
 0xd85   :  { %v1889_v44 = vpop.f32.mrf.mxu1  ;;  %v1808_v39 = vpop.f32.mrf.mxu0 }
 0xd86   :  { %6179 = vpow2.f32 %v5056_v6  ;;  %v5054_v12 = vmul.f32 -1.442695, %v1889_v44 }
 0xd88   :  { %6181 = vpow2.f32 %v5054_v12 }
 0xd8f   :  { %v6176_v57 = vpop.eup %6175 }
 0xd90   :  { %v1915_v61 = vadd.f32 1.0, %v6176_v57 }
 0xd91   :  { %v6178_v9 = vpop.eup %6177 }
 0xd92   :  { %6183 = vrcp.f32 %v1915_v61  ;;  %v1913_v4 = vadd.f32 1.0, %v6178_v9 }
 0xd93   :  { %v6180_v15 = vpop.eup %6179 }
 0xd94   :  { %6185 = vrcp.f32 %v1913_v4  ;;  %v1916_v3 = vadd.f32 1.0, %v6180_v15  ;;  %v7395_v4 = vpop.permute.xlu0 %2057  ;;  %v7397_v15 = vpop.permute.xlu1 %2065 }
 0xd95   :  { %v6182_v17 = vpop.eup %6181 }
 0xd96   :  { %6187 = vrcp.f32 %v1916_v3  ;;  %v1914_v11 = vadd.f32 1.0, %v6182_v17 }
 0xd98   :  { %6189 = vrcp.f32 %v1914_v11 }
 0xd9f   :  { %v6184_v20 = vpop.eup %6183 }
 0xda0   :  { %v7360_v23 = vmul.f32 %v6184_v20, %v5635_v21 }
 0xda1   :  { %v6186_v25 = vpop.eup %6185 }
 0xda2   :  { %v7366_v10 = vmul.f32 %v6186_v25, %v1805_v0  ;;  %v1936_v29 = vmul.f32 %v1933_v7, %v7360_v23  ;;  %v1948_v55 = vrot.slane %v7360_v23, 6  ;;  %v1998_v47 = vrot.slane %v7360_v23, 7 }
 0xda3   :  { %v6188_v27 = vpop.eup %6187  ;;  %v2042_v24 = vrot.slane %v7360_v23, 1 }
 0xda4   :  { %v7379_v36 = vmul.f32 %v6188_v27, %v5636_v26  ;;  %v1995_v37 = vrot.slane %v7366_v10, 7  ;;  %v1945_v43 = vrot.slane %v7366_v10, 6  ;;  %v2039_v1 = vrot.slane %v7366_v10, 1 }
 0xda5   :  { %v6190_v31 = vpop.eup %6189  ;;  %v1934_v57 = vmul.f32 %v1933_v7, %v7366_v10  ;;  %v2085_v3 = vrot.slane %v7366_v10, 2 }
 0xda6   :  { %v1992_v6 = vrot.slane %v7379_v36, 7  ;;  %v7389_v44 = vmul.f32 %v6190_v31, %v1808_v39  ;;  %v1939_v12 = vrot.slane %v7379_v36, 6  ;;  %v1937_v61 = vmul.f32 %v1933_v7, %v7379_v36 }
 0xda7   :  { %v2044_v9 = vrot.slane %v7379_v36, 1  ;;  %v2090_v17 = vrot.slane %v7379_v36, 2 }
 0xda8   :  { %v2005_v11 = vsel %vm1994_vm4, %v1992_v6, %v1995_v37  ;;  %v1935_v21 = vmul.f32 %v1933_v7, %v7389_v44  ;;  %v1946_v19 = vrot.slane %v7389_v44, 6  ;;  %v1996_v0 = vrot.slane %v7389_v44, 7 }
 0xda9   :  { %v2022_v20 = vmul.f32 %v7346_v50, %v2005_v11  ;;  %v1950_v25 = vsel %vm1944_vm5, %v1948_v55, %v1939_v12  ;;  %v2000_v26 = vsel %vm1994_vm4, %v1998_v47, %v1992_v6  ;;  %v2040_v27 = vrot.slane %v7389_v44, 1 }
 0xdaa   :  { %v1947_v10 = vsel %vm1944_vm5, %v1945_v43, %v1946_v19  ;;  %v1997_v36 = vsel %vm1994_vm4, %v1995_v37, %v1996_v0  ;;  %v1949_v31 = vsel %vm1944_vm5, %v1946_v19, %v1948_v55  ;;  %v1999_v7 = vsel %vm1994_vm4, %v1996_v0, %v1998_v47  ;;  %v7423_v0 = vpop.permute.xlu0 %2099 }
 0xdab   :  { %v2030_v39 = vmul.f32 %v2029_v32, %v2022_v20  ;;  %v1977_v22 = vmul.f32 %v7340_v33, %v1947_v10  ;;  %v2023_v35 = vmul.f32 %v7348_v56, %v1997_v36  ;;  %v1978_v11 = vmul.f32 %v7342_v34, %v1949_v31  ;;  %v7425_v20 = vpop.permute.xlu1 %2103 }
 0xdac   :  { %v2024_v48 = vmul.f32 %v7350_v13, %v1999_v7  ;;  %v1979_v6 = vmul.f32 %v7344_v59, %v1950_v25  ;;  %v2025_v50 = vmul.f32 %v7352_v18, %v2000_v26  ;;  %v2041_v45 = vsel %vm2038_vm6, %v2039_v1, %v2040_v27 }
 0xdad   :  { %v1985_v37 = vmul.f32 %v7370_v41, %v1977_v22  ;;  %v2031_v55 = vmul.f32 %v2029_v32, %v2023_v35  ;;  %v1986_v47 = vmul.f32 %v7370_v41, %v1978_v11  ;;  %v2068_v19 = vmul.f32 %v7354_v5, %v2041_v45 }
 0xdae   :  { %v2032_v10 = vmul.f32 %v2029_v32, %v2024_v48  ;;  %v1987_v36 = vmul.f32 %v7370_v41, %v1979_v6  ;;  %v2033_v31 = vmul.f32 %v2029_v32, %v2025_v50  ;;  %v1955_v25 = vsel %vm1944_vm5, %v1939_v12, %v1945_v43 }
 0xdaf   :  { %v1989_v26 = vadd.f32 %v1985_v37, %v1935_v21  ;;  %v1990_v7 = vadd.f32 %v1986_v47, %v1936_v29  ;;  %v2076_v18 = vmul.f32 %v7374_v63, %v2068_v19  ;;  %v1976_v35 = vmul.f32 %v7362_v40, %v1955_v25  ;;  %v7440_v37 = vpop.permute.xlu0 %2111 }
 0xdb0   :  { %v1991_v22 = vadd.f32 %v1987_v36, %v1937_v61  ;;  %v2045_v11 = vsel %vm2038_vm6, %v2042_v24, %v2044_v9  ;;  %v2043_v45 = vsel %vm2038_vm6, %v2040_v27, %v2042_v24  ;;  %v2051_v13 = vsel %vm2038_vm6, %v2044_v9, %v2039_v1  ;;  %v7446_v9 = vpop.permute.xlu1 %2107 }
 0xdb1   :  { %v2035_v59 = vadd.f32 %v2031_v55, %v1989_v26  ;;  %v2036_v48 = vadd.f32 %v2032_v10, %v1990_v7  ;;  %v1984_v6 = vmul.f32 %v7370_v41, %v1976_v35  ;;  %v2070_v50 = vmul.f32 %v7364_v28, %v2045_v11 }
 0xdb2   :  { %v2037_v32 = vadd.f32 %v2033_v31, %v1991_v22  ;;  %v2069_v29 = vmul.f32 %v7395_v4, %v2043_v45  ;;  %v2071_v43 = vmul.f32 %v7397_v15, %v2051_v13  ;;  %v2086_v12 = vrot.slane %v7389_v44, 2  ;;  %v7453_v13 = vld [vmem:[%s8315_s20 + $0x8] sm:$0x7f] }
 0xdb3   :  { %v1988_v61 = vadd.f32 %v1984_v6, %v1934_v57  ;;  %v2078_v21 = vmul.f32 %v7374_v63, %v2070_v50  ;;  %v2097_v24 = vsel %vm2084_vm7, %v2090_v17, %v2085_v3  ;;  %v8347_v1 = vrot.slane %v7360_v23, 2 }
 0xdb4   :  { %v2077_v27 = vmul.f32 %v7374_v63, %v2069_v29  ;;  %v2079_v55 = vmul.f32 %v7374_v63, %v2071_v43  ;;  %v2087_v44 = vsel %vm2084_vm7, %v2085_v3, %v2086_v12  ;;  %v2117_v63 = vmul.f32 %v7440_v37, %v2097_v24 }
 0xdb5   :  { %v2091_v41 = vsel %vm2084_vm7, %v8347_v1, %v2090_v17  ;;  %v8348_v57 = vmov %v8347_v1  ;;  %v2034_v19 = vadd.f32 %v2030_v39, %v1988_v61  ;;  %v2082_v10 = vadd.f32 %v2078_v21, %v2036_v48 }
 0xdb6   :  { %v2089_v47 = vsel %vm2084_vm7, %v2086_v12, %v8348_v57  ;;  %v2114_v17 = vmul.f32 %v7423_v0, %v2087_v44  ;;  %v2081_v31 = vadd.f32 %v2077_v27, %v2035_v59  ;;  %v2083_v25 = vadd.f32 %v2079_v55, %v2037_v32 }
 0xdb7   :  { %v2115_v36 = vmul.f32 %v7425_v20, %v2089_v47  ;;  %v2116_v26 = vmul.f32 %v7446_v9, %v2091_v41  ;;  %v2133_v7 = vrot.slane %v7453_v13, %v6801_v46  ;;  %v2080_v3 = vadd.f32 %v2076_v18, %v2034_v19 }
 0xdb8   :  { %v2122_v23 = vmul.f32 %v7377_v52, %v2114_v17  ;;  %v2125_v39 = vmul.f32 %v7377_v52, %v2117_v63  ;;  %v2141_v59 = vrot.slane %v7453_v13, %v6811_v51 }
 0xdb9   :  { %v2123_v35 = vmul.f32 %v7377_v52, %v2115_v36  ;;  %v2124_v22 = vmul.f32 %v7377_v52, %v2116_v26 }
 0xdba   :  { %v2126_v11 = vadd.f32 %v2122_v23, %v2080_v3  ;;  %v2129_v48 = vadd.f32 %v2125_v39, %v2083_v25 }
 0xdbb   :  { %v2127_v45 = vadd.f32 %v2123_v35, %v2081_v31  ;;  %v2128_v6 = vadd.f32 %v2124_v22, %v2082_v10 }
 0xdbc   :  { %v2134_v50 = vmul.f32 %v2133_v7, %v2126_v11  ;;  %v2137_v29 = vmul.f32 %v2133_v7, %v2129_v48 }
 0xdbd   :  { %v2135_v32 = vmul.f32 %v2133_v7, %v2127_v45  ;;  %v2136_v43 = vmul.f32 %v2133_v7, %v2128_v6 }
 0xdbe   :  { %v2142_v18 = vadd.f32 %v2141_v59, %v2134_v50  ;;  %v2145_v61 = vadd.f32 %v2141_v59, %v2137_v29 }
 0xdbf   :  { %v2143_v12 = vadd.f32 %v2141_v59, %v2135_v32  ;;  %v2144_v21 = vadd.f32 %v2141_v59, %v2136_v43 }
 0xdc0   :  { %v5057_v24 = vmul.f32 -1.442695, %v2142_v18  ;;  %v5060_v1 = vmul.f32 -1.442695, %v2145_v61 }
 0xdc1   :  { %v5059_v41 = vmul.f32 -1.442695, %v2144_v21  ;;  %v5058_v27 = vmul.f32 -1.442695, %v2143_v12 }
 0xdc2   :  { %6191 = vpow2.f32 %v5057_v24 }
 0xdc3   :  { %6193 = vpow2.f32 %v5060_v1 }
 0xdc4   :  { %6195 = vpow2.f32 %v5059_v41 }
 0xdc5   :  { %6197 = vpow2.f32 %v5058_v27 }
 0xdcf   :  { %v6192_v52 = vpop.eup %6191 }
 0xdd0   :  { %v6194_v55 = vpop.eup %6193  ;;  %v2158_v44 = vadd.f32 1.0, %v6192_v52 }
 0xdd1   :  { %v6196_v57 = vpop.eup %6195  ;;  %v2161_v47 = vadd.f32 1.0, %v6194_v55 }
 0xdd2   :  { %v6198_v19 = vpop.eup %6197  ;;  %v2160_v10 = vadd.f32 1.0, %v6196_v57  ;;  %6199 = vrcp.f32 %v2158_v44 }
 0xdd3   :  { %6201 = vrcp.f32 %v2161_v47  ;;  %v2159_v17 = vadd.f32 1.0, %v6198_v19 }
 0xdd4   :  { %6203 = vrcp.f32 %v2160_v10 }
 0xdd5   :  { %6205 = vrcp.f32 %v2159_v17 }
 0xddf   :  { %v6200_v36 = vpop.eup %6199 }
 0xde0   :  { %v6202_v31 = vpop.eup %6201  ;;  %v2170_v3 = vmul.f32 %v6200_v36, %v2142_v18 }
 0xde1   :  { %v6204_v25 = vpop.eup %6203  ;;  %v2173_v26 = vmul.f32 %v6202_v31, %v2145_v61 }
 0xde2   :  { %v6206_v63 = vpop.eup %6205  ;;  %v2172_v7 = vmul.f32 %v6204_v25, %v2144_v21  ;;  %v6027_v25 = vld [vmem:[%s8309_s14 + $0x18] sm:$0xff]  }
 0xde3   :  { %v2171_v23 = vmul.f32 %v6206_v63, %v2143_v12  ;;  %5661 = vmatprep.subr.bf16.mxu1 %v6027_v25  ;;  %v6028_v63 = vld [vmem:[%s8309_s14 + $0x10] sm:$0xff]  }
 0xde4   :  { %v2183_v35 = vpack.c.bf16 %v2173_v26, %v2172_v7  ;;  %5662 = vmatpush3.bf16.msra.mxu1 %v6027_v25  ;;  %v6029_v26 = vld [vmem:[%s8309_s14 + $0x8] sm:$0xff]   ;;  %v6030_v7 = vld [vmem:[%s8309_s14] sm:$0xff]  }
 0xde5   :  { %v2182_v39 = vpack.c.bf16 %v2171_v23, %v2170_v3  ;;  %5663 = vmatprep.subr.bf16.mxu1 %v6028_v63 }
 0xde7   :  { %5657 = vmatprep.mubr.msk.bf16.mxu0 %vm250_vm0, %v2182_v39 }
 0xde8   :  { %5658 = vmatmul.mubr.msk.bf16.vlgmr.msra.gmra.mxu0 %vm250_vm0, %v2183_v35  ;;  %5664 = vmatpush3.bf16.msra.mxu1 %v6028_v63 }
 0xde9   :  { %5665 = vmatprep.subr.bf16.mxu1 %v6029_v26 }
 0xdec   :  { %5666 = vmatpush3.bf16.msra.mxu1 %v6029_v26 }
 0xded   :  { %5667 = vmatprep.subr.bf16.mxu1 %v6030_v7 }
 0xdf0   :  { %5668 = vmatpush3.bf16.msra.mxu1 %v6030_v7  ;;  %v6034_v7 = vld [vmem:[%s8310_s15 + $0x20] sm:$0xff]  }
 0xea8   :  { %v5659_v22 = vpop.f32.mrf.mxu0 }
 0xea9   :  { %v7485_v29 = vadd.f32 %v5659_v22, %v7243_v2 }
 0xeaa   :  { %v2248_v11 = vpop.f32.mrf.mxu0 }
 0xeab   :  { %v7474_v45 = vadd.f32 %v2248_v11, %v7232_v60 }
 0xeac   :  { %v5660_v59 = vpop.f32.mrf.mxu0 }
 0xead   :  { %v7477_v48 = vadd.f32 %v5660_v59, %v7235_v14  ;;  %v2291_v6 = vsel %vm250_vm0, %v7474_v45, 0.0  ;;  %v2297_v14 = vsel %vm250_vm0, %v7485_v29, 0.0 }
 0xeae   :  { %2292 = vadd.xlane.f32.xlu1 %v2291_v6  ;;  %v2251_v50 = vpop.f32.mrf.mxu0 }
 0xeaf   :  { %v7482_v32 = vadd.f32 %v2251_v50, %v7240_v16  ;;  %v2300_v43 = vsel %vm250_vm0, %v7477_v48, 0.0 }
 0xeb1   :  { %v2294_v60 = vsel %vm250_vm0, %v7482_v32, 0.0 }
 0xeb2   :  { %2301 = vadd.xlane.f32.xlu1 %v2300_v43  ;;  %2295 = vadd.xlane.f32.xlu0 %v2294_v60 }
 0xeb6   :  { %2298 = vadd.xlane.f32.xlu0 %v2297_v14 }
 0xf37   :  { %v2293_v18 = vpop.xlane.xlu1 %2292 }
 0xf38   :  { %v2303_v12 = vmul.f32 0.015625, %v2293_v18 }
 0xf3a   :  { %v2307_v16 = vsub.f32 %v7474_v45, %v2303_v12 }
 0xf3b   :  { %v2302_v61 = vpop.xlane.xlu1 %2301  ;;  %v2296_v21 = vpop.xlane.xlu0 %2295 }
 0xf3c   :  { %v2306_v2 = vmul.f32 0.015625, %v2302_v61  ;;  %v2304_v24 = vmul.f32 0.015625, %v2296_v21  ;;  %v2311_v1 = vmul.f32 %v2307_v16, %v2307_v16  ;;  %v2346_v61 = vrot.slane %v7453_v13, %v6846_v53 }
 0xf3e   :  { %v2310_v41 = vsub.f32 %v7477_v48, %v2306_v2  ;;  %v2308_v27 = vsub.f32 %v7482_v32, %v2304_v24  ;;  %v2315_v52 = vsel %vm250_vm0, %v2311_v1, 0.0  ;;  %v2354_v1 = vrot.slane %v7453_v13, %v6929_v62 }
 0xf3f   :  { %2316 = vadd.xlane.f32.xlu0 %v2315_v52  ;;  %v2299_v55 = vpop.xlane.xlu0 %2298 }
 0xf40   :  { %v2305_v44 = vmul.f32 0.015625, %v2299_v55  ;;  %v2312_v57 = vmul.f32 %v2308_v27, %v2308_v27  ;;  %v2314_v10 = vmul.f32 %v2310_v41, %v2310_v41 }
 0xf42   :  { %v2309_v47 = vsub.f32 %v7485_v29, %v2305_v44  ;;  %v2318_v19 = vsel %vm250_vm0, %v2312_v57, 0.0  ;;  %v2324_v36 = vsel %vm250_vm0, %v2314_v10, 0.0 }
 0xf43   :  { %2319 = vadd.xlane.f32.xlu1 %v2318_v19 }
 0xf44   :  { %v2313_v17 = vmul.f32 %v2309_v47, %v2309_v47 }
 0xf46   :  { %v2321_v31 = vsel %vm250_vm0, %v2313_v17, 0.0 }
 0xf47   :  { %2325 = vadd.xlane.f32.xlu1 %v2324_v36  ;;  %2322 = vadd.xlane.f32.xlu0 %v2321_v31 }
 0xfc8   :  { %v2317_v3 = vpop.xlane.xlu0 %2316 }
 0xfc9   :  { %v2327_v23 = vmul.f32 0.015625, %v2317_v3  ;;  %v6035_v3 = vld [vmem:[%s8310_s15 + $0x18] sm:$0xff]  }
 0xfcb   :  { %v2331_v35 = vadd.f32 1e-05, %v2327_v23  ;;  %v6036_v23 = vld [vmem:[%s8310_s15 + $0x10] sm:$0xff]  }
 0xfcc   :  { %v2320_v39 = vpop.xlane.xlu1 %2319 }
 0xfcd   :  { %6207 = vrsqrt.f32 %v2331_v35  ;;  %v2328_v22 = vmul.f32 0.015625, %v2320_v39  ;;  %v6037_v35 = vld [vmem:[%s8310_s15 + $0x8] sm:$0xff]   ;;  %v6038_v39 = vld [vmem:[%s8310_s15] sm:$0xff]  }
 0xfcf   :  { %v2332_v11 = vadd.f32 1e-05, %v2328_v22  ;;  %v6392_v22 = vld [vmem:[%s8316_s21] sm:$0x3] }
 0xfd0   :  { %v2326_v59 = vpop.xlane.xlu1 %2325  ;;  %v2323_v6 = vpop.xlane.xlu0 %2322 }
 0xfd1   :  { %6209 = vrsqrt.f32 %v2332_v11  ;;  %v2330_v50 = vmul.f32 0.015625, %v2326_v59  ;;  %v2329_v43 = vmul.f32 0.015625, %v2323_v6  ;;  %v2364_v11 = vrot.slane %v6392_v22, %v6811_v51 }
 0xfd3   :  { %v2334_v60 = vadd.f32 1e-05, %v2330_v50  ;;  %v2333_v14 = vadd.f32 1e-05, %v2329_v43 }
 0xfd5   :  { %6211 = vrsqrt.f32 %v2334_v60 }
 0xfd6   :  { %6213 = vrsqrt.f32 %v2333_v14 }
 0xfda   :  { %v6208_v18 = vpop.eup %6207 }
 0xfdb   :  { %v2339_v12 = vmul.f32 %v6208_v18, %v2307_v16 }
 0xfdd   :  { %v2347_v24 = vmul.f32 %v2346_v61, %v2339_v12 }
 0xfde   :  { %v6210_v21 = vpop.eup %6209 }
 0xfdf   :  { %v2340_v2 = vmul.f32 %v6210_v21, %v2308_v27  ;;  %v2355_v19 = vadd.f32 %v2354_v1, %v2347_v24  ;;  %v6031_v27 = vld [vmem:[%s8310_s15 + $0x38] sm:$0xff]  }
 0xfe0   :  { %5673 = vmatprep.subr.bf16.mxu0 %v6031_v27 }
 0xfe1   :  { %v2348_v52 = vmul.f32 %v2346_v61, %v2340_v2  ;;  %5674 = vmatpush3.bf16.msra.mxu0 %v6031_v27 }
 0xfe2   :  { %v6212_v55 = vpop.eup %6211 }
 0xfe3   :  { %v6214_v44 = vpop.eup %6213  ;;  %v2342_v57 = vmul.f32 %v6212_v55, %v2310_v41  ;;  %v2356_v10 = vadd.f32 %v2354_v1, %v2348_v52  ;;  %v6032_v41 = vld [vmem:[%s8310_s15 + $0x30] sm:$0xff]  }
 0xfe4   :  { %v2341_v17 = vmul.f32 %v6214_v44, %v2309_v47  ;;  %5675 = vmatprep.subr.bf16.mxu0 %v6032_v41  ;;  %v6033_v47 = vld [vmem:[%s8310_s15 + $0x28] sm:$0xff]  }
 0xfe5   :  { %v2359_v36 = vpack.c.bf16 %v2356_v10, %v2355_v19  ;;  %v2350_v31 = vmul.f32 %v2346_v61, %v2342_v57  ;;  %5676 = vmatpush3.bf16.msra.mxu0 %v6032_v41 }
 0xfe6   :  { %v2349_v25 = vmul.f32 %v2346_v61, %v2341_v17  ;;  %5677 = vmatprep.subr.bf16.mxu0 %v6033_v47 }
 0xfe7   :  { %5669 = vmatprep.mubr.msk.bf16.mxu1 %vm250_vm0, %v2359_v36  ;;  %v2358_v16 = vadd.f32 %v2354_v1, %v2350_v31 }
 0xfe8   :  { %v2357_v63 = vadd.f32 %v2354_v1, %v2349_v25 }
 0xfe9   :  { %5678 = vmatpush3.bf16.msra.mxu0 %v6033_v47 }
 0xfea   :  { %v2360_v26 = vpack.c.bf16 %v2358_v16, %v2357_v63  ;;  %5679 = vmatprep.subr.bf16.mxu0 %v6034_v7 }
 0xfec   :  { %5670 = vmatmul.mubr.msk.bf16.vlgmr.msra.gmra.mxu1 %vm250_vm0, %v2360_v26 }
 0xfed   :  { %5680 = vmatpush3.bf16.msra.mxu0 %v6034_v7 }
 0xfee   :  { %5681 = vmatprep.subr.bf16.mxu0 %v6035_v3 }
 0xff1   :  { %5682 = vmatpush3.bf16.msra.mxu0 %v6035_v3  ;;  %v8349_v3 = vmov 0  }
 0xff2   :  { %5683 = vmatprep.subr.bf16.mxu0 %v6036_v23 }
 0xff5   :  { %5684 = vmatpush3.bf16.msra.mxu0 %v6036_v23  ;;  %v2477_v23 = vrot.slane %v7453_v13, %v6935_v8 }
 0xff6   :  { %5685 = vmatprep.subr.bf16.mxu0 %v6037_v35 }
 0xff9   :  { %5686 = vmatpush3.bf16.msra.mxu0 %v6037_v35 }
 0xffa   :  { %5687 = vmatprep.subr.bf16.mxu0 %v6038_v39 }
 0xffd   :  { %5688 = vmatpush3.bf16.msra.mxu0 %v6038_v39 }
0x10ac   :  { %v5671_v59 = vpop.f32.mrf.mxu1 }
0x10ad   :  { %v2438_v6 = vadd.f32 %v5671_v59, %v2364_v11 }
0x10ae   :  { %v2429_v50 = vpop.f32.mrf.mxu1 }
0x10af   :  { %v5075_v43 = vmul.f32 -1.442695, %v2438_v6  ;;  %v2430_v60 = vadd.f32 %v2429_v50, %v2364_v11 }
0x10b0   :  { %v5672_v14 = vpop.f32.mrf.mxu1 }
0x10b1   :  { %v5073_v18 = vmul.f32 -1.442695, %v2430_v60  ;;  %v2441_v12 = vadd.f32 %v5672_v14, %v2364_v11  ;;  %6215 = vpow2.f32 %v5075_v43 }
0x10b2   :  { %v2432_v61 = vpop.f32.mrf.mxu1 }
0x10b3   :  { %6217 = vpow2.f32 %v5073_v18  ;;  %v5076_v21 = vmul.f32 -1.442695, %v2441_v12  ;;  %v2433_v2 = vadd.f32 %v2432_v61, %v2364_v11 }
0x10b5   :  { %6219 = vpow2.f32 %v5076_v21  ;;  %v5074_v24 = vmul.f32 -1.442695, %v2433_v2 }
0x10b7   :  { %6221 = vpow2.f32 %v5074_v24 }
0x10be   :  { %v6216_v1 = vpop.eup %6215 }
0x10bf   :  { %v2458_v57 = vadd.f32 1.0, %v6216_v1 }
0x10c0   :  { %v6218_v52 = vpop.eup %6217 }
0x10c1   :  { %v2456_v55 = vadd.f32 1.0, %v6218_v52 }
0x10c2   :  { %v6220_v44 = vpop.eup %6219 }
0x10c3   :  { %v2459_v19 = vadd.f32 1.0, %v6220_v44  ;;  %6223 = vrcp.f32 %v2456_v55 }
0x10c4   :  { %v6222_v10 = vpop.eup %6221 }
0x10c5   :  { %6225 = vrcp.f32 %v2459_v19  ;;  %v2457_v17 = vadd.f32 1.0, %v6222_v10 }
0x10c6   :  { %6227 = vrcp.f32 %v2458_v57 }
0x10c7   :  { %6229 = vrcp.f32 %v2457_v17 }
0x10d0   :  { %v6224_v36 = vpop.eup %6223 }
0x10d1   :  { %v2468_v26 = vmul.f32 %v6224_v36, %v2430_v60 }
0x10d2   :  { %v6226_v31 = vpop.eup %6225 }
0x10d3   :  { %v6228_v25 = vpop.eup %6227  ;;  %v2471_v63 = vmul.f32 %v6226_v31, %v2441_v12 }
0x10d4   :  { %v6230_v16 = vpop.eup %6229  ;;  %v2470_v41 = vmul.f32 %v6228_v25, %v2438_v6 }
0x10d5   :  { %v2469_v27 = vmul.f32 %v6230_v16, %v2433_v2 }
0x10d6   :  { %v2473_v7 = vpack.c.bf16 %v2471_v63, %v2470_v41 }
0x10d7   :  { %v2472_v47 = vpack.c.bf16 %v2469_v27, %v2468_v26 }
0x10d9   :  { %5689 = vmatprep.mubr.bf16.mxu0 %v2472_v47 }
0x10da   :  { %5690 = vmatmul.mubr.bf16.vlgmr.msra.gmra.mxu0 %v2473_v7 }
0x10db   :  { %3181 = vmatprep.mubr.bf16.mxu0 %v8349_v3 }
0x119a   :  { %v5691_v35 = vpop.f32.mrf.mxu0 }
0x119b   :  { %v2569_v39 = vadd.f32 %v5691_v35, %v2477_v23 }
0x119c   :  { %v2560_v22 = vpop.f32.mrf.mxu0 }
0x119d   :  { %v2561_v11 = vadd.f32 %v2560_v22, %v2477_v23  ;;  %v2577_v50 = vmul.f32 0.5, %v2569_v39 }
0x119e   :  { %v5692_v59 = vpop.f32.mrf.mxu0 }
0x119f   :  { %v2575_v43 = vmul.f32 0.5, %v2561_v11  ;;  %v2572_v14 = vadd.f32 %v5692_v59, %v2477_v23  ;;  %v2581_v2 = vadd.f32 %v2577_v50, %v7485_v29 }
0x11a0   :  { %v2563_v60 = vpop.f32.mrf.mxu0 }
0x11a1   :  { %v2564_v18 = vadd.f32 %v2563_v60, %v2477_v23  ;;  %v2579_v6 = vadd.f32 %v2575_v43, %v7474_v45  ;;  %v2578_v12 = vmul.f32 0.5, %v2572_v14  ;;  %v2589_v55 = vsel %vm250_vm0, %v2581_v2, 0.0 }
0x11a3   :  { %v2576_v61 = vmul.f32 0.5, %v2564_v18  ;;  %v2583_v21 = vsel %vm250_vm0, %v2579_v6, 0.0  ;;  %v2582_v1 = vadd.f32 %v2578_v12, %v7477_v48 }
0x11a4   :  { %2584 = vadd.xlane.f32.xlu0 %v2583_v21  ;;  %v2638_v21 = vrot.slane %v7453_v13, %v7222_v54 }
0x11a5   :  { %v2580_v24 = vadd.f32 %v2576_v61, %v7482_v32  ;;  %v2592_v44 = vsel %vm250_vm0, %v2582_v1, 0.0 }
0x11a7   :  { %v2586_v52 = vsel %vm250_vm0, %v2580_v24, 0.0 }
0x11a8   :  { %2587 = vadd.xlane.f32.xlu1 %v2586_v52  ;;  %2590 = vadd.xlane.f32.xlu0 %v2589_v55 }
0x11ac   :  { %2593 = vadd.xlane.f32.xlu1 %v2592_v44 }
0x122d   :  { %v2585_v45 = vpop.xlane.xlu0 %2584 }
0x122e   :  { %v2595_v57 = vmul.f32 0.015625, %v2585_v45 }
0x1230   :  { %v2599_v19 = vsub.f32 %v2579_v6, %v2595_v57 }
0x1231   :  { %v2588_v10 = vpop.xlane.xlu1 %2587  ;;  %v2591_v17 = vpop.xlane.xlu0 %2590 }
0x1232   :  { %v2596_v29 = vmul.f32 0.015625, %v2588_v10  ;;  %v2597_v36 = vmul.f32 0.015625, %v2591_v17  ;;  %v2603_v31 = vmul.f32 %v2599_v19, %v2599_v19 }
0x1234   :  { %v2600_v32 = vsub.f32 %v2580_v24, %v2596_v29  ;;  %v2601_v25 = vsub.f32 %v2581_v2, %v2597_v36  ;;  %v2607_v48 = vsel %vm250_vm0, %v2603_v31, 0.0 }
0x1235   :  { %v2594_v16 = vpop.xlane.xlu1 %2593  ;;  %2608 = vadd.xlane.f32.xlu0 %v2607_v48 }
0x1236   :  { %v2598_v63 = vmul.f32 0.015625, %v2594_v16  ;;  %v2604_v26 = vmul.f32 %v2600_v32, %v2600_v32  ;;  %v2605_v27 = vmul.f32 %v2601_v25, %v2601_v25 }
0x1238   :  { %v2602_v41 = vsub.f32 %v2582_v1, %v2598_v63  ;;  %v2610_v47 = vsel %vm250_vm0, %v2604_v26, 0.0  ;;  %v2613_v7 = vsel %vm250_vm0, %v2605_v27, 0.0  ;;  %v2646_v1 = vrot.slane %v7453_v13, %v7312_v49 }
0x1239   :  { %2611 = vadd.xlane.f32.xlu1 %v2610_v47  ;;  %2614 = vadd.xlane.f32.xlu0 %v2613_v7 }
0x123a   :  { %v2606_v23 = vmul.f32 %v2602_v41, %v2602_v41 }
0x123c   :  { %v2616_v35 = vsel %vm250_vm0, %v2606_v23, 0.0 }
0x123d   :  { %2617 = vadd.xlane.f32.xlu1 %v2616_v35 }
0x12be   :  { %v2609_v39 = vpop.xlane.xlu0 %2608 }
0x12bf   :  { %v2619_v22 = vmul.f32 0.015625, %v2609_v39 }
0x12c1   :  { %v2623_v11 = vadd.f32 1e-05, %v2619_v22 }
0x12c2   :  { %v2612_v59 = vpop.xlane.xlu1 %2611  ;;  %v2615_v50 = vpop.xlane.xlu0 %2614 }
0x12c3   :  { %6231 = vrsqrt.f32 %v2623_v11  ;;  %v2620_v43 = vmul.f32 0.015625, %v2612_v59  ;;  %v2621_v14 = vmul.f32 0.015625, %v2615_v50 }
0x12c5   :  { %v2624_v60 = vadd.f32 1e-05, %v2620_v43  ;;  %v2625_v18 = vadd.f32 1e-05, %v2621_v14 }
0x12c6   :  { %v2618_v6 = vpop.xlane.xlu1 %2617 }
0x12c7   :  { %6233 = vrsqrt.f32 %v2624_v60  ;;  %v2622_v12 = vmul.f32 0.015625, %v2618_v6 }
0x12c8   :  { %6235 = vrsqrt.f32 %v2625_v18 }
0x12c9   :  { %v2626_v61 = vadd.f32 1e-05, %v2622_v12 }
0x12cb   :  { %6237 = vrsqrt.f32 %v2626_v61 }
0x12d0   :  { %v6232_v2 = vpop.eup %6231 }
0x12d1   :  { %v2631_v24 = vmul.f32 %v6232_v2, %v2599_v19 }
0x12d3   :  { %v2639_v52 = vmul.f32 %v2638_v21, %v2631_v24  ;;  %v6039_v24 = vld [vmem:[%s8307_s12 + $0x38] sm:$0xff]  }
0x12d4   :  { %v6234_v55 = vpop.eup %6233  ;;  %5693 = vmatprep.subr.bf16.mxu1 %v6039_v24 }
0x12d5   :  { %v6236_v44 = vpop.eup %6235  ;;  %v7566_v45 = vadd.f32 %v2646_v1, %v2639_v52  ;;  %v2632_v57 = vmul.f32 %v6234_v55, %v2600_v32  ;;  %5694 = vmatpush3.bf16.msra.mxu1 %v6039_v24  ;;  %v6041_v52 = vld [vmem:[%s8307_s12 + $0x28] sm:$0xff]   ;;  %v6042_v55 = vld [vmem:[%s8307_s12 + $0x20] sm:$0xff]  }
0x12d6   :  { %v2633_v10 = vmul.f32 %v6236_v44, %v2601_v25 }
0x12d7   :  { %v2682_v17 = vsel %vm250_vm0, %v7566_v45, 0.0  ;;  %v2640_v29 = vmul.f32 %v2638_v21, %v2632_v57 }
0x12d8   :  { %v6238_v36 = vpop.eup %6237  ;;  %2683 = vadd.xlane.f32.xlu0 %v2682_v17  ;;  %v2641_v31 = vmul.f32 %v2638_v21, %v2633_v10 }
0x12d9   :  { %v7570_v48 = vadd.f32 %v2646_v1, %v2640_v29  ;;  %v2634_v19 = vmul.f32 %v6238_v36, %v2602_v41 }
0x12da   :  { %v7572_v16 = vadd.f32 %v2646_v1, %v2641_v31 }
0x12db   :  { %v2685_v13 = vsel %vm250_vm0, %v7570_v48, 0.0  ;;  %v2642_v63 = vmul.f32 %v2638_v21, %v2634_v19 }
0x12dc   :  { %2686 = vadd.xlane.f32.xlu1 %v2685_v13  ;;  %v2688_v32 = vsel %vm250_vm0, %v7572_v16, 0.0 }
0x12dd   :  { %2689 = vadd.xlane.f32.xlu0 %v2688_v32  ;;  %v7578_v25 = vadd.f32 %v2646_v1, %v2642_v63  ;;  %v6040_v1 = vld [vmem:[%s8307_s12 + $0x30] sm:$0xff]  }
0x12de   :  { %5695 = vmatprep.subr.bf16.mxu1 %v6040_v1 }
0x12df   :  { %v2691_v26 = vsel %vm250_vm0, %v7578_v25, 0.0  ;;  %5696 = vmatpush3.bf16.msra.mxu1 %v6040_v1 }
0x12e0   :  { %2692 = vadd.xlane.f32.xlu1 %v2691_v26  ;;  %5697 = vmatprep.subr.bf16.mxu1 %v6041_v52 }
0x12e3   :  { %5698 = vmatpush3.bf16.msra.mxu1 %v6041_v52 }
0x12e4   :  { %5699 = vmatprep.subr.bf16.mxu1 %v6042_v55 }
0x12e7   :  { %5700 = vmatpush3.bf16.msra.mxu1 %v6042_v55 }
0x1361   :  { %v2684_v27 = vpop.xlane.xlu0 %2683 }
0x1362   :  { %v2694_v47 = vmul.f32 0.015625, %v2684_v27  ;;  %v7605_v27 = vld [vmem:[%s8315_s20 + $0x10] sm:$0xff] }
0x1364   :  { %v2698_v41 = vsub.f32 %v7566_v45, %v2694_v47 }
0x1365   :  { %v2687_v7 = vpop.xlane.xlu1 %2686 }
0x1366   :  { %v2695_v23 = vmul.f32 0.015625, %v2687_v7  ;;  %v2690_v35 = vpop.xlane.xlu0 %2689  ;;  %v2702_v39 = vmul.f32 %v2698_v41, %v2698_v41 }
0x1367   :  { %v2696_v22 = vmul.f32 0.015625, %v2690_v35 }
0x1368   :  { %v2699_v11 = vsub.f32 %v7570_v48, %v2695_v23  ;;  %v2706_v59 = vsel %vm250_vm0, %v2702_v39, 0.0  ;;  %v2737_v23 = vrot.slane %v7605_v27, %v6801_v46 }
0x1369   :  { %v2700_v50 = vsub.f32 %v7572_v16, %v2696_v22  ;;  %v2693_v43 = vpop.xlane.xlu1 %2692  ;;  %2707 = vadd.xlane.f32.xlu0 %v2706_v59 }
0x136a   :  { %v2697_v14 = vmul.f32 0.015625, %v2693_v43  ;;  %v2703_v60 = vmul.f32 %v2699_v11, %v2699_v11  ;;  %v2745_v43 = vrot.slane %v7605_v27, %v6811_v51 }
0x136b   :  { %v2704_v18 = vmul.f32 %v2700_v50, %v2700_v50 }
0x136c   :  { %v2701_v6 = vsub.f32 %v7578_v25, %v2697_v14  ;;  %v2709_v12 = vsel %vm250_vm0, %v2703_v60, 0.0 }
0x136d   :  { %2710 = vadd.xlane.f32.xlu1 %v2709_v12  ;;  %v2712_v61 = vsel %vm250_vm0, %v2704_v18, 0.0 }
0x136e   :  { %2713 = vadd.xlane.f32.xlu0 %v2712_v61  ;;  %v2705_v21 = vmul.f32 %v2701_v6, %v2701_v6 }
0x1370   :  { %v2715_v2 = vsel %vm250_vm0, %v2705_v21, 0.0 }
0x1371   :  { %2716 = vadd.xlane.f32.xlu1 %v2715_v2 }
0x13f2   :  { %v2708_v44 = vpop.xlane.xlu0 %2707 }
0x13f3   :  { %v2718_v57 = vmul.f32 0.015625, %v2708_v44  ;;  %v6046_v44 = vld [vmem:[%s8308_s13 + $0x60] sm:$0xff]  }
0x13f5   :  { %v2722_v10 = vadd.f32 1e-05, %v2718_v57  ;;  %v6047_v57 = vld [vmem:[%s8308_s13 + $0x58] sm:$0xff]  }
0x13f6   :  { %v2711_v17 = vpop.xlane.xlu1 %2710 }
0x13f7   :  { %6239 = vrsqrt.f32 %v2722_v10  ;;  %v2719_v29 = vmul.f32 0.015625, %v2711_v17  ;;  %v2714_v36 = vpop.xlane.xlu0 %2713  ;;  %v6048_v10 = vld [vmem:[%s8308_s13 + $0x50] sm:$0xff]   ;;  %v6049_v17 = vld [vmem:[%s8308_s13 + $0x48] sm:$0xff]  }
0x13f8   :  { %v2720_v31 = vmul.f32 0.015625, %v2714_v36  ;;  %v5087_v36 = vld [vmem:[%s8316_s21 + $0x2] sm:$0x3] }
0x13f9   :  { %v2723_v19 = vadd.f32 1e-05, %v2719_v29  ;;  %v6050_v29 = vld [vmem:[%s8308_s13 + $0x40] sm:$0xff]  }
0x13fa   :  { %v2724_v13 = vadd.f32 1e-05, %v2720_v31  ;;  %v2717_v63 = vpop.xlane.xlu1 %2716  ;;  %v2755_v31 = vrot.slane %v5087_v36, %v6801_v46 }
0x13fb   :  { %6241 = vrsqrt.f32 %v2723_v19  ;;  %v2721_v32 = vmul.f32 0.015625, %v2717_v63 }
0x13fc   :  { %6243 = vrsqrt.f32 %v2724_v13 }
0x13fd   :  { %v2725_v26 = vadd.f32 1e-05, %v2721_v32 }
0x13ff   :  { %6245 = vrsqrt.f32 %v2725_v26 }
0x1404   :  { %v6240_v47 = vpop.eup %6239 }
0x1405   :  { %v2730_v7 = vmul.f32 %v6240_v47, %v2698_v41 }
0x1407   :  { %v2738_v59 = vmul.f32 %v2737_v23, %v2730_v7 }
0x1408   :  { %v6242_v35 = vpop.eup %6241 }
0x1409   :  { %v6244_v39 = vpop.eup %6243  ;;  %v2731_v22 = vmul.f32 %v6242_v35, %v2699_v11  ;;  %v2746_v61 = vadd.f32 %v2745_v43, %v2738_v59  ;;  %v6043_v11 = vld [vmem:[%s8308_s13 + $0x78] sm:$0xff]  }
0x140a   :  { %v2732_v14 = vmul.f32 %v6244_v39, %v2700_v50  ;;  %5705 = vmatprep.subr.bf16.mxu1 %v6043_v11  ;;  %v6044_v50 = vld [vmem:[%s8308_s13 + $0x70] sm:$0xff]  }
0x140b   :  { %v2739_v60 = vmul.f32 %v2737_v23, %v2731_v22 }
0x140c   :  { %v6246_v18 = vpop.eup %6245  ;;  %v2740_v2 = vmul.f32 %v2737_v23, %v2732_v14 }
0x140d   :  { %v2733_v12 = vmul.f32 %v6246_v18, %v2701_v6  ;;  %v2747_v21 = vadd.f32 %v2745_v43, %v2739_v60  ;;  %v6045_v6 = vld [vmem:[%s8308_s13 + $0x68] sm:$0xff]  }
0x140e   :  { %v2748_v41 = vadd.f32 %v2745_v43, %v2740_v2 }
0x140f   :  { %v2750_v24 = vpack.c.bf16 %v2747_v21, %v2746_v61  ;;  %v2741_v1 = vmul.f32 %v2737_v23, %v2733_v12 }
0x1411   :  { %5701 = vmatprep.mubr.msk.bf16.mxu1 %vm250_vm0, %v2750_v24  ;;  %v2749_v52 = vadd.f32 %v2745_v43, %v2741_v1 }
0x1413   :  { %v2751_v55 = vpack.c.bf16 %v2749_v52, %v2748_v41 }
0x1415   :  { %5702 = vmatmul.mubr.msk.bf16.vlgmr.msra.gmra.mxu1 %vm250_vm0, %v2751_v55 }
0x1416   :  { %5706 = vmatpush3.bf16.msra.mxu1 %v6043_v11 }
0x1417   :  { %5707 = vmatprep.subr.bf16.mxu1 %v6044_v50 }
0x141a   :  { %5708 = vmatpush3.bf16.msra.mxu1 %v6044_v50 }
0x141b   :  { %5709 = vmatprep.subr.bf16.mxu1 %v6045_v6 }
0x141e   :  { %5710 = vmatpush3.bf16.msra.mxu1 %v6045_v6 }
0x141f   :  { %5711 = vmatprep.subr.bf16.mxu1 %v6046_v44 }
0x1422   :  { %5712 = vmatpush3.bf16.msra.mxu1 %v6046_v44 }
0x1423   :  { %5713 = vmatprep.subr.bf16.mxu1 %v6047_v57 }
0x1426   :  { %5714 = vmatpush3.bf16.msra.mxu1 %v6047_v57 }
0x1427   :  { %5715 = vmatprep.subr.bf16.mxu1 %v6048_v10 }
0x142a   :  { %5716 = vmatpush3.bf16.msra.mxu1 %v6048_v10  ;;  %v7644_v10 = vld [vmem:[%s8341_s28] sm:$0xff]  }
0x142b   :  { %5717 = vmatprep.subr.bf16.mxu1 %v6049_v17 }
0x142e   :  { %5718 = vmatpush3.bf16.msra.mxu1 %v6049_v17  ;;  %v2868_v17 = vrot.slane %v7605_v27, %v6846_v53 }
0x142f   :  { %5719 = vmatprep.subr.bf16.mxu1 %v6050_v29 }
0x1432   :  { %5720 = vmatpush3.bf16.msra.mxu1 %v6050_v29 }
0x14d5   :  { %v5703_v19 = vpop.f32.mrf.mxu1 }
0x14d6   :  { %v2829_v13 = vadd.f32 %v5703_v19, %v2755_v31 }
0x14d7   :  { %v2820_v63 = vpop.f32.mrf.mxu1 }
0x14d8   :  { %v5120_v32 = vmul.f32 -1.442695, %v2829_v13  ;;  %v2821_v26 = vadd.f32 %v2820_v63, %v2755_v31 }
0x14d9   :  { %v5704_v47 = vpop.f32.mrf.mxu1 }
0x14da   :  { %v5118_v7 = vmul.f32 -1.442695, %v2821_v26  ;;  %v2832_v23 = vadd.f32 %v5704_v47, %v2755_v31  ;;  %6247 = vpow2.f32 %v5120_v32 }
0x14db   :  { %v2823_v35 = vpop.f32.mrf.mxu1 }
0x14dc   :  { %6249 = vpow2.f32 %v5118_v7  ;;  %v5121_v39 = vmul.f32 -1.442695, %v2832_v23  ;;  %v2824_v22 = vadd.f32 %v2823_v35, %v2755_v31 }
0x14de   :  { %6251 = vpow2.f32 %v5121_v39  ;;  %v5119_v59 = vmul.f32 -1.442695, %v2824_v22 }
0x14e0   :  { %6253 = vpow2.f32 %v5119_v59 }
0x14e7   :  { %v6248_v43 = vpop.eup %6247 }
0x14e8   :  { %v2849_v12 = vadd.f32 1.0, %v6248_v43 }
0x14e9   :  { %v6250_v14 = vpop.eup %6249 }
0x14ea   :  { %v2847_v60 = vadd.f32 1.0, %v6250_v14 }
0x14eb   :  { %v6252_v18 = vpop.eup %6251 }
0x14ec   :  { %v2850_v61 = vadd.f32 1.0, %v6252_v18  ;;  %6255 = vrcp.f32 %v2847_v60 }
0x14ed   :  { %v6254_v21 = vpop.eup %6253 }
0x14ee   :  { %6257 = vrcp.f32 %v2850_v61  ;;  %v2848_v2 = vadd.f32 1.0, %v6254_v21 }
0x14ef   :  { %6259 = vrcp.f32 %v2849_v12 }
0x14f0   :  { %6261 = vrcp.f32 %v2848_v2 }
0x14f9   :  { %v6256_v24 = vpop.eup %6255 }
0x14fa   :  { %v2859_v11 = vmul.f32 %v6256_v24, %v2821_v26 }
0x14fb   :  { %v6258_v1 = vpop.eup %6257 }
0x14fc   :  { %v6260_v41 = vpop.eup %6259  ;;  %v2862_v55 = vmul.f32 %v6258_v1, %v2832_v23 }
0x14fd   :  { %v6262_v52 = vpop.eup %6261  ;;  %v2861_v6 = vmul.f32 %v6260_v41, %v2829_v13 }
0x14fe   :  { %v2860_v50 = vmul.f32 %v6262_v52, %v2824_v22 }
0x14ff   :  { %v2864_v57 = vpack.c.bf16 %v2862_v55, %v2861_v6 }
0x1500   :  { %v2863_v44 = vpack.c.bf16 %v2860_v50, %v2859_v11 }
0x1502   :  { %5721 = vmatprep.mubr.bf16.mxu1 %v2863_v44 }
0x1503   :  { %5722 = vmatmul.mubr.bf16.vlgmr.msra.gmra.mxu1 %v2864_v57 }
0x1504   :  { %5741 = vmatprep.mubr.msk.bf16.mxu1 %vm969_vm1, %v7644_v10 }
0x15c3   :  { %v5723_v29 = vpop.f32.mrf.mxu1 }
0x15c4   :  { %v2960_v36 = vadd.f32 %v5723_v29, %v2868_v17 }
0x15c5   :  { %v2951_v31 = vpop.f32.mrf.mxu1 }
0x15c6   :  { %v2952_v19 = vadd.f32 %v2951_v31, %v2868_v17  ;;  %v2968_v63 = vmul.f32 0.5, %v2960_v36  ;;  %v6053_v31 = vld [vmem:[%s8304_s9 + $0xac] ss:$12 sps:$4 sm:$0xff]  }
0x15c7   :  { %v5724_v13 = vpop.f32.mrf.mxu1  ;;  %3157 = vmatprep.subr.bf16.mxu0 %v6053_v31 }
0x15c8   :  { %v2966_v32 = vmul.f32 0.5, %v2952_v19  ;;  %v2963_v26 = vadd.f32 %v5724_v13, %v2868_v17  ;;  %v7654_v35 = vadd.f32 %v2968_v63, %v7572_v16  ;;  %v6051_v19 = vld [vmem:[%s8304_s9 + $0xa8] ss:$12 sps:$4 sm:$0xff]   ;;  %v6054_v63 = vld [vmem:[%s8304_s9 + $0x90] ss:$12 sps:$4 sm:$0xff]  }
0x15c9   :  { %v2954_v47 = vpop.f32.mrf.mxu1  ;;  %3158 = vmatpush1.bf16.msra.mxu0 %v6051_v19  ;;  %v6056_v13 = vld [vmem:[%s8304_s9 + $0x94] ss:$12 sps:$4 sm:$0xff]  }
0x15ca   :  { %v7651_v7 = vadd.f32 %v2966_v32, %v7566_v45  ;;  %v2955_v23 = vadd.f32 %v2954_v47, %v2868_v17  ;;  %v2969_v39 = vmul.f32 0.5, %v2963_v26  ;;  %v2980_v60 = vsel %vm250_vm0, %v7654_v35, 0.0  ;;  %v6059_v32 = vld [vmem:[%s8304_s9 + $0x7c] ss:$12 sps:$4 sm:$0xff]   ;;  %3159 = vmatprep.subr.bf16.mxu0 %v6056_v13  ;;  %v6057_v26 = vld [vmem:[%s8304_s9 + $0x78] ss:$12 sps:$4 sm:$0xff]  }
0x15cb   :  { %v6062_v47 = vld [vmem:[%s8304_s9 + $0x64] ss:$12 sps:$4 sm:$0xff]  }
0x15cc   :  { %v2967_v22 = vmul.f32 0.5, %v2955_v23  ;;  %v2974_v59 = vsel %vm250_vm0, %v7651_v7, 0.0  ;;  %v7662_v14 = vadd.f32 %v2969_v39, %v7578_v25  ;;  %v6060_v23 = vld [vmem:[%s8304_s9 + $0x60] ss:$12 sps:$4 sm:$0xff]   ;;  %v6063_v39 = vld [vmem:[%s8304_s9 + $0xb0] ss:$12 sps:$4 sm:$0xff]  }
0x15cd   :  { %2975 = vadd.xlane.f32.xlu0 %v2974_v59  ;;  %3160 = vmatpush1.bf16.msra.mxu0 %v6054_v63 }
0x15ce   :  { %v7659_v43 = vadd.f32 %v2967_v22, %v7570_v48  ;;  %v2983_v16 = vsel %vm250_vm0, %v7662_v14, 0.0  ;;  %3161 = vmatprep.subr.bf16.mxu0 %v6059_v32 }
0x15d0   :  { %v2977_v45 = vsel %vm250_vm0, %v7659_v43, 0.0 }
0x15d1   :  { %2978 = vadd.xlane.f32.xlu1 %v2977_v45  ;;  %2981 = vadd.xlane.f32.xlu0 %v2980_v60 }
0x15d2   :  { %3162 = vmatpush1.bf16.msra.mxu0 %v6057_v26 }
0x15d3   :  { %3163 = vmatprep.subr.bf16.mxu0 %v6062_v47 }
0x15d5   :  { %2984 = vadd.xlane.f32.xlu1 %v2983_v16 }
0x15d6   :  { %3164 = vmatpush1.bf16.msra.mxu0 %v6060_v23  ;;  %v6065_v23 = vld [vmem:[%s8304_s9 + $0x80] ss:$12 sps:$4 sm:$0xff]  }
0x15d7   :  { %5725 = vmatprep.subr.bf16.mxu0 %v6063_v39 }
0x1656   :  { %v2976_v18 = vpop.xlane.xlu0 %2975 }
0x1657   :  { %v2986_v12 = vmul.f32 0.015625, %v2976_v18 }
0x1659   :  { %v2990_v48 = vsub.f32 %v7651_v7, %v2986_v12 }
0x165a   :  { %v2979_v61 = vpop.xlane.xlu1 %2978  ;;  %v2982_v21 = vpop.xlane.xlu0 %2981 }
0x165b   :  { %v2987_v25 = vmul.f32 0.015625, %v2979_v61  ;;  %v2988_v2 = vmul.f32 0.015625, %v2982_v21  ;;  %v2994_v24 = vmul.f32 %v2990_v48, %v2990_v48 }
0x165d   :  { %v2991_v1 = vsub.f32 %v7659_v43, %v2987_v25  ;;  %v2992_v41 = vsub.f32 %v7654_v35, %v2988_v2  ;;  %v2998_v52 = vsel %vm250_vm0, %v2994_v24, 0.0 }
0x165e   :  { %v2985_v55 = vpop.xlane.xlu1 %2984  ;;  %2999 = vadd.xlane.f32.xlu0 %v2998_v52 }
0x165f   :  { %v2989_v11 = vmul.f32 0.015625, %v2985_v55  ;;  %v2995_v50 = vmul.f32 %v2991_v1, %v2991_v1  ;;  %v2996_v6 = vmul.f32 %v2992_v41, %v2992_v41 }
0x1661   :  { %v2993_v44 = vsub.f32 %v7662_v14, %v2989_v11  ;;  %v3001_v57 = vsel %vm250_vm0, %v2995_v50, 0.0  ;;  %v3004_v17 = vsel %vm250_vm0, %v2996_v6, 0.0  ;;  %v3029_v11 = vrot.slane %v7605_v27, %v6929_v62 }
0x1662   :  { %3002 = vadd.xlane.f32.xlu1 %v3001_v57  ;;  %3005 = vadd.xlane.f32.xlu0 %v3004_v17  ;;  %v3037_v17 = vrot.slane %v7605_v27, %v6935_v8 }
0x1663   :  { %v2997_v29 = vmul.f32 %v2993_v44, %v2993_v44 }
0x1665   :  { %v3007_v36 = vsel %vm250_vm0, %v2997_v29, 0.0 }
0x1666   :  { %3008 = vadd.xlane.f32.xlu1 %v3007_v36 }
0x16e7   :  { %v3000_v22 = vpop.xlane.xlu0 %2999 }
0x16e8   :  { %v3010_v59 = vmul.f32 0.015625, %v3000_v22  ;;  %v6066_v22 = vld [vmem:[%s8304_s9 + $0x68] ss:$12 sps:$4 sm:$0xff]  }
0x16ea   :  { %v3014_v45 = vadd.f32 1e-05, %v3010_v59 }
0x16eb   :  { %v3003_v60 = vpop.xlane.xlu1 %3002  ;;  %v3006_v16 = vpop.xlane.xlu0 %3005 }
0x16ec   :  { %6263 = vrsqrt.f32 %v3014_v45  ;;  %v3011_v18 = vmul.f32 0.015625, %v3003_v60  ;;  %v3012_v12 = vmul.f32 0.015625, %v3006_v16  ;;  %v3062_v60 = vld [vmem:[#allocation13 + $0x3] sm:$0x7] }
0x16ee   :  { %v3015_v61 = vadd.f32 1e-05, %v3011_v18  ;;  %v3016_v21 = vadd.f32 1e-05, %v3012_v12  ;;  %v3071_v18 = vrot.slane %v3062_v60, %v6811_v51 }
0x16ef   :  { %v3009_v25 = vpop.xlane.xlu1 %3008 }
0x16f0   :  { %6265 = vrsqrt.f32 %v3015_v61  ;;  %v3013_v2 = vmul.f32 0.015625, %v3009_v25 }
0x16f1   :  { %6267 = vrsqrt.f32 %v3016_v21 }
0x16f2   :  { %v3017_v24 = vadd.f32 1e-05, %v3013_v2 }
0x16f4   :  { %6269 = vrsqrt.f32 %v3017_v24 }
0x16f9   :  { %v6264_v52 = vpop.eup %6263 }
0x16fa   :  { %v3022_v55 = vmul.f32 %v6264_v52, %v2990_v48  ;;  %v6064_v48 = vld [vmem:[%s8304_s9 + $0x98] ss:$12 sps:$4 sm:$0xff]   ;;  %v3067_v52 = vrot.slane %v3062_v60, %v6801_v46 }
0x16fc   :  { %v3030_v57 = vmul.f32 %v3029_v11, %v3022_v55 }
0x16fd   :  { %v6266_v50 = vpop.eup %6265 }
0x16fe   :  { %v3023_v6 = vmul.f32 %v6266_v50, %v2991_v1  ;;  %v6268_v29 = vpop.eup %6267  ;;  %v3038_v19 = vadd.f32 %v3037_v17, %v3030_v57 }
0x16ff   :  { %v3024_v63 = vmul.f32 %v6268_v29, %v2992_v41 }
0x1700   :  { %v3031_v36 = vmul.f32 %v3029_v11, %v3023_v6 }
0x1701   :  { %v6270_v31 = vpop.eup %6269  ;;  %v3032_v1 = vmul.f32 %v3029_v11, %v3024_v63 }
0x1702   :  { %v3039_v13 = vadd.f32 %v3037_v17, %v3031_v36  ;;  %v3025_v32 = vmul.f32 %v6270_v31, %v2993_v44 }
0x1703   :  { %v3040_v41 = vadd.f32 %v3037_v17, %v3032_v1 }
0x1704   :  { %v3059_v26 = vpack.c.bf16 %v3039_v13, %v3038_v19  ;;  %v3033_v47 = vmul.f32 %v3029_v11, %v3025_v32 }
0x1706   :  { %5158 = vmatmul.mubr.msk.bf16.vlgmr.msra.gmra.mxu0 %vm250_vm0, %v3059_v26  ;;  %v3041_v27 = vadd.f32 %v3037_v17, %v3033_v47 }
0x1707   :  { %5726 = vmatpush3.bf16.msra.mxu0 %v6063_v39  ;;  %3191 = vmatprep.mubr.bf16.mxu0 %v8349_v3 }
0x1708   :  { %5727 = vmatprep.subr.bf16.mxu0 %v6064_v48  ;;  %v3060_v44 = vpack.c.bf16 %v3041_v27, %v3040_v41 }
0x170b   :  { %5728 = vmatpush3.bf16.msra.mxu0 %v6064_v48 }
0x170c   :  { %5729 = vmatprep.subr.bf16.mxu0 %v6065_v23 }
0x170e   :  { %5159 = vmatmul.mubr.msk.bf16.gmra.mxu0 %vm250_vm0, %v3060_v44 }
0x170f   :  { %5730 = vmatpush3.bf16.msra.mxu0 %v6065_v23  ;;  %5733 = vmatprep.mubr.msk.bf16.mxu0 %vm250_vm0, %v3059_v26 }
0x1710   :  { %5731 = vmatprep.subr.bf16.mxu0 %v6066_v22 }
0x1713   :  { %5732 = vmatpush3.bf16.msra.mxu0 %v6066_v22 }
0x1716   :  { %5734 = vmatmul.mubr.msk.bf16.vlgmr.msra.gmra.mxu0 %vm250_vm0, %v3060_v44 }
0x1717   :  { %5761 = vmatprep.mubr.msk.bf16.mxu0 %vm969_vm1, %v7644_v10  ;;  %v3075_v10 = vrot.slane %v3062_v60, %v6846_v53 }
0x17c6   :  { %v3183_v3 = vpop.f32.mrf.mxu0 }
0x17c7   :  { %v3184_v36 = vadd.f32 %v3183_v3, %v3067_v52  ;;  %v6396_v3 = vld [vmem:[%s8341_s28 + $0x18] sm:$0xff]  }
0x17c8   :  { %v3185_v39 = vpop.f32.mrf.mxu0 }
0x17c9   :  { %v3186_v50 = vadd.f32 %v3185_v39, %v3071_v18  ;;  %v3255_v23 = vmul.f32 %v3184_v36, %v6968_v42  ;;  %v6398_v39 = vld [vmem:[%s8341_s28 + $0x28] sm:$0xff]  }
0x17ca   :  { %v3187_v59 = vpop.f32.mrf.mxu0 }
0x17cb   :  { %v7732_v6 = vadd.f32 %v3187_v59, %v3067_v52  ;;  %v3283_v19 = vmul.f32 %v3186_v50, %v6968_v42  ;;  %v6394_v42 = vld [vmem:[%s8341_s28 + $0x8] sm:$0xff]   ;;  %v6399_v59 = vld [vmem:[%s8341_s28 + $0x30] sm:$0xff]  }
0x17cc   :  { %v3189_v45 = vpop.f32.mrf.mxu0 }
0x17cd   :  { %v7726_v25 = vadd.f32 %v3189_v45, %v3071_v18  ;;  %v3256_v13 = vmul.f32 %v7732_v6, %v6984_v58  ;;  %v6400_v45 = vld [vmem:[%s8341_s28 + $0x38] sm:$0xff]  }
0x17ce   :  { %v3193_v16 = vpop.f32.mrf.mxu0 }
0x17cf   :  { %v3284_v57 = vmul.f32 %v7726_v25, %v6984_v58  ;;  %v3194_v41 = vadd.f32 %v3193_v16, %v3067_v52  ;;  %v6401_v16 = vld [vmem:[#allocation5 + $0x10] sm:$0xff] }
0x17d0   :  { %v3195_v12 = vpop.f32.mrf.mxu0 }
0x17d1   :  { %v3196_v61 = vadd.f32 %v3195_v12, %v3071_v18  ;;  %v3257_v22 = vmul.f32 %v3194_v41, %v6962_v38  ;;  %v6402_v12 = vld [vmem:[#allocation5 + $0x18] sm:$0xff] }
0x17d2   :  { %v3197_v21 = vpop.f32.mrf.mxu0 }
0x17d3   :  { %v3285_v2 = vmul.f32 %v3196_v61, %v6962_v38  ;;  %v7742_v26 = vadd.f32 %v3197_v21, %v3067_v52  ;;  %v6397_v38 = vld [vmem:[%s8341_s28 + $0x20] sm:$0xff]  }
0x17d4   :  { %v3199_v24 = vpop.f32.mrf.mxu0 }
0x17d5   :  { %v3200_v55 = vadd.f32 %v3199_v24, %v3071_v18  ;;  %3295 = vrot.lane.b32.xlu0 %v3285_v2, %s6599_s5  ;;  %v3258_v58 = vmul.f32 %v7742_v26, %v6956_v30  ;;  %v3281_v18 = vmul.f32 %v6401_v16, %v3196_v61 }
0x17d6   :  { %v5735_v11 = vpop.f32.mrf.mxu0 }
0x17d7   :  { %v3286_v17 = vmul.f32 %v3200_v55, %v6956_v30  ;;  %v3245_v63 = vadd.f32 %v5735_v11, %v3075_v10  ;;  %v6395_v30 = vld [vmem:[%s8341_s28 + $0x10] sm:$0xff]   ;;  %v3282_v21 = vmul.f32 %v6402_v12, %v3200_v55 }
0x17d8   :  { %v3236_v29 = vpop.f32.mrf.mxu0 }
0x17d9   :  { %3297 = vrot.lane.b32.xlu1 %v3286_v17, %s6599_s5  ;;  %3293 = vrot.lane.b32.xlu0 %v3284_v57, %s6599_s5  ;;  %v3237_v47 = vadd.f32 %v3236_v29, %v3075_v10  ;;  %v6403_v57 = vld [vmem:[#allocation5 + $0x8] sm:$0xff]  ;;  %v6404_v29 = vld [vmem:[#allocation5] sm:$0xff] }
0x17da   :  { %v5736_v31 = vpop.f32.mrf.mxu0  ;;  %v3280_v17 = vmul.f32 %v6403_v57, %v7726_v25  ;;  %v3252_v61 = vmul.f32 %v6403_v57, %v7732_v6  ;;  %v3251_v55 = vmul.f32 %v6404_v29, %v3184_v36  ;;  %v3254_v25 = vmul.f32 %v6402_v12, %v7742_v26 }
0x17db   :  { %v3248_v32 = vadd.f32 %v5736_v31, %v3075_v10  ;;  %v3279_v31 = vmul.f32 %v6404_v29, %v3186_v50  ;;  %v3253_v50 = vmul.f32 %v6401_v16, %v3194_v41 }
0x17dc   :  { %v3239_v48 = vpop.f32.mrf.mxu0 }
0x17dd   :  { %v3447_v1 = vpack.c.bf16 %v3248_v32, %v3245_v63  ;;  %v3240_v27 = vadd.f32 %v3239_v48, %v3075_v10  ;;  %3291 = vrot.lane.b32.xlu1 %v3283_v19, %s6599_s5  ;;  %3265 = vrot.lane.b32.xlu0 %v3256_v13, %s6599_s5 }
0x17df   :  { %v3446_v44 = vpack.c.bf16 %v3240_v27, %v3237_v47  ;;  %5757 = vmatprep.subr.bf16.mxu0 %v3447_v1 }
0x17e0   :  { %5758 = vmatpush3.bf16.msra.mxu0 %v3447_v1 }
0x17e1   :  { %5759 = vmatprep.subr.bf16.mxu0 %v3446_v44  ;;  %3263 = vrot.lane.b32.xlu1 %v3255_v23, %s6599_s5 }
0x17e2   :  { %3269 = vrot.lane.b32.xlu0 %v3258_v58, %s6599_s5 }
0x17e4   :  { %5760 = vmatpush3.bf16.msra.mxu0 %v3446_v44 }
0x17e5   :  { %3267 = vrot.lane.b32.xlu1 %v3257_v22, %s6599_s5 }
0x17e7   :  { %5762 = vmatmul.mubr.msk.bf16.vlgmr.msra.gmra.mxu0 %vm969_vm1, %v6394_v42 }
0x17e8   :  { %5765 = vmatprep.mubr.msk.bf16.mxu0 %vm969_vm1, %v6395_v30 }
0x17ef   :  { %5766 = vmatmul.mubr.msk.bf16.gmra.mxu0 %vm969_vm1, %v6396_v3 }
0x17f0   :  { %5769 = vmatprep.mubr.msk.bf16.mxu0 %vm969_vm1, %v6397_v38 }
0x17f7   :  { %5770 = vmatmul.mubr.msk.bf16.gmra.mxu0 %vm969_vm1, %v6398_v39 }
0x17f8   :  { %5773 = vmatprep.mubr.msk.bf16.mxu0 %vm969_vm1, %v6399_v59 }
0x17ff   :  { %5774 = vmatmul.mubr.msk.bf16.gmra.mxu0 %vm969_vm1, %v6400_v45 }
0x1847   :  { %v3296_v60 = vpop.permute.xlu0 %3295 }
0x1848   :  { %v3305_v52 = vadd.f32 %v3296_v60, %v3281_v18  ;;  %v7801_v18 = vld [vmem:[#allocation10] sm:$0xff]  }
0x184b   :  { %v3298_v2 = vpop.permute.xlu1 %3297  ;;  %v3294_v24 = vpop.permute.xlu0 %3293 }
0x184c   :  { %v3306_v10 = vadd.f32 %v3298_v2, %v3282_v21  ;;  %v3304_v63 = vadd.f32 %v3294_v24, %v3280_v17 }
0x184e   :  { %v3332_v11 = vpack.c.bf16 %v3306_v10, %v3305_v52 }
0x184f   :  { %v3292_v19 = vpop.permute.xlu1 %3291  ;;  %v3266_v13 = vpop.permute.xlu0 %3265 }
0x1850   :  { %v3303_v32 = vadd.f32 %v3292_v19, %v3279_v31  ;;  %5737 = vmatprep.subr.bf16.mxu1 %v3332_v11  ;;  %v3276_v1 = vadd.f32 %v3266_v13, %v3252_v61 }
0x1851   :  { %5738 = vmatpush3.bf16.msra.mxu1 %v3332_v11 }
0x1852   :  { %v3331_v48 = vpack.c.bf16 %v3304_v63, %v3303_v32  ;;  %v7807_v63 = vld [vmem:[%s8342_s4 + $0x38] sm:$0xff]  }
0x1853   :  { %v3264_v47 = vpop.permute.xlu1 %3263 }
0x1854   :  { %v3275_v27 = vadd.f32 %v3264_v47, %v3251_v55  ;;  %5739 = vmatprep.subr.bf16.mxu1 %v3331_v48  ;;  %v3270_v23 = vpop.permute.xlu0 %3269  ;;  %v7813_v55 = vld [vmem:[%s8342_s4 + $0x30] sm:$0xff]  }
0x1855   :  { %5740 = vmatpush3.bf16.msra.mxu1 %v3331_v48  ;;  %v7784_v22 = vadd.f32 %v3270_v23, %v3254_v25  ;;  %v7825_v25 = vld [vmem:[%s8342_s4 + $0x20] sm:$0xff]  }
0x1856   :  { %v5945_v44 = vpack.i.bf16 %v3276_v1, %v3275_v27 }
0x1857   :  { %v3268_v58 = vpop.permute.xlu1 %3267 }
0x1858   :  { %v7786_v60 = vadd.f32 %v3268_v58, %v3253_v50  ;;  %5742 = vmatmul.mubr.msk.bf16.vlgmr.msra.gmra.mxu1 %vm969_vm1, %v6394_v42  ;;  %5946 = vrot.lane.b32.xlu1 %v5945_v44, %s6599_s5  ;;  %v7831_v58 = vld [vmem:[%s8342_s4 + $0x18] sm:$0xff]  }
0x1859   :  { %5745 = vmatprep.mubr.msk.bf16.mxu1 %vm969_vm1, %v6395_v30 }
0x185a   :  { %v5950_v6 = vpack.i.bf16 %v7784_v22, %v7786_v60 }
0x185c   :  { %5951 = vrot.lane.b32.xlu0 %v5950_v6, %s6599_s5 }
0x1860   :  { %5746 = vmatmul.mubr.msk.bf16.gmra.mxu1 %vm969_vm1, %v6396_v3 }
0x1861   :  { %5749 = vmatprep.mubr.msk.bf16.mxu1 %vm969_vm1, %v6397_v38 }
0x1868   :  { %5750 = vmatmul.mubr.msk.bf16.gmra.mxu1 %vm969_vm1, %v6398_v39 }
0x1869   :  { %5753 = vmatprep.mubr.msk.bf16.mxu1 %vm969_vm1, %v6399_v59 }
0x1870   :  { %5754 = vmatmul.mubr.msk.bf16.gmra.mxu1 %vm969_vm1, %v6400_v45 }
0x18ca   :  { %v5947_v36 = vpop.permute.xlu1 %5946 }
0x18cb   :  { %v5949_v26 = vunpack.i.h.bf16 %v5947_v36  ;;  %v5948_v41 = vunpack.i.l.bf16 %v5947_v36 }
0x18cd   :  { %v3324_v42 = vsel %vm250_vm0, %v3276_v1, %v5949_v26  ;;  %v3323_v30 = vsel %vm250_vm0, %v3275_v27, %v5948_v41  ;;  %v7819_v1 = vld [vmem:[%s8342_s4 + $0x28] sm:$0xff]  }
0x18ce   :  { %v3327_v16 = vpack.c.bf16 %v3324_v42, %v3323_v30  ;;  %v5952_v26 = vpop.permute.xlu0 %5951  ;;  %v7837_v42 = vld [vmem:[%s8342_s4 + $0x10] sm:$0xff]  }
0x18d0   :  { %v3329_v3 = vmul.bf16 %v7801_v18, %v3327_v16  ;;  %v5954_v16 = vunpack.i.h.bf16 %v5952_v26 }
0x18d2   :  { %5793 = vmatprep.mubr.bf16.mxu1 %v3329_v3  ;;  %v5953_v3 = vunpack.i.l.bf16 %v5952_v26 }
0x1918   :  { %v5743_v38 = vpop.f32.mrf.mxu1 }
0x191a   :  { %v3367_v12 = vpop.f32.mrf.mxu1 }
0x191c   :  { %v5744_v39 = vpop.f32.mrf.mxu1 }
0x191d   :  { %v3431_v41 = vpack.c.bf16 %v5744_v39, %v5743_v38  ;;  %v3326_v38 = vsel %vm250_vm0, %v7784_v22, %v5954_v16  ;;  %v3325_v39 = vsel %vm250_vm0, %v7786_v60, %v5953_v3 }
0x191e   :  { %v3370_v21 = vpop.f32.mrf.mxu1 }
0x1920   :  { %v5747_v59 = vpop.f32.mrf.mxu1 }
0x1922   :  { %v3383_v2 = vpop.f32.mrf.mxu1 }
0x1924   :  { %v5748_v45 = vpop.f32.mrf.mxu1 }
0x1925   :  { %v3433_v44 = vpack.c.bf16 %v5748_v45, %v5747_v59  ;;  %v7843_v59 = vld [vmem:[%s8342_s4 + $0x8] sm:$0xff]   ;;  %v3430_v45 = vpack.c.bf16 %v3370_v21, %v3367_v12 }
0x1926   :  { %v3386_v24 = vpop.f32.mrf.mxu1  ;;  %v7856_v12 = vld [vmem:[#allocation10 + $0x8] sm:$0xff]  }
0x1927   :  { %v3441_v6 = vmul.bf16 %v7831_v58, %v3433_v44  ;;  %v3432_v36 = vpack.c.bf16 %v3386_v24, %v3383_v2  ;;  %v3439_v2 = vmul.bf16 %v7843_v59, %v3431_v41  ;;  %v7853_v24 = vld [vmem:[%s8342_s4] sm:$0xff]  }
0x1928   :  { %v5751_v52 = vpop.f32.mrf.mxu1 }
0x1929   :  { %v3440_v30 = vmul.bf16 %v7837_v42, %v3432_v36 }
0x192a   :  { %v3399_v10 = vpop.f32.mrf.mxu1 }
0x192c   :  { %v5752_v11 = vpop.f32.mrf.mxu1 }
0x192d   :  { %v3435_v61 = vpack.c.bf16 %v5752_v11, %v5751_v52  ;;  %v3438_v52 = vmul.bf16 %v7853_v24, %v3430_v45 }
0x192e   :  { %v3402_v57 = vpop.f32.mrf.mxu1 }
0x192f   :  { %v3443_v27 = vmul.bf16 %v7819_v1, %v3435_v61  ;;  %v3434_v23 = vpack.c.bf16 %v3402_v57, %v3399_v10  ;;  %v3328_v10 = vpack.c.bf16 %v3326_v38, %v3325_v39  ;;  %v6415_v57 = vld [vmem:[#allocation8] sm:$0xff]  ;;  %v6418_v61 = vld [vmem:[#allocation8 + $0x10] sm:$0xff] }
0x1930   :  { %v5755_v17 = vpop.f32.mrf.mxu1 }
0x1931   :  { %v3442_v50 = vmul.bf16 %v7825_v25, %v3434_v23  ;;  %v3330_v21 = vmul.bf16 %v7856_v12, %v3328_v10 }
0x1932   :  { %v3415_v29 = vpop.f32.mrf.mxu1 }
0x1934   :  { %v5756_v31 = vpop.f32.mrf.mxu1 }
0x1935   :  { %v3437_v19 = vpack.c.bf16 %v5756_v31, %v5755_v17 }
0x1936   :  { %v3418_v13 = vpop.f32.mrf.mxu1 }
0x1937   :  { %v3445_v32 = vmul.bf16 %v7807_v63, %v3437_v19  ;;  %v3436_v48 = vpack.c.bf16 %v3418_v13, %v3415_v29  ;;  %v6416_v29 = vld [vmem:[#allocation8 + $0x18] sm:$0xff] }
0x1939   :  { %v3444_v47 = vmul.bf16 %v7813_v55, %v3436_v48  ;;  %5777 = vmatprep.subr.bf16.mxu1 %v3445_v32 }
0x193a   :  { %5778 = vmatpush3.bf16.msra.mxu1 %v3445_v32  ;;  %v6417_v32 = vld [vmem:[#allocation8 + $0x8] sm:$0xff] }
0x193b   :  { %5779 = vmatprep.subr.bf16.mxu1 %v3444_v47 }
0x193e   :  { %5780 = vmatpush3.bf16.msra.mxu1 %v3444_v47 }
0x193f   :  { %5781 = vmatprep.subr.bf16.mxu1 %v3443_v27 }
0x1942   :  { %5782 = vmatpush3.bf16.msra.mxu1 %v3443_v27 }
0x1943   :  { %5783 = vmatprep.subr.bf16.mxu1 %v3442_v50 }
0x1946   :  { %5784 = vmatpush3.bf16.msra.mxu1 %v3442_v50 }
0x1947   :  { %5785 = vmatprep.subr.bf16.mxu1 %v3441_v6 }
0x194a   :  { %5786 = vmatpush3.bf16.msra.mxu1 %v3441_v6 }
0x194b   :  { %5787 = vmatprep.subr.bf16.mxu1 %v3440_v30 }
0x194e   :  { %5788 = vmatpush3.bf16.msra.mxu1 %v3440_v30 }
0x194f   :  { %5789 = vmatprep.subr.bf16.mxu1 %v3439_v2 }
0x1952   :  { %5790 = vmatpush3.bf16.msra.mxu1 %v3439_v2 }
0x1953   :  { %5791 = vmatprep.subr.bf16.mxu1 %v3438_v52 }
0x1956   :  { %5792 = vmatpush3.bf16.msra.mxu1 %v3438_v52 }
0x1959   :  { %5794 = vmatmul.mubr.bf16.vlgmr.msra.gmra.mxu1 %v3330_v21 }
0x1a19   :  { %v5795_v22 = vpop.f32.mrf.mxu1 }
0x1a1a   :  { %v3604_v47 = vadd.f32 %v6418_v61, %v5795_v22 }
0x1a1b   :  { %v3595_v11 = vpop.f32.mrf.mxu1 }
0x1a1c   :  { %v3596_v60 = vadd.f32 %v6415_v57, %v3595_v11  ;;  %v3616_v44 = vsel %vm250_vm0, %v3604_v47, -inf }
0x1a1d   :  { %v5796_v17 = vpop.f32.mrf.mxu1 }
0x1a1e   :  { %v3607_v31 = vadd.f32 %v6416_v29, %v5796_v17  ;;  %v3610_v19 = vsel %vm250_vm0, %v3596_v60, -inf }
0x1a1f   :  { %v3598_v13 = vpop.f32.mrf.mxu1  ;;  %3611 = vmax.xlane.f32.xlu1 %v3610_v19 }
0x1a20   :  { %v3599_v48 = vadd.f32 %v6417_v32, %v3598_v13  ;;  %v3619_v23 = vsel %vm250_vm0, %v3607_v31, -inf }
0x1a22   :  { %v3613_v27 = vsel %vm250_vm0, %v3599_v48, -inf }
0x1a23   :  { %3614 = vmax.xlane.f32.xlu0 %v3613_v27  ;;  %3620 = vmax.xlane.f32.xlu1 %v3619_v23 }
0x1a27   :  { %3617 = vmax.xlane.f32.xlu0 %v3616_v44 }
0x1aa8   :  { %v3612_v50 = vpop.xlane.xlu1 %3611 }
0x1aa9   :  { %v3622_v6 = vsub.f32 %v3596_v60, %v3612_v50 }
0x1aab   :  { %v3626_v36 = vmul.f32 1.442695, %v3622_v6 }
0x1aac   :  { %v3615_v26 = vpop.xlane.xlu0 %3614  ;;  %v3621_v41 = vpop.xlane.xlu1 %3620 }
0x1aad   :  { %6271 = vpow2.f32 %v3626_v36  ;;  %v3625_v30 = vsub.f32 %v3607_v31, %v3621_v41  ;;  %v3623_v45 = vsub.f32 %v3599_v48, %v3615_v26 }
0x1aaf   :  { %v3632_v16 = vmul.f32 1.442695, %v3625_v30  ;;  %v3628_v39 = vmul.f32 1.442695, %v3623_v45 }
0x1ab0   :  { %v3618_v3 = vpop.xlane.xlu0 %3617 }
0x1ab1   :  { %v3624_v2 = vsub.f32 %v3604_v47, %v3618_v3  ;;  %6273 = vpow2.f32 %v3632_v16 }
0x1ab3   :  { %v3630_v38 = vmul.f32 1.442695, %v3624_v2 }
0x1ab5   :  { %6275 = vpow2.f32 %v3630_v38 }
0x1ab6   :  { %6277 = vpow2.f32 %v3628_v39 }
0x1aba   :  { %v7863_v52 = vpop.eup %6271 }
0x1abb   :  { %3662 = vrot.lane.b32.xlu0 %v7863_v52, %s6606_s25  ;;  %v3634_v60 = vsel %vm1343_vm2, %v7863_v52, 0.0 }
0x1abe   :  { %v7867_v10 = vpop.eup %6273 }
0x1abf   :  { %3668 = vrot.lane.b32.xlu0 %v7867_v10, %s6606_s25  ;;  %v3643_v17 = vsel %vm1343_vm2, %v7867_v10, 0.0 }
0x1ac2   :  { %v7871_v21 = vpop.eup %6275 }
0x1ac3   :  { %3666 = vrot.lane.b32.xlu1 %v7871_v21, %s6606_s25  ;;  %3704 = vrot.lane.b32.xlu0 %v7867_v10, %s6605_s6  ;;  %v7877_v22 = vpop.eup %6277  ;;  %v3640_v11 = vsel %vm1343_vm2, %v7871_v21, 0.0 }
0x1ac4   :  { %v3637_v57 = vsel %vm1343_vm2, %v7877_v22, 0.0 }
0x1ac7   :  { %3702 = vrot.lane.b32.xlu1 %v7871_v21, %s6605_s6  ;;  %3700 = vrot.lane.b32.xlu0 %v7877_v22, %s6605_s6 }
0x1acb   :  { %3698 = vrot.lane.b32.xlu1 %v7863_v52, %s6605_s6  ;;  %3736 = vrot.lane.b32.xlu0 %v7877_v22, %s6607_s26 }
0x1acf   :  { %3734 = vrot.lane.b32.xlu1 %v7863_v52, %s6607_s26  ;;  %3740 = vrot.lane.b32.xlu0 %v7867_v10, %s6607_s26 }
0x1ad3   :  { %3664 = vrot.lane.b32.xlu1 %v7877_v22, %s6606_s25 }
0x1ad7   :  { %3738 = vrot.lane.b32.xlu1 %v7871_v21, %s6607_s26 }
0x1aee   :  { %3641 = vadd.xlane.f32.xlu0 %v3640_v11 }
0x1af2   :  { %3638 = vadd.xlane.f32.xlu0 %v3637_v57  ;;  %v5763_v57 = vpop.f32.mrf.mxu0 }
0x1afb   :  { %3635 = vadd.xlane.f32.xlu1 %v3634_v60  ;;  %v3482_v60 = vpop.f32.mrf.mxu0 }
0x1aff   :  { %3644 = vadd.xlane.f32.xlu1 %v3643_v17  ;;  %v5764_v17 = vpop.f32.mrf.mxu0 }
0x1b2d   :  { %v3663_v29 = vpop.permute.xlu0 %3662 }
0x1b2e   :  { %v3674_v44 = vsel %vm1343_vm2, %v3663_v29, 0.0  ;;  %v3485_v29 = vpop.f32.mrf.mxu0 }
0x1b31   :  { %v3669_v31 = vpop.permute.xlu0 %3668 }
0x1b32   :  { %v3683_v19 = vsel %vm1343_vm2, %v3669_v31, 0.0  ;;  %v5767_v31 = vpop.f32.mrf.mxu0 }
0x1b33   :  { %3684 = vadd.xlane.f32.xlu1 %v3683_v19 }
0x1b34   :  { %v3498_v19 = vpop.f32.mrf.mxu0 }
0x1b35   :  { %v3667_v13 = vpop.permute.xlu1 %3666  ;;  %v3705_v32 = vpop.permute.xlu0 %3704 }
0x1b36   :  { %v3680_v48 = vsel %vm1343_vm2, %v3667_v13, 0.0  ;;  %v3719_v61 = vsel %vm1343_vm2, %v3705_v32, 0.0  ;;  %v5768_v13 = vpop.f32.mrf.mxu0 }
0x1b37   :  { %3681 = vadd.xlane.f32.xlu0 %v3680_v48  ;;  %3720 = vadd.xlane.f32.xlu1 %v3719_v61 }
0x1b38   :  { %v3501_v32 = vpop.f32.mrf.mxu0 }
0x1b39   :  { %v3703_v47 = vpop.permute.xlu1 %3702  ;;  %v3701_v36 = vpop.permute.xlu0 %3700 }
0x1b3a   :  { %v3716_v27 = vsel %vm1343_vm2, %v3703_v47, 0.0  ;;  %v3713_v2 = vsel %vm1343_vm2, %v3701_v36, 0.0  ;;  %v5771_v48 = vpop.f32.mrf.mxu0 }
0x1b3b   :  { %3717 = vadd.xlane.f32.xlu0 %v3716_v27 }
0x1b3c   :  { %v3514_v61 = vpop.f32.mrf.mxu0 }
0x1b3d   :  { %v3699_v23 = vpop.permute.xlu1 %3698  ;;  %v3737_v16 = vpop.permute.xlu0 %3736 }
0x1b3e   :  { %v3710_v6 = vsel %vm1343_vm2, %v3699_v23, 0.0  ;;  %v3749_v38 = vsel %vm1343_vm2, %v3737_v16, 0.0  ;;  %v5772_v47 = vpop.f32.mrf.mxu0 }
0x1b3f   :  { %3675 = vadd.xlane.f32.xlu0 %v3674_v44 }
0x1b40   :  { %v3517_v27 = vpop.f32.mrf.mxu0 }
0x1b41   :  { %v3735_v50 = vpop.permute.xlu1 %3734  ;;  %v3741_v39 = vpop.permute.xlu0 %3740 }
0x1b42   :  { %v3746_v41 = vsel %vm1343_vm2, %v3735_v50, 0.0  ;;  %v3755_v11 = vsel %vm1343_vm2, %v3741_v39, 0.0  ;;  %v5775_v23 = vpop.f32.mrf.mxu0 }
0x1b43   :  { %3711 = vadd.xlane.f32.xlu0 %v3710_v6 }
0x1b44   :  { %v3530_v44 = vpop.f32.mrf.mxu0 }
0x1b45   :  { %v3665_v26 = vpop.permute.xlu1 %3664 }
0x1b46   :  { %v3677_v30 = vsel %vm1343_vm2, %v3665_v26, 0.0  ;;  %v5776_v50 = vpop.f32.mrf.mxu0  ;;  %v3550_v26 = vpack.c.bf16 %v5772_v47, %v5771_v48  ;;  %v3545_v48 = vpack.c.bf16 %v3485_v29, %v3482_v60 }
0x1b47   :  { %3747 = vadd.xlane.f32.xlu0 %v3746_v41  ;;  %3678 = vadd.xlane.f32.xlu1 %v3677_v30  ;;  %v3552_v6 = vpack.c.bf16 %v5776_v50, %v5775_v23 }
0x1b48   :  { %v3533_v36 = vpop.f32.mrf.mxu0 }
0x1b49   :  { %v3739_v3 = vpop.permute.xlu1 %3738  ;;  %v3560_v41 = vmul.bf16 %v7807_v63, %v3552_v6  ;;  %v3551_v30 = vpack.c.bf16 %v3533_v36, %v3530_v44  ;;  %v3546_v63 = vpack.c.bf16 %v5764_v17, %v5763_v57 }
0x1b4a   :  { %v3752_v45 = vsel %vm1343_vm2, %v3739_v3, 0.0  ;;  %v3558_v3 = vmul.bf16 %v7819_v1, %v3550_v26 }
0x1b4b   :  { %3714 = vadd.xlane.f32.xlu1 %v3713_v2  ;;  %3753 = vadd.xlane.f32.xlu0 %v3752_v45  ;;  %v3559_v16 = vmul.bf16 %v7813_v55, %v3551_v30  ;;  %v3549_v2 = vpack.c.bf16 %v3517_v27, %v3514_v61  ;;  %v3548_v45 = vpack.c.bf16 %v5768_v13, %v5767_v31 }
0x1b4c   :  { %5797 = vmatprep.subr.bf16.mxu0 %v3560_v41  ;;  %v3554_v1 = vmul.bf16 %v7843_v59, %v3546_v63  ;;  %v3553_v31 = vmul.bf16 %v7853_v24, %v3545_v48 }
0x1b4d   :  { %5798 = vmatpush3.bf16.msra.mxu0 %v3560_v41  ;;  %v3556_v39 = vmul.bf16 %v7831_v58, %v3548_v45 }
0x1b4e   :  { %5799 = vmatprep.subr.bf16.mxu0 %v3559_v16 }
0x1b4f   :  { %3750 = vadd.xlane.f32.xlu1 %v3749_v38  ;;  %v3557_v38 = vmul.bf16 %v7825_v25, %v3549_v2 }
0x1b51   :  { %5800 = vmatpush3.bf16.msra.mxu0 %v3559_v16 }
0x1b52   :  { %5801 = vmatprep.subr.bf16.mxu0 %v3558_v3 }
0x1b53   :  { %3756 = vadd.xlane.f32.xlu1 %v3755_v11  ;;  %v3547_v11 = vpack.c.bf16 %v3501_v32, %v3498_v19 }
0x1b55   :  { %5802 = vmatpush3.bf16.msra.mxu0 %v3558_v3  ;;  %v3555_v55 = vmul.bf16 %v7837_v42, %v3547_v11 }
0x1b56   :  { %5803 = vmatprep.subr.bf16.mxu0 %v3557_v38 }
0x1b59   :  { %5804 = vmatpush3.bf16.msra.mxu0 %v3557_v38 }
0x1b5a   :  { %5805 = vmatprep.subr.bf16.mxu0 %v3556_v39 }
0x1b5d   :  { %5806 = vmatpush3.bf16.msra.mxu0 %v3556_v39 }
0x1b5e   :  { %5807 = vmatprep.subr.bf16.mxu0 %v3555_v55 }
0x1b61   :  { %5808 = vmatpush3.bf16.msra.mxu0 %v3555_v55 }
0x1b62   :  { %5809 = vmatprep.subr.bf16.mxu0 %v3554_v1 }
0x1b65   :  { %5810 = vmatpush3.bf16.msra.mxu0 %v3554_v1 }
0x1b66   :  { %5811 = vmatprep.subr.bf16.mxu0 %v3553_v31 }
0x1b69   :  { %5812 = vmatpush3.bf16.msra.mxu0 %v3553_v31 }
0x1b77   :  { %v3642_v25 = vpop.xlane.xlu0 %3641 }
0x1b78   :  { %v3648_v61 = vadd.f32 1e-30, %v3642_v25 }
0x1b7a   :  { %6279 = vrcp.f32 %v3648_v61 }
0x1b7b   :  { %v3639_v58 = vpop.xlane.xlu0 %3638 }
0x1b7c   :  { %v3647_v47 = vadd.f32 1e-30, %v3639_v58 }
0x1b7e   :  { %6281 = vrcp.f32 %v3647_v47 }
0x1b84   :  { %v3636_v19 = vpop.xlane.xlu1 %3635 }
0x1b85   :  { %v3646_v59 = vadd.f32 1e-30, %v3636_v19 }
0x1b87   :  { %6283 = vrcp.f32 %v3646_v59  ;;  %v6280_v63 = vpop.eup %6279 }
0x1b88   :  { %v3645_v57 = vpop.xlane.xlu1 %3644 }
0x1b89   :  { %v3649_v60 = vadd.f32 1e-30, %v3645_v57 }
0x1b8b   :  { %6285 = vrcp.f32 %v3649_v60  ;;  %v6282_v55 = vpop.eup %6281 }
0x1b94   :  { %v6284_v1 = vpop.eup %6283 }
0x1b98   :  { %v6286_v31 = vpop.eup %6285 }
0x1bbc   :  { %v3685_v42 = vpop.xlane.xlu1 %3684 }
0x1bbd   :  { %v3689_v24 = vadd.f32 1e-30, %v3685_v42 }
0x1bbf   :  { %6287 = vrcp.f32 %v3689_v24 }
0x1bc0   :  { %v3682_v13 = vpop.xlane.xlu0 %3681  ;;  %v3721_v29 = vpop.xlane.xlu1 %3720 }
0x1bc1   :  { %v3688_v23 = vadd.f32 1e-30, %v3682_v13  ;;  %v3725_v44 = vadd.f32 1e-30, %v3721_v29 }
0x1bc3   :  { %6289 = vrcp.f32 %v3688_v23  ;;  %v3651_v23 = vmul.f32 %v6284_v1, %v7863_v52 }
0x1bc4   :  { %v3718_v17 = vpop.xlane.xlu0 %3717  ;;  %6291 = vrcp.f32 %v3725_v44  ;;  %v3653_v44 = vmul.f32 %v6282_v55, %v7877_v22 }
0x1bc5   :  { %v3724_v2 = vadd.f32 1e-30, %v3718_v17 }
0x1bc8   :  { %v3676_v32 = vpop.xlane.xlu0 %3675 }
0x1bc9   :  { %v3686_v50 = vadd.f32 1e-30, %v3676_v32 }
0x1bcb   :  { %6293 = vrcp.f32 %v3686_v50 }
0x1bcc   :  { %v3712_v27 = vpop.xlane.xlu0 %3711  ;;  %v6288_v58 = vpop.eup %6287 }
0x1bcd   :  { %v3722_v41 = vadd.f32 1e-30, %v3712_v27 }
0x1bd0   :  { %v3748_v6 = vpop.xlane.xlu0 %3747  ;;  %v3679_v36 = vpop.xlane.xlu1 %3678 }
0x1bd1   :  { %v3687_v26 = vadd.f32 1e-30, %v3679_v36  ;;  %v3758_v30 = vadd.f32 1e-30, %v3748_v6  ;;  %v6290_v19 = vpop.eup %6289  ;;  %v3655_v36 = vmul.f32 %v6280_v63, %v7871_v21 }
0x1bd2   :  { %v6292_v13 = vpop.eup %6291 }
0x1bd3   :  { %6295 = vrcp.f32 %v3687_v26  ;;  %v3697_v26 = vmul.f32 %v6288_v58, %v7867_v10 }
0x1bd4   :  { %v3754_v16 = vpop.xlane.xlu0 %3753  ;;  %v3715_v3 = vpop.xlane.xlu1 %3714  ;;  %6297 = vrcp.f32 %v3722_v41 }
0x1bd5   :  { %v3723_v45 = vadd.f32 1e-30, %v3715_v3  ;;  %v3760_v38 = vadd.f32 1e-30, %v3754_v16  ;;  %6299 = vrcp.f32 %v3758_v30  ;;  %v3695_v3 = vmul.f32 %v6290_v19, %v7871_v21 }
0x1bd7   :  { %6301 = vrcp.f32 %v3723_v45  ;;  %v3772_v19 = vsel %vm1343_vm2, %v3655_v36, %v3695_v3 }
0x1bd8   :  { %v3751_v39 = vpop.xlane.xlu1 %3750  ;;  %6303 = vrcp.f32 %v3724_v2  ;;  %v6294_v57 = vpop.eup %6293 }
0x1bd9   :  { %v3759_v11 = vadd.f32 1e-30, %v3751_v39  ;;  %6305 = vrcp.f32 %v3760_v38  ;;  %v3691_v47 = vmul.f32 %v6294_v57, %v7863_v52 }
0x1bdb   :  { %6307 = vrcp.f32 %v3759_v11  ;;  %v3770_v30 = vsel %vm1343_vm2, %v3651_v23, %v3691_v47 }
0x1bdc   :  { %v3757_v48 = vpop.xlane.xlu1 %3756 }
0x1bdd   :  { %v3761_v25 = vadd.f32 1e-30, %v3757_v48  ;;  %v6067_v48 = vld [vmem:[%s8306_s11 + $0x38] sm:$0xff]  }
0x1bde   :  { %5817 = vmatprep.subr.bf16.mxu1 %v6067_v48 }
0x1bdf   :  { %6309 = vrcp.f32 %v3761_v25  ;;  %v6068_v25 = vld [vmem:[%s8306_s11 + $0x30] sm:$0xff]   ;;  %5818 = vmatpush3.bf16.msra.mxu1 %v6067_v48 }
0x1be0   :  { %v6296_v17 = vpop.eup %6295  ;;  %5819 = vmatprep.subr.bf16.mxu1 %v6068_v25 }
0x1be1   :  { %v6298_v42 = vpop.eup %6297  ;;  %v3693_v59 = vmul.f32 %v6296_v17, %v7877_v22 }
0x1be2   :  { %v6300_v32 = vpop.eup %6299  ;;  %v3727_v29 = vmul.f32 %v6298_v42, %v7863_v52 }
0x1be3   :  { %v3763_v50 = vmul.f32 %v6300_v32, %v7863_v52  ;;  %v3771_v16 = vsel %vm1343_vm2, %v3653_v44, %v3693_v59  ;;  %v3733_v52 = vmul.f32 %v6292_v13, %v7867_v10  ;;  %5820 = vmatpush3.bf16.msra.mxu1 %v6068_v25 }
0x1be4   :  { %v6302_v61 = vpop.eup %6301  ;;  %v3774_v2 = vsel %vm969_vm1, %v3770_v30, %v3727_v29 }
0x1be5   :  { %v6304_v60 = vpop.eup %6303  ;;  %v3729_v27 = vmul.f32 %v6302_v61, %v7877_v22  ;;  %v3778_v39 = vsel %vm1488_vm3, %v3774_v2, %v3763_v50 }
0x1be6   :  { %v6306_v24 = vpop.eup %6305  ;;  %v3731_v38 = vmul.f32 %v6304_v60, %v7871_v21 }
0x1be7   :  { %v3775_v45 = vsel %vm969_vm1, %v3771_v16, %v3729_v27  ;;  %v3767_v63 = vmul.f32 %v6306_v24, %v7871_v21 }
0x1be8   :  { %v6308_v6 = vpop.eup %6307  ;;  %v3776_v21 = vsel %vm969_vm1, %v3772_v19, %v3731_v38  ;;  %v7976_v38 = vld [vmem:[%s8315_s20 + $0x10] sm:$0xff] }
0x1be9   :  { %v3765_v41 = vmul.f32 %v6308_v6, %v7877_v22  ;;  %v3657_v22 = vmul.f32 %v6286_v31, %v7867_v10  ;;  %v3780_v57 = vsel %vm1488_vm3, %v3776_v21, %v3767_v63 }
0x1beb   :  { %v3779_v11 = vsel %vm1488_vm3, %v3775_v45, %v3765_v41  ;;  %v3773_v13 = vsel %vm1343_vm2, %v3657_v22, %v3697_v26  ;;  %v6069_v26 = vld [vmem:[%s8306_s11 + $0x28] sm:$0xff]   ;;  %v6070_v41 = vld [vmem:[%s8306_s11 + $0x20] sm:$0xff]  }
0x1bec   :  { %v6310_v55 = vpop.eup %6309  ;;  %v5955_v1 = vpack.i.bf16 %v3779_v11, %v3778_v39  ;;  %v3777_v31 = vsel %vm969_vm1, %v3773_v13, %v3733_v52  ;;  %5821 = vmatprep.subr.bf16.mxu1 %v6069_v26  ;;  %v3869_v52 = vrot.slane %v7976_v38, %v7222_v54 }
0x1bed   :  { %v3769_v58 = vmul.f32 %v6310_v55, %v7867_v10  ;;  %5822 = vmatpush3.bf16.msra.mxu1 %v6069_v26 }
0x1bee   :  { %5956 = vrot.lane.b32.xlu0 %v5955_v1, %s6599_s5  ;;  %5823 = vmatprep.subr.bf16.mxu1 %v6070_v41 }
0x1bef   :  { %v3781_v17 = vsel %vm1488_vm3, %v3777_v31, %v3769_v58 }
0x1bf0   :  { %v5960_v42 = vpack.i.bf16 %v3781_v17, %v3780_v57 }
0x1bf1   :  { %5824 = vmatpush3.bf16.msra.mxu1 %v6070_v41  ;;  %v6071_v41 = vld [vmem:[%s8311_s16 + $0x38] sm:$0xff]  }
0x1bf2   :  { %5961 = vrot.lane.b32.xlu1 %v5960_v42, %s6599_s5  ;;  %5829 = vmatprep.subr.bf16.mxu0 %v6071_v41 }
0x1c60   :  { %v5957_v10 = vpop.permute.xlu0 %5956 }
0x1c61   :  { %v5959_v32 = vunpack.i.h.bf16 %v5957_v10  ;;  %v5958_v61 = vunpack.i.l.bf16 %v5957_v10 }
0x1c63   :  { %v3799_v47 = vsel %vm250_vm0, %v3779_v11, %v5959_v32  ;;  %v3798_v59 = vsel %vm250_vm0, %v3778_v39, %v5958_v61 }
0x1c64   :  { %v5962_v60 = vpop.permute.xlu1 %5961  ;;  %v3802_v29 = vpack.c.bf16 %v3799_v47, %v3798_v59 }
0x1c65   :  { %v5964_v27 = vunpack.i.h.bf16 %v5962_v60  ;;  %v5963_v24 = vunpack.i.l.bf16 %v5962_v60 }
0x1c66   :  { %v3804_v23 = vmul.bf16 %v7801_v18, %v3802_v29 }
0x1c67   :  { %v3801_v44 = vsel %vm250_vm0, %v3781_v17, %v5964_v27  ;;  %v3800_v50 = vsel %vm250_vm0, %v3780_v57, %v5963_v24 }
0x1c68   :  { %v3803_v6 = vpack.c.bf16 %v3801_v44, %v3800_v50  ;;  %5813 = vmatprep.mubr.bf16.mxu0 %v3804_v23 }
0x1c6a   :  { %v3805_v36 = vmul.bf16 %v7856_v12, %v3803_v6 }
0x1c6c   :  { %5814 = vmatmul.mubr.bf16.vlgmr.msra.gmra.mxu0 %v3805_v36 }
0x1c6d   :  { %5830 = vmatpush3.bf16.msra.mxu0 %v6071_v41 }
0x1d2c   :  { %v5815_v18 = vpop.f32.mrf.mxu0 }
0x1d2e   :  { %v3840_v30 = vpop.f32.mrf.mxu0 }
0x1d30   :  { %v5816_v16 = vpop.f32.mrf.mxu0 }
0x1d31   :  { %v3865_v45 = vpack.c.bf16 %v5816_v16, %v5815_v18  ;;  %v6072_v18 = vld [vmem:[%s8312_s17 + $0x38] sm:$0xff]   ;;  %v6074_v16 = vld [vmem:[%s8312_s17 + $0x30] sm:$0xff]  }
0x1d32   :  { %v3843_v3 = vpop.f32.mrf.mxu0  ;;  %5841 = vmatprep.subr.bf16.mxu1 %v6072_v18 }
0x1d33   :  { %v3864_v2 = vpack.c.bf16 %v3843_v3, %v3840_v30  ;;  %v6073_v30 = vld [vmem:[%s8311_s16 + $0x30] sm:$0xff]   ;;  %v6075_v3 = vld [vmem:[%s8311_s16 + $0x28] sm:$0xff]  }
0x1d34   :  { %5831 = vmatprep.subr.bf16.mxu0 %v6073_v30 }
0x1d35   :  { %5825 = vmatprep.mubr.msk.bf16.mxu1 %vm250_vm0, %v3864_v2  ;;  %v6076_v2 = vld [vmem:[%s8312_s17 + $0x28] sm:$0xff]   ;;  %5832 = vmatpush3.bf16.msra.mxu0 %v6073_v30 }
0x1d36   :  { %5826 = vmatmul.mubr.msk.bf16.vlgmr.msra.gmra.mxu1 %vm250_vm0, %v3865_v45  ;;  %5833 = vmatprep.subr.bf16.mxu0 %v6075_v3  ;;  %v6077_v45 = vld [vmem:[%s8311_s16 + $0x20] sm:$0xff]  }
0x1d37   :  { %5842 = vmatpush3.bf16.msra.mxu1 %v6072_v18 }
0x1d38   :  { %5843 = vmatprep.subr.bf16.mxu1 %v6074_v16 }
0x1d39   :  { %5834 = vmatpush3.bf16.msra.mxu0 %v6075_v3  ;;  %v6082_v3 = vld [vmem:[%s8313_s18 + $0x20] sm:$0xff]  }
0x1d3a   :  { %5835 = vmatprep.subr.bf16.mxu0 %v6077_v45 }
0x1d3b   :  { %5844 = vmatpush3.bf16.msra.mxu1 %v6074_v16 }
0x1d3c   :  { %5845 = vmatprep.subr.bf16.mxu1 %v6076_v2 }
0x1d3d   :  { %5836 = vmatpush3.bf16.msra.mxu0 %v6077_v45 }
0x1d3f   :  { %5846 = vmatpush3.bf16.msra.mxu1 %v6076_v2 }
0x1df6   :  { %v5827_v12 = vpop.f32.mrf.mxu1 }
0x1df7   :  { %v3943_v48 = vadd.f32 %v5827_v12, %v3869_v52  ;;  %v6078_v12 = vld [vmem:[%s8312_s17 + $0x20] sm:$0xff]  }
0x1df8   :  { %v3934_v39 = vpop.f32.mrf.mxu1  ;;  %5847 = vmatprep.subr.bf16.mxu1 %v6078_v12 }
0x1df9   :  { %v3935_v11 = vadd.f32 %v3934_v39, %v3869_v52  ;;  %v7992_v21 = vadd.f32 %v3943_v48, %v7654_v35  ;;  %5848 = vmatpush3.bf16.msra.mxu1 %v6078_v12 }
0x1dfa   :  { %v5828_v22 = vpop.f32.mrf.mxu1 }
0x1dfb   :  { %v7981_v63 = vadd.f32 %v3935_v11, %v7651_v7  ;;  %v3946_v55 = vadd.f32 %v5828_v22, %v3869_v52 }
0x1dfc   :  { %v3937_v1 = vpop.f32.mrf.mxu1 }
0x1dfd   :  { %v7984_v25 = vadd.f32 %v3946_v55, %v7662_v14  ;;  %v3938_v58 = vadd.f32 %v3937_v1, %v3869_v52  ;;  %v3953_v19 = vsel %vm250_vm0, %v7981_v63, 0.0  ;;  %v3959_v14 = vsel %vm250_vm0, %v7992_v21, 0.0 }
0x1dfe   :  { %3954 = vadd.xlane.f32.xlu1 %v3953_v19 }
0x1dff   :  { %v7989_v13 = vadd.f32 %v3938_v58, %v7659_v43  ;;  %v3962_v31 = vsel %vm250_vm0, %v7984_v25, 0.0 }
0x1e01   :  { %v3956_v7 = vsel %vm250_vm0, %v7989_v13, 0.0 }
0x1e02   :  { %3957 = vadd.xlane.f32.xlu0 %v3956_v7  ;;  %3963 = vadd.xlane.f32.xlu1 %v3962_v31 }
0x1e06   :  { %3960 = vadd.xlane.f32.xlu0 %v3959_v14 }
0x1e87   :  { %v3955_v57 = vpop.xlane.xlu1 %3954 }
0x1e88   :  { %v3965_v17 = vmul.f32 0.015625, %v3955_v57 }
0x1e8a   :  { %v8001_v43 = vsub.f32 %v7981_v63, %v3965_v17 }
0x1e8b   :  { %v3958_v42 = vpop.xlane.xlu0 %3957  ;;  %v3964_v35 = vpop.xlane.xlu1 %3963 }
0x1e8c   :  { %v3966_v10 = vmul.f32 0.015625, %v3958_v42  ;;  %v3968_v32 = vmul.f32 0.015625, %v3964_v35  ;;  %v3973_v61 = vmul.f32 %v8001_v43, %v8001_v43  ;;  %v4008_v42 = vrot.slane %v7976_v38, %v7312_v49 }
0x1e8e   :  { %v3970_v47 = vsub.f32 %v7989_v13, %v3966_v10  ;;  %v8007_v59 = vsub.f32 %v7984_v25, %v3968_v32  ;;  %v3977_v60 = vsel %vm250_vm0, %v3973_v61, 0.0  ;;  %v8350_v61 = vld [vmem:[#allocation20_spill] sm:$0xff] }
0x1e8f   :  { %v3961_v29 = vpop.xlane.xlu0 %3960  ;;  %3978 = vadd.xlane.f32.xlu0 %v3977_v60  ;;  %v8351_v60 = vsub.s32 7, %v8350_v61  ;;  %v8071_v61 = vld [vmem:[%s8315_s20 + $0x18] sm:$0x7f] }
0x1e90   :  { %v3967_v27 = vmul.f32 0.015625, %v3961_v29  ;;  %v3974_v24 = vmul.f32 %v3970_v47, %v3970_v47  ;;  %v3976_v50 = vmul.f32 %v8007_v59, %v8007_v59 }
0x1e91   :  { %v4016_v29 = vrot.slane %v7976_v38, %v8351_v60  ;;  %v6079_v38 = vld [vmem:[%s8313_s18 + $0x38] sm:$0xff]  }
0x1e92   :  { %v3971_v23 = vsub.f32 %v7992_v21, %v3967_v27  ;;  %v3980_v44 = vsel %vm250_vm0, %v3974_v24, 0.0  ;;  %v3986_v26 = vsel %vm250_vm0, %v3976_v50, 0.0  ;;  %5853 = vmatprep.subr.bf16.mxu0 %v6079_v38 }
0x1e93   :  { %3981 = vadd.xlane.f32.xlu1 %v3980_v44 }
0x1e94   :  { %v3975_v6 = vmul.f32 %v3971_v23, %v3971_v23 }
0x1e96   :  { %v3983_v36 = vsel %vm250_vm0, %v3975_v6, 0.0 }
0x1e97   :  { %3984 = vadd.xlane.f32.xlu0 %v3983_v36  ;;  %3987 = vadd.xlane.f32.xlu1 %v3986_v26 }
0x1f18   :  { %v3979_v52 = vpop.xlane.xlu0 %3978 }
0x1f19   :  { %v3989_v39 = vmul.f32 0.015625, %v3979_v52 }
0x1f1b   :  { %v3993_v11 = vadd.f32 1e-05, %v3989_v39 }
0x1f1c   :  { %v3982_v22 = vpop.xlane.xlu1 %3981 }
0x1f1d   :  { %6311 = vrsqrt.f32 %v3993_v11  ;;  %v3990_v55 = vmul.f32 0.015625, %v3982_v22 }
0x1f1f   :  { %v3994_v1 = vadd.f32 1e-05, %v3990_v55 }
0x1f20   :  { %v3985_v48 = vpop.xlane.xlu0 %3984  ;;  %v3988_v58 = vpop.xlane.xlu1 %3987 }
0x1f21   :  { %6313 = vrsqrt.f32 %v3994_v1  ;;  %v3991_v19 = vmul.f32 0.015625, %v3985_v48  ;;  %v3992_v7 = vmul.f32 0.015625, %v3988_v58 }
0x1f23   :  { %v3995_v31 = vadd.f32 1e-05, %v3991_v19  ;;  %v3996_v14 = vadd.f32 1e-05, %v3992_v7 }
0x1f25   :  { %6315 = vrsqrt.f32 %v3995_v31 }
0x1f26   :  { %6317 = vrsqrt.f32 %v3996_v14 }
0x1f2a   :  { %v6312_v57 = vpop.eup %6311 }
0x1f2b   :  { %v4001_v17 = vmul.f32 %v6312_v57, %v8001_v43 }
0x1f2d   :  { %v4009_v32 = vmul.f32 %v4008_v42, %v4001_v17 }
0x1f2e   :  { %v6314_v35 = vpop.eup %6313 }
0x1f2f   :  { %v4002_v10 = vmul.f32 %v6314_v35, %v3970_v47  ;;  %v4017_v6 = vadd.f32 %v4016_v29, %v4009_v32  ;;  %v5224_v35 = vld [vmem:[%s8314_s19 + $0x8] sm:$0x1f] }
0x1f31   :  { %v4010_v27 = vmul.f32 %v4008_v42, %v4002_v10 }
0x1f32   :  { %v6316_v24 = vpop.eup %6315 }
0x1f33   :  { %v6318_v44 = vpop.eup %6317  ;;  %v4003_v50 = vmul.f32 %v6316_v24, %v3971_v23  ;;  %v4018_v36 = vadd.f32 %v4016_v29, %v4010_v27  ;;  %v6081_v23 = vld [vmem:[%s8313_s18 + $0x28] sm:$0xff]   ;;  %v4226_v27 = vrot.slane %v5224_v35, %v6846_v53 }
0x1f34   :  { %v4004_v26 = vmul.f32 %v6318_v44, %v8007_v59  ;;  %v6080_v59 = vld [vmem:[%s8313_s18 + $0x30] sm:$0xff]   ;;  %v8077_v44 = vrot.slane %v5224_v35, %v6801_v46 }
0x1f35   :  { %v4030_v41 = vpack.c.bf16 %v4018_v36, %v4017_v6  ;;  %v4011_v43 = vmul.f32 %v4008_v42, %v4003_v50  ;;  %v8080_v50 = vrot.slane %v5224_v35, %v6811_v51  ;;  %v8083_v6 = vrot.slane %v5224_v35, %v6929_v62 }
0x1f36   :  { %v4012_v18 = vmul.f32 %v4008_v42, %v4004_v26 }
0x1f37   :  { %5837 = vmatprep.mubr.msk.bf16.mxu0 %vm250_vm0, %v4030_v41  ;;  %5849 = vmatprep.mubr.msk.bf16.mxu1 %vm250_vm0, %v4030_v41  ;;  %v4019_v47 = vadd.f32 %v4016_v29, %v4011_v43  ;;  %v8087_v41 = vrot.slane %v5224_v35, %v6935_v8  ;;  %v8091_v43 = vrot.slane %v8071_v61, %v6801_v46 }
0x1f38   :  { %v4020_v30 = vadd.f32 %v4016_v29, %v4012_v18  ;;  %v8095_v18 = vrot.slane %v8071_v61, %v6811_v51 }
0x1f3a   :  { %v4031_v16 = vpack.c.bf16 %v4020_v30, %v4019_v47 }
0x1f3c   :  { %5838 = vmatmul.mubr.msk.bf16.vlgmr.msra.gmra.mxu0 %vm250_vm0, %v4031_v16  ;;  %5850 = vmatmul.mubr.msk.bf16.vlgmr.msra.gmra.mxu1 %vm250_vm0, %v4031_v16 }
0x1f3d   :  { %5854 = vmatpush3.bf16.msra.mxu0 %v6079_v38 }
0x1f3e   :  { %5855 = vmatprep.subr.bf16.mxu0 %v6080_v59 }
0x1f41   :  { %5856 = vmatpush3.bf16.msra.mxu0 %v6080_v59 }
0x1f42   :  { %5857 = vmatprep.subr.bf16.mxu0 %v6081_v23 }
0x1f45   :  { %5858 = vmatpush3.bf16.msra.mxu0 %v6081_v23 }
0x1f46   :  { %5859 = vmatprep.subr.bf16.mxu0 %v6082_v3 }
0x1f49   :  { %5860 = vmatpush3.bf16.msra.mxu0 %v6082_v3 }
0x1ffc   :  { %v5851_v2 = vpop.f32.mrf.mxu1  ;;  %v5839_v17 = vpop.f32.mrf.mxu0 }
0x1ffd   :  { %v5222_v45 = vmul.f32 -1.442695, %v5851_v2 }
0x1ffe   :  { %v4178_v12 = vpop.f32.mrf.mxu1  ;;  %v4096_v42 = vpop.f32.mrf.mxu0 }
0x1fff   :  { %6319 = vpow2.f32 %v5222_v45  ;;  %v5220_v52 = vmul.f32 -1.442695, %v4178_v12 }
0x2000   :  { %v5852_v39 = vpop.f32.mrf.mxu1  ;;  %v5840_v29 = vpop.f32.mrf.mxu0 }
0x2001   :  { %6321 = vpow2.f32 %v5220_v52  ;;  %v5223_v11 = vmul.f32 -1.442695, %v5852_v39 }
0x2002   :  { %v4181_v22 = vpop.f32.mrf.mxu1  ;;  %v4099_v23 = vpop.f32.mrf.mxu0 }
0x2003   :  { %6323 = vpow2.f32 %v5223_v11  ;;  %v5221_v55 = vmul.f32 -1.442695, %v4181_v22 }
0x2005   :  { %6325 = vpow2.f32 %v5221_v55 }
0x200c   :  { %v6320_v1 = vpop.eup %6319 }
0x200d   :  { %v4207_v48 = vadd.f32 1.0, %v6320_v1 }
0x200e   :  { %v6322_v58 = vpop.eup %6321 }
0x200f   :  { %6327 = vrcp.f32 %v4207_v48  ;;  %v4205_v19 = vadd.f32 1.0, %v6322_v58 }
0x2010   :  { %v6324_v7 = vpop.eup %6323 }
0x2011   :  { %6329 = vrcp.f32 %v4205_v19  ;;  %v4208_v31 = vadd.f32 1.0, %v6324_v7 }
0x2012   :  { %v6326_v14 = vpop.eup %6325 }
0x2013   :  { %6331 = vrcp.f32 %v4208_v31  ;;  %v4206_v57 = vadd.f32 1.0, %v6326_v14 }
0x2015   :  { %6333 = vrcp.f32 %v4206_v57 }
0x201c   :  { %v6328_v10 = vpop.eup %6327 }
0x201d   :  { %v8066_v32 = vmul.f32 %v6328_v10, %v5839_v17 }
0x201e   :  { %v6330_v60 = vpop.eup %6329 }
0x201f   :  { %v8074_v24 = vmul.f32 %v6330_v60, %v4096_v42  ;;  %v4240_v26 = vrot.slane %v8066_v32, 6  ;;  %v4269_v47 = vrot.slane %v8066_v32, 7  ;;  %v4296_v16 = vrot.slane %v8066_v32, 1 }
0x2020   :  { %v6332_v36 = vpop.eup %6331  ;;  %v4325_v38 = vrot.slane %v8066_v32, 2  ;;  %v4229_v12 = vmul.f32 %v4226_v27, %v8066_v32 }
0x2021   :  { %v8098_v30 = vmul.f32 %v6332_v36, %v5840_v29  ;;  %v4227_v3 = vmul.f32 %v4226_v27, %v8074_v24  ;;  %v4237_v2 = vrot.slane %v8074_v24, 6  ;;  %v4266_v45 = vrot.slane %v8074_v24, 7  ;;  %v8352_v29 = vld [vmem:[#allocation22_spill] sm:$0xff] }
0x2022   :  { %v6334_v59 = vpop.eup %6333  ;;  %v4293_v22 = vrot.slane %v8074_v24, 1  ;;  %v4322_v55 = vrot.slane %v8074_v24, 2 }
0x2023   :  { %v4218_v52 = vmul.f32 %v6334_v59, %v4099_v23  ;;  %v4232_v39 = vrot.slane %v8098_v30, 6  ;;  %v4264_v11 = vrot.slane %v8098_v30, 7  ;;  %v4230_v1 = vmul.f32 %v4226_v27, %v8098_v30 }
0x2024   :  { %v4298_v48 = vrot.slane %v8098_v30, 1  ;;  %v4327_v58 = vrot.slane %v8098_v30, 2 }
0x2025   :  { %v4228_v19 = vmul.f32 %v4226_v27, %v4218_v52  ;;  %v4238_v7 = vrot.slane %v4218_v52, 6  ;;  %v4247_v31 = vsel %vm1944_vm5, %v4232_v39, %v4237_v2  ;;  %v4267_v14 = vrot.slane %v4218_v52, 7 }
0x2026   :  { %v4248_v57 = vmul.f32 %v4247_v31, %v7362_v40  ;;  %v4276_v17 = vsel %vm1994_vm4, %v4264_v11, %v4266_v45  ;;  %v4294_v42 = vrot.slane %v4218_v52, 1  ;;  %v4323_v35 = vrot.slane %v4218_v52, 2 }
0x2027   :  { %v4239_v10 = vsel %vm1944_vm5, %v4237_v2, %v4238_v7  ;;  %v4268_v60 = vsel %vm1994_vm4, %v4266_v45, %v4267_v14  ;;  %v4277_v36 = vmul.f32 %v4276_v17, %v8352_v29  ;;  %v4241_v59 = vsel %vm1944_vm5, %v4238_v7, %v4240_v26 }
0x2028   :  { %v4249_v27 = vmul.f32 %v4239_v10, %v7340_v33  ;;  %v4256_v30 = vmul.f32 %v8077_v44, %v4248_v57  ;;  %v4278_v23 = vmul.f32 %v4268_v60, %v7348_v56  ;;  %v4295_v40 = vsel %vm2038_vm6, %v4293_v22, %v4294_v42 }
0x2029   :  { %v4285_v31 = vmul.f32 %v8080_v50, %v4277_v36  ;;  %v4297_v2 = vsel %vm2038_vm6, %v4294_v42, %v4296_v16  ;;  %v4306_v45 = vmul.f32 %v4295_v40, %v7354_v5  ;;  %v4324_v52 = vsel %vm2084_vm7, %v4322_v55, %v4323_v35 }
0x202a   :  { %v4257_v33 = vmul.f32 %v8077_v44, %v4249_v27  ;;  %v4260_v7 = vadd.f32 %v4256_v30, %v4227_v3  ;;  %v4286_v57 = vmul.f32 %v8080_v50, %v4278_v23  ;;  %v4307_v56 = vmul.f32 %v4297_v2, %v7395_v4  ;;  %v8353_v30 = vld [vmem:[#allocation21_spill] sm:$0xff] }
0x202b   :  { %v4314_v17 = vmul.f32 %v8083_v6, %v4306_v45  ;;  %v4326_v10 = vsel %vm2084_vm7, %v4323_v35, %v4325_v38  ;;  %v4335_v42 = vmul.f32 %v4324_v52, %v7423_v0  ;;  %v4242_v5 = vsel %vm1944_vm5, %v4240_v26, %v4232_v39  ;;  %v8355_v45 = vld [vmem:[#allocation24_spill] sm:$0xff] }
0x202c   :  { %v4261_v60 = vadd.f32 %v4257_v33, %v4228_v19  ;;  %v4289_v29 = vadd.f32 %v4285_v31, %v4260_v7  ;;  %v4315_v36 = vmul.f32 %v8083_v6, %v4307_v56  ;;  %v4336_v3 = vmul.f32 %v4326_v10, %v7425_v20  ;;  %v8354_v31 = vld [vmem:[#allocation23_spill] sm:$0xff] }
0x202d   :  { %v4343_v27 = vmul.f32 %v8087_v41, %v4335_v42  ;;  %v4250_v4 = vmul.f32 %v4241_v59, %v7342_v34  ;;  %v4251_v23 = vmul.f32 %v4242_v5, %v8353_v30  ;;  %v4270_v40 = vsel %vm1994_vm4, %v4267_v14, %v4269_v47 }
0x202e   :  { %v4290_v2 = vadd.f32 %v4286_v57, %v4261_v60  ;;  %v4318_v35 = vadd.f32 %v4314_v17, %v4289_v29  ;;  %v4344_v0 = vmul.f32 %v8087_v41, %v4336_v3  ;;  %v4271_v26 = vsel %vm1994_vm4, %v4269_v47, %v4264_v11 }
0x202f   :  { %v4258_v39 = vmul.f32 %v8077_v44, %v4250_v4  ;;  %v4259_v19 = vmul.f32 %v8077_v44, %v4251_v23  ;;  %v4279_v20 = vmul.f32 %v4270_v40, %v8354_v31  ;;  %v4280_v52 = vmul.f32 %v4271_v26, %v8355_v45 }
0x2030   :  { %v4319_v33 = vadd.f32 %v4315_v36, %v4290_v2  ;;  %v4347_v34 = vadd.f32 %v4343_v27, %v4318_v35  ;;  %v4299_v14 = vsel %vm2038_vm6, %v4296_v16, %v4298_v48  ;;  %v4305_v59 = vsel %vm2038_vm6, %v4298_v48, %v4293_v22 }
0x2031   :  { %v4262_v7 = vadd.f32 %v4258_v39, %v4229_v12  ;;  %v4263_v57 = vadd.f32 %v4259_v19, %v4230_v1  ;;  %v4287_v47 = vmul.f32 %v8080_v50, %v4279_v20  ;;  %v4288_v11 = vmul.f32 %v8080_v50, %v4280_v52 }
0x2032   :  { %v4348_v56 = vadd.f32 %v4344_v0, %v4319_v33  ;;  %v4355_v44 = vmul.f32 %v8091_v43, %v4347_v34  ;;  %v4308_v17 = vmul.f32 %v4299_v14, %v7364_v28  ;;  %v4309_v10 = vmul.f32 %v4305_v59, %v7397_v15 }
0x2033   :  { %v4291_v42 = vadd.f32 %v4287_v47, %v4262_v7  ;;  %v4292_v5 = vadd.f32 %v4288_v11, %v4263_v57  ;;  %v4328_v16 = vsel %vm2084_vm7, %v4325_v38, %v4327_v58  ;;  %v4334_v12 = vsel %vm2084_vm7, %v4327_v58, %v4322_v55 }
0x2034   :  { %v4356_v22 = vmul.f32 %v8091_v43, %v4348_v56  ;;  %v4363_v50 = vadd.f32 %v8095_v18, %v4355_v44  ;;  %v4316_v1 = vmul.f32 %v8083_v6, %v4308_v17  ;;  %v4317_v28 = vmul.f32 %v8083_v6, %v4309_v10 }
0x2035   :  { %v4337_v15 = vmul.f32 %v4328_v16, %v7446_v9  ;;  %v4338_v48 = vmul.f32 %v4334_v12, %v7440_v37 }
0x2036   :  { %v4364_v32 = vadd.f32 %v8095_v18, %v4356_v22  ;;  %v5225_v60 = vmul.f32 -1.442695, %v4363_v50  ;;  %v4320_v38 = vadd.f32 %v4316_v1, %v4291_v42  ;;  %v4321_v29 = vadd.f32 %v4317_v28, %v4292_v5 }
0x2037   :  { %v4345_v24 = vmul.f32 %v8087_v41, %v4337_v15  ;;  %v4346_v55 = vmul.f32 %v8087_v41, %v4338_v48 }
0x2038   :  { %6335 = vpow2.f32 %v5225_v60  ;;  %v5226_v58 = vmul.f32 -1.442695, %v4364_v32 }
0x2039   :  { %v4349_v36 = vadd.f32 %v4345_v24, %v4320_v38  ;;  %v4350_v3 = vadd.f32 %v4346_v55, %v4321_v29 }
0x203a   :  { %6337 = vpow2.f32 %v5226_v58 }
0x203b   :  { %v4357_v6 = vmul.f32 %v8091_v43, %v4349_v36  ;;  %v4358_v9 = vmul.f32 %v8091_v43, %v4350_v3 }
0x203d   :  { %v4365_v37 = vadd.f32 %v8095_v18, %v4357_v6  ;;  %v4366_v27 = vadd.f32 %v8095_v18, %v4358_v9  ;;  %v6083_v6 = vld [vmem:[%s8309_s14 + $0x38] sm:$0xff]   ;;  %v6084_v9 = vld [vmem:[%s8309_s14 + $0x30] sm:$0xff]  }
0x203e   :  { %5865 = vmatprep.subr.bf16.mxu1 %v6083_v6 }
0x203f   :  { %v5227_v4 = vmul.f32 -1.442695, %v4365_v37  ;;  %v5228_v30 = vmul.f32 -1.442695, %v4366_v27  ;;  %5866 = vmatpush3.bf16.msra.mxu1 %v6083_v6 }
0x2040   :  { %5867 = vmatprep.subr.bf16.mxu1 %v6084_v9 }
0x2041   :  { %6339 = vpow2.f32 %v5227_v4 }
0x2042   :  { %6341 = vpow2.f32 %v5228_v30 }
0x2043   :  { %5868 = vmatpush3.bf16.msra.mxu1 %v6084_v9 }
0x2045   :  { %v6336_v23 = vpop.eup %6335 }
0x2046   :  { %v4379_v40 = vadd.f32 1.0, %v6336_v23 }
0x2047   :  { %v6338_v41 = vpop.eup %6337 }
0x2048   :  { %v4380_v2 = vadd.f32 1.0, %v6338_v41  ;;  %6343 = vrcp.f32 %v4379_v40 }
0x204a   :  { %6345 = vrcp.f32 %v4380_v2 }
0x204e   :  { %v6340_v35 = vpop.eup %6339 }
0x204f   :  { %v6342_v0 = vpop.eup %6341  ;;  %v4381_v26 = vadd.f32 1.0, %v6340_v35 }
0x2050   :  { %v4382_v39 = vadd.f32 1.0, %v6342_v0 }
0x2051   :  { %6347 = vrcp.f32 %v4381_v26 }
0x2052   :  { %6349 = vrcp.f32 %v4382_v39 }
0x2055   :  { %v6344_v43 = vpop.eup %6343 }
0x2056   :  { %v4391_v31 = vmul.f32 %v6344_v43, %v4363_v50 }
0x2057   :  { %v6346_v19 = vpop.eup %6345 }
0x2058   :  { %v4392_v18 = vmul.f32 %v6346_v19, %v4364_v32 }
0x205a   :  { %v4404_v20 = vpack.c.bf16 %v4392_v18, %v4391_v31 }
0x205c   :  { %5861 = vmatprep.mubr.msk.bf16.mxu0 %vm250_vm0, %v4404_v20  ;;  %v4570_v20 = vrot.slane %v8071_v61, %v6846_v53 }
0x205e   :  { %v6348_v45 = vpop.eup %6347 }
0x205f   :  { %v6350_v52 = vpop.eup %6349  ;;  %v4393_v33 = vmul.f32 %v6348_v45, %v4365_v37  ;;  %v6085_v37 = vld [vmem:[%s8309_s14 + $0x28] sm:$0xff]  }
0x2060   :  { %v4394_v34 = vmul.f32 %v6350_v52, %v4366_v27  ;;  %5869 = vmatprep.subr.bf16.mxu1 %v6085_v37  ;;  %v6086_v27 = vld [vmem:[%s8309_s14 + $0x20] sm:$0xff]  }
0x2061   :  { %5870 = vmatpush3.bf16.msra.mxu1 %v6085_v37 }
0x2062   :  { %v4405_v14 = vpack.c.bf16 %v4394_v34, %v4393_v33  ;;  %5871 = vmatprep.subr.bf16.mxu1 %v6086_v27 }
0x2064   :  { %5862 = vmatmul.mubr.msk.bf16.vlgmr.msra.gmra.mxu0 %vm250_vm0, %v4405_v14 }
0x2065   :  { %5872 = vmatpush3.bf16.msra.mxu1 %v6086_v27 }
0x2124   :  { %v5863_v59 = vpop.f32.mrf.mxu0 }
0x2125   :  { %v8187_v11 = vadd.f32 %v5863_v59, %v7992_v21  ;;  %v4578_v59 = vrot.slane %v8071_v61, %v6929_v62  ;;  %v6088_v62 = vld [vmem:[%s8310_s15 + $0x70] sm:$0xff]  }
0x2126   :  { %v4470_v7 = vpop.f32.mrf.mxu0 }
0x2127   :  { %v8184_v57 = vadd.f32 %v4470_v7, %v7981_v63  ;;  %v4521_v42 = vsel %vm250_vm0, %v8187_v11, 0.0 }
0x2128   :  { %v5864_v47 = vpop.f32.mrf.mxu0 }
0x2129   :  { %v4515_v56 = vsel %vm250_vm0, %v8184_v57, 0.0  ;;  %v8195_v10 = vadd.f32 %v5864_v47, %v7984_v25 }
0x212a   :  { %4516 = vadd.xlane.f32.xlu0 %v4515_v56  ;;  %v4473_v44 = vpop.f32.mrf.mxu0 }
0x212b   :  { %v8192_v17 = vadd.f32 %v4473_v44, %v7989_v13  ;;  %v4524_v21 = vsel %vm250_vm0, %v8195_v10, 0.0 }
0x212d   :  { %v4518_v63 = vsel %vm250_vm0, %v8192_v17, 0.0 }
0x212e   :  { %4522 = vadd.xlane.f32.xlu0 %v4521_v42  ;;  %4519 = vadd.xlane.f32.xlu1 %v4518_v63 }
0x2132   :  { %4525 = vadd.xlane.f32.xlu1 %v4524_v21 }
0x21b3   :  { %v4517_v5 = vpop.xlane.xlu0 %4516 }
0x21b4   :  { %v4527_v16 = vmul.f32 0.015625, %v4517_v5 }
0x21b6   :  { %v4531_v13 = vsub.f32 %v8184_v57, %v4527_v16 }
0x21b7   :  { %v4523_v12 = vpop.xlane.xlu0 %4522  ;;  %v4520_v22 = vpop.xlane.xlu1 %4519 }
0x21b8   :  { %v4529_v25 = vmul.f32 0.015625, %v4523_v12  ;;  %v4528_v50 = vmul.f32 0.015625, %v4520_v22  ;;  %v4535_v1 = vmul.f32 %v4531_v13, %v4531_v13  ;;  %v6087_v12 = vld [vmem:[%s8310_s15 + $0x78] sm:$0xff]   ;;  %v6089_v22 = vld [vmem:[%s8310_s15 + $0x68] sm:$0xff]  }
0x21b9   :  { %5877 = vmatprep.subr.bf16.mxu0 %v6087_v12 }
0x21ba   :  { %v4533_v28 = vsub.f32 %v8187_v11, %v4529_v25  ;;  %v4532_v15 = vsub.f32 %v8192_v17, %v4528_v50  ;;  %v4539_v48 = vsel %vm250_vm0, %v4535_v1, 0.0  ;;  %5878 = vmatpush3.bf16.msra.mxu0 %v6087_v12  ;;  %v6090_v25 = vld [vmem:[%s8310_s15 + $0x60] sm:$0xff]   ;;  %v6091_v50 = vld [vmem:[%s8310_s15 + $0x58] sm:$0xff]   ;;  %v6092_v1 = vld [vmem:[%s8310_s15 + $0x50] sm:$0xff]  }
0x21bb   :  { %4540 = vadd.xlane.f32.xlu0 %v4539_v48  ;;  %v4526_v32 = vpop.xlane.xlu1 %4525  ;;  %5879 = vmatprep.subr.bf16.mxu0 %v6088_v62  ;;  %v6420_v48 = vld [vmem:[%s8316_s21 + $0x2] sm:$0x3] }
0x21bc   :  { %v4530_v60 = vmul.f32 0.015625, %v4526_v32  ;;  %v4537_v38 = vmul.f32 %v4533_v28, %v4533_v28  ;;  %v4536_v29 = vmul.f32 %v4532_v15, %v4532_v15  ;;  %v4588_v32 = vrot.slane %v6420_v48, %v6811_v51 }
0x21be   :  { %v4534_v24 = vsub.f32 %v8195_v10, %v4530_v60  ;;  %v4545_v55 = vsel %vm250_vm0, %v4537_v38, 0.0  ;;  %v4542_v58 = vsel %vm250_vm0, %v4536_v29, 0.0  ;;  %5880 = vmatpush3.bf16.msra.mxu0 %v6088_v62 }
0x21bf   :  { %4546 = vadd.xlane.f32.xlu0 %v4545_v55  ;;  %4543 = vadd.xlane.f32.xlu1 %v4542_v58 }
0x21c0   :  { %v4538_v36 = vmul.f32 %v4534_v24, %v4534_v24  ;;  %5881 = vmatprep.subr.bf16.mxu0 %v6089_v22 }
0x21c2   :  { %v4548_v3 = vsel %vm250_vm0, %v4538_v36, 0.0  ;;  %5882 = vmatpush3.bf16.msra.mxu0 %v6089_v22 }
0x21c3   :  { %4549 = vadd.xlane.f32.xlu1 %v4548_v3  ;;  %5883 = vmatprep.subr.bf16.mxu0 %v6090_v25 }
0x21c6   :  { %5884 = vmatpush3.bf16.msra.mxu0 %v6090_v25 }
0x21c7   :  { %5885 = vmatprep.subr.bf16.mxu0 %v6091_v50 }
0x21ca   :  { %5886 = vmatpush3.bf16.msra.mxu0 %v6091_v50 }
0x21cb   :  { %5887 = vmatprep.subr.bf16.mxu0 %v6092_v1 }
0x21ce   :  { %5888 = vmatpush3.bf16.msra.mxu0 %v6092_v1 }
0x2244   :  { %v4541_v4 = vpop.xlane.xlu0 %4540 }
0x2245   :  { %v4551_v30 = vmul.f32 0.015625, %v4541_v4 }
0x2247   :  { %v4555_v23 = vadd.f32 1e-05, %v4551_v30 }
0x2248   :  { %v4547_v40 = vpop.xlane.xlu0 %4546  ;;  %v4544_v41 = vpop.xlane.xlu1 %4543 }
0x2249   :  { %6351 = vrsqrt.f32 %v4555_v23  ;;  %v4553_v2 = vmul.f32 0.015625, %v4547_v40  ;;  %v4552_v35 = vmul.f32 0.015625, %v4544_v41 }
0x224b   :  { %v4557_v0 = vadd.f32 1e-05, %v4553_v2  ;;  %v4556_v26 = vadd.f32 1e-05, %v4552_v35 }
0x224c   :  { %v4550_v39 = vpop.xlane.xlu1 %4549 }
0x224d   :  { %6353 = vrsqrt.f32 %v4557_v0  ;;  %v4554_v43 = vmul.f32 0.015625, %v4550_v39 }
0x224e   :  { %6355 = vrsqrt.f32 %v4556_v26 }
0x224f   :  { %v4558_v19 = vadd.f32 1e-05, %v4554_v43 }
0x2251   :  { %6357 = vrsqrt.f32 %v4558_v19 }
0x2256   :  { %v6352_v31 = vpop.eup %6351 }
0x2257   :  { %v4563_v18 = vmul.f32 %v6352_v31, %v4531_v13 }
0x2259   :  { %v4571_v14 = vmul.f32 %v4570_v20, %v4563_v18 }
0x225a   :  { %v6354_v45 = vpop.eup %6353 }
0x225b   :  { %v6356_v52 = vpop.eup %6355  ;;  %v4565_v33 = vmul.f32 %v6354_v45, %v4533_v28  ;;  %v4579_v42 = vadd.f32 %v4578_v59, %v4571_v14  ;;  %v6093_v28 = vld [vmem:[%s8310_s15 + $0x48] sm:$0xff]  }
0x225c   :  { %v4564_v34 = vmul.f32 %v6356_v52, %v4532_v15  ;;  %5889 = vmatprep.subr.bf16.mxu0 %v6093_v28  ;;  %v6094_v15 = vld [vmem:[%s8310_s15 + $0x40] sm:$0xff]   ;;  %s6611_s15 = smov [#allocation14]  }
0x225d   :  { %v4573_v44 = vmul.f32 %v4570_v20, %v4565_v33  ;;  %5890 = vmatpush3.bf16.msra.mxu0 %v6093_v28  ;;  %s4952_s21 = sshll.u32 %s6611_s15, 4  ;;  %s4953_s21 = int_to_ptr.vmem [resolvable:$true] %s4952_s21 }
0x225e   :  { %v6358_v7 = vpop.eup %6357  ;;  %v4572_v47 = vmul.f32 %v4570_v20, %v4564_v34  ;;  %5891 = vmatprep.subr.bf16.mxu0 %v6094_v15  ;;  %v4701_v34 = vrot.slane %v8071_v61, %v6935_v8  ;;  %s6561_s19 = scalar_lea.vmem %s4953_s21, 512  ;;  %p6566_p8 = scmp.lt.s32.totalorder %s4953_s21, %s4953_s21 }
0x225f   :  { %v4566_v56 = vmul.f32 %v6358_v7, %v4534_v24  ;;  %v4581_v16 = vadd.f32 %v4578_v59, %v4573_v44  ;;  %p6562_p7 = scmp.ne.s32.totalorder %s4953_s21, %s6561_s19  ;;  %p6567_p9 = scmp.lt.s32.totalorder %s6561_s19, %s6561_s19 }
0x2260   :  { %v4580_v63 = vadd.f32 %v4578_v59, %v4572_v47 }
0x2261   :  { %v4574_v21 = vmul.f32 %v4570_v20, %v4566_v56  ;;  %5892 = vmatpush3.bf16.msra.mxu0 %v6094_v15  ;;  %p6568_p10 = por %p6567_p9, %p6566_p8 }
0x2262   :  { %v4583_v5 = vpack.c.bf16 %v4580_v63, %v4579_v42 }
0x2263   :  { %v4582_v13 = vadd.f32 %v4578_v59, %v4574_v21  ;;  %p6569_p11 = pnand %p6568_p10, %p6562_p7 }
0x2264   :  { %5873 = vmatprep.mubr.msk.bf16.mxu1 %vm250_vm0, %v4583_v5 }
0x2265   :  { %v4584_v53 = vpack.c.bf16 %v4582_v13, %v4581_v16 }
0x2267   :  { %5874 = vmatmul.mubr.msk.bf16.vlgmr.msra.gmra.mxu1 %vm250_vm0, %v4584_v53 }
0x2327   :  { %v5875_v60 = vpop.f32.mrf.mxu1 }
0x2328   :  { %v4662_v38 = vadd.f32 %v5875_v60, %v4588_v32 }
0x2329   :  { %v4653_v29 = vpop.f32.mrf.mxu1 }
0x232a   :  { %v5275_v24 = vmul.f32 -1.442695, %v4662_v38  ;;  %v4654_v55 = vadd.f32 %v4653_v29, %v4588_v32 }
0x232b   :  { %v5876_v58 = vpop.f32.mrf.mxu1 }
0x232c   :  { %v5273_v36 = vmul.f32 -1.442695, %v4654_v55  ;;  %v4665_v3 = vadd.f32 %v5876_v58, %v4588_v32  ;;  %6359 = vpow2.f32 %v5275_v24 }
0x232d   :  { %v4656_v6 = vpop.f32.mrf.mxu1 }
0x232e   :  { %6361 = vpow2.f32 %v5273_v36  ;;  %v5276_v9 = vmul.f32 -1.442695, %v4665_v3  ;;  %v4657_v37 = vadd.f32 %v4656_v6, %v4588_v32 }
0x2330   :  { %6363 = vpow2.f32 %v5276_v9  ;;  %v5274_v27 = vmul.f32 -1.442695, %v4657_v37 }
0x2332   :  { %6365 = vpow2.f32 %v5274_v27 }
0x2339   :  { %v6360_v4 = vpop.eup %6359 }
0x233a   :  { %v4682_v41 = vadd.f32 1.0, %v6360_v4 }
0x233b   :  { %v6362_v30 = vpop.eup %6361 }
0x233c   :  { %v4680_v23 = vadd.f32 1.0, %v6362_v30 }
0x233d   :  { %v6364_v40 = vpop.eup %6363 }
0x233e   :  { %v4683_v2 = vadd.f32 1.0, %v6364_v40  ;;  %6367 = vrcp.f32 %v4680_v23 }
0x233f   :  { %v6366_v35 = vpop.eup %6365 }
0x2340   :  { %6369 = vrcp.f32 %v4683_v2  ;;  %v4681_v0 = vadd.f32 1.0, %v6366_v35 }
0x2341   :  { %6371 = vrcp.f32 %v4682_v41 }
0x2342   :  { %6373 = vrcp.f32 %v4681_v0 }
0x234b   :  { %v6368_v26 = vpop.eup %6367 }
0x234c   :  { %v4692_v18 = vmul.f32 %v6368_v26, %v4654_v55 }
0x234d   :  { %v6370_v39 = vpop.eup %6369 }
0x234e   :  { %v6372_v43 = vpop.eup %6371  ;;  %v4695_v31 = vmul.f32 %v6370_v39, %v4665_v3 }
0x234f   :  { %v6374_v19 = vpop.eup %6373  ;;  %v4694_v45 = vmul.f32 %v6372_v43, %v4662_v38 }
0x2350   :  { %v4693_v20 = vmul.f32 %v6374_v19, %v4657_v37 }
0x2351   :  { %v4697_v33 = vpack.c.bf16 %v4695_v31, %v4694_v45  ;;  %v4862_v31 = vrot.slane %v8071_v61, %v7222_v54  ;;  %v4870_v45 = vrot.slane %v8071_v61, %v7312_v49 }
0x2352   :  { %v4696_v52 = vpack.c.bf16 %v4693_v20, %v4692_v18 }
0x2354   :  { %5893 = vmatprep.mubr.bf16.mxu0 %v4696_v52 }
0x2355   :  { %5894 = vmatmul.mubr.bf16.vlgmr.msra.gmra.mxu0 %v4697_v33 }
0x2415   :  { %v5895_v14 = vpop.f32.mrf.mxu0 }
0x2416   :  { %v4793_v59 = vadd.f32 %v5895_v14, %v4701_v34 }
0x2417   :  { %v4784_v7 = vpop.f32.mrf.mxu0 }
0x2418   :  { %v4785_v47 = vadd.f32 %v4784_v7, %v4701_v34  ;;  %v4801_v44 = vmul.f32 0.5, %v4793_v59 }
0x2419   :  { %v5896_v56 = vpop.f32.mrf.mxu0 }
0x241a   :  { %v4799_v42 = vmul.f32 0.5, %v4785_v47  ;;  %v4796_v63 = vadd.f32 %v5896_v56, %v4701_v34  ;;  %v4805_v13 = vadd.f32 %v4801_v44, %v8187_v11 }
0x241b   :  { %v4787_v21 = vpop.f32.mrf.mxu0 }
0x241c   :  { %v4803_v5 = vadd.f32 %v4799_v42, %v8184_v57  ;;  %v4788_v16 = vadd.f32 %v4787_v21, %v4701_v34  ;;  %v4802_v53 = vmul.f32 0.5, %v4796_v63  ;;  %v4813_v50 = vsel %vm250_vm0, %v4805_v13, 0.0 }
0x241e   :  { %v4800_v12 = vmul.f32 0.5, %v4788_v16  ;;  %v4807_v62 = vsel %vm250_vm0, %v4803_v5, 0.0  ;;  %v4806_v22 = vadd.f32 %v4802_v53, %v8195_v10 }
0x241f   :  { %4808 = vadd.xlane.f32.xlu0 %v4807_v62 }
0x2420   :  { %v4804_v8 = vadd.f32 %v4800_v12, %v8192_v17  ;;  %v4816_v57 = vsel %vm250_vm0, %v4806_v22, 0.0 }
0x2422   :  { %v4810_v25 = vsel %vm250_vm0, %v4804_v8, 0.0 }
0x2423   :  { %4811 = vadd.xlane.f32.xlu1 %v4810_v25  ;;  %4814 = vadd.xlane.f32.xlu0 %v4813_v50 }
0x2427   :  { %4817 = vadd.xlane.f32.xlu1 %v4816_v57 }
0x24a8   :  { %v4809_v1 = vpop.xlane.xlu0 %4808 }
0x24a9   :  { %v4819_v11 = vmul.f32 0.015625, %v4809_v1 }
0x24ab   :  { %v4823_v28 = vsub.f32 %v4803_v5, %v4819_v11 }
0x24ac   :  { %v4812_v15 = vpop.xlane.xlu1 %4811  ;;  %v4815_v48 = vpop.xlane.xlu0 %4814 }
0x24ad   :  { %v4820_v32 = vmul.f32 0.015625, %v4812_v15  ;;  %v4821_v60 = vmul.f32 0.015625, %v4815_v48  ;;  %v4827_v38 = vmul.f32 %v4823_v28, %v4823_v28 }
0x24af   :  { %v4824_v17 = vsub.f32 %v4804_v8, %v4820_v32  ;;  %v4825_v29 = vsub.f32 %v4805_v13, %v4821_v60  ;;  %v4831_v10 = vsel %vm250_vm0, %v4827_v38, 0.0 }
0x24b0   :  { %v4818_v24 = vpop.xlane.xlu1 %4817  ;;  %4832 = vadd.xlane.f32.xlu0 %v4831_v10 }
0x24b1   :  { %v4822_v55 = vmul.f32 0.015625, %v4818_v24  ;;  %v4828_v58 = vmul.f32 %v4824_v17, %v4824_v17  ;;  %v4829_v36 = vmul.f32 %v4825_v29, %v4825_v29 }
0x24b3   :  { %v4826_v3 = vsub.f32 %v4806_v22, %v4822_v55  ;;  %v4834_v6 = vsel %vm250_vm0, %v4828_v58, 0.0  ;;  %v4837_v9 = vsel %vm250_vm0, %v4829_v36, 0.0 }
0x24b4   :  { %4835 = vadd.xlane.f32.xlu1 %v4834_v6  ;;  %4838 = vadd.xlane.f32.xlu0 %v4837_v9 }
0x24b5   :  { %v4830_v37 = vmul.f32 %v4826_v3, %v4826_v3 }
0x24b7   :  { %v4840_v27 = vsel %vm250_vm0, %v4830_v37, 0.0 }
0x24b8   :  { %4841 = vadd.xlane.f32.xlu1 %v4840_v27 }
0x2539   :  { %v4833_v4 = vpop.xlane.xlu0 %4832 }
0x253a   :  { %v4843_v30 = vmul.f32 0.015625, %v4833_v4 }
0x253c   :  { %v4847_v23 = vadd.f32 1e-05, %v4843_v30 }
0x253d   :  { %v4836_v40 = vpop.xlane.xlu1 %4835  ;;  %v4839_v41 = vpop.xlane.xlu0 %4838 }
0x253e   :  { %6375 = vrsqrt.f32 %v4847_v23  ;;  %v4844_v2 = vmul.f32 0.015625, %v4836_v40  ;;  %v4845_v35 = vmul.f32 0.015625, %v4839_v41  ;;  %v218_v41 = vld [vmem:[#allocation11] sm:$0x3] }
0x2540   :  { %v4848_v0 = vadd.f32 1e-05, %v4844_v2  ;;  %v4849_v26 = vadd.f32 1e-05, %v4845_v35  ;;  %v4930_v2 = vrot.slane %v218_v41, %v6801_v46 }
0x2541   :  { %v4842_v39 = vpop.xlane.xlu1 %4841 }
0x2542   :  { %6377 = vrsqrt.f32 %v4848_v0  ;;  %v4846_v43 = vmul.f32 0.015625, %v4842_v39 }
0x2543   :  { %6379 = vrsqrt.f32 %v4849_v26  ;;  %v4938_v26 = vrot.slane %v218_v41, %v6811_v51 }
0x2544   :  { %v4850_v19 = vadd.f32 1e-05, %v4846_v43 }
0x2546   :  { %6381 = vrsqrt.f32 %v4850_v19 }
0x254b   :  { %v6376_v18 = vpop.eup %6375 }
0x254c   :  { %v4855_v20 = vmul.f32 %v6376_v18, %v4823_v28 }
0x254e   :  { %v4863_v52 = vmul.f32 %v4862_v31, %v4855_v20 }
0x254f   :  { %v6378_v33 = vpop.eup %6377 }
0x2550   :  { %v6380_v34 = vpop.eup %6379  ;;  %v4871_v14 = vadd.f32 %v4870_v45, %v4863_v52  ;;  %v4856_v59 = vmul.f32 %v6378_v33, %v4824_v17 }
0x2551   :  { %v4857_v7 = vmul.f32 %v6380_v34, %v4825_v29 }
0x2552   :  { %v4875_v47 = vsel %vm250_vm0, %v4871_v14, 0.0  ;;  %v4864_v56 = vmul.f32 %v4862_v31, %v4856_v59 }
0x2553   :  { %v6382_v44 = vpop.eup %6381  ;;  %4876 = vadd.xlane.f32.xlu0 %v4875_v47  ;;  %v4865_v42 = vmul.f32 %v4862_v31, %v4857_v7 }
0x2554   :  { %v4872_v63 = vadd.f32 %v4870_v45, %v4864_v56  ;;  %v4858_v21 = vmul.f32 %v6382_v44, %v4826_v3 }
0x2555   :  { %v4873_v54 = vadd.f32 %v4870_v45, %v4865_v42 }
0x2556   :  { %v4878_v5 = vsel %vm250_vm0, %v4872_v63, 0.0  ;;  %v4866_v16 = vmul.f32 %v4862_v31, %v4858_v21 }
0x2557   :  { %4879 = vadd.xlane.f32.xlu1 %v4878_v5  ;;  %v4881_v49 = vsel %vm250_vm0, %v4873_v54, 0.0 }
0x2558   :  { %4882 = vadd.xlane.f32.xlu0 %v4881_v49  ;;  %v4874_v61 = vadd.f32 %v4870_v45, %v4866_v16 }
0x255a   :  { %v4884_v13 = vsel %vm250_vm0, %v4874_v61, 0.0 }
0x255b   :  { %4885 = vadd.xlane.f32.xlu1 %v4884_v13 }
0x25dc   :  { %v4877_v53 = vpop.xlane.xlu0 %4876 }
0x25dd   :  { %v4887_v12 = vmul.f32 0.015625, %v4877_v53 }
0x25df   :  { %v4891_v62 = vsub.f32 %v4871_v14, %v4887_v12 }
0x25e0   :  { %v4880_v8 = vpop.xlane.xlu1 %4879 }
0x25e1   :  { %v4888_v22 = vmul.f32 0.015625, %v4880_v8  ;;  %v4883_v25 = vpop.xlane.xlu0 %4882  ;;  %v4895_v50 = vmul.f32 %v4891_v62, %v4891_v62 }
0x25e2   :  { %v4889_v57 = vmul.f32 0.015625, %v4883_v25 }
0x25e3   :  { %v4892_v1 = vsub.f32 %v4872_v63, %v4888_v22  ;;  %v4899_v11 = vsel %vm250_vm0, %v4895_v50, 0.0 }
0x25e4   :  { %v4893_v28 = vsub.f32 %v4873_v54, %v4889_v57  ;;  %v4886_v15 = vpop.xlane.xlu1 %4885  ;;  %4900 = vadd.xlane.f32.xlu0 %v4899_v11 }
0x25e5   :  { %v4890_v48 = vmul.f32 0.015625, %v4886_v15  ;;  %v4896_v32 = vmul.f32 %v4892_v1, %v4892_v1 }
0x25e6   :  { %v4897_v60 = vmul.f32 %v4893_v28, %v4893_v28 }
0x25e7   :  { %v4894_v38 = vsub.f32 %v4874_v61, %v4890_v48  ;;  %v4902_v17 = vsel %vm250_vm0, %v4896_v32, 0.0 }
0x25e8   :  { %4903 = vadd.xlane.f32.xlu1 %v4902_v17  ;;  %v4905_v29 = vsel %vm250_vm0, %v4897_v60, 0.0 }
0x25e9   :  { %4906 = vadd.xlane.f32.xlu0 %v4905_v29  ;;  %v4898_v10 = vmul.f32 %v4894_v38, %v4894_v38 }
0x25eb   :  { %v4908_v24 = vsel %vm250_vm0, %v4898_v10, 0.0 }
0x25ec   :  { %4909 = vadd.xlane.f32.xlu1 %v4908_v24 }
0x266d   :  { %v4901_v55 = vpop.xlane.xlu0 %4900 }
0x266e   :  { %v4911_v58 = vmul.f32 0.015625, %v4901_v55 }
0x2670   :  { %v4915_v36 = vadd.f32 1e-05, %v4911_v58 }
0x2671   :  { %v4904_v3 = vpop.xlane.xlu1 %4903 }
0x2672   :  { %6383 = vrsqrt.f32 %v4915_v36  ;;  %v4912_v6 = vmul.f32 0.015625, %v4904_v3  ;;  %v4907_v9 = vpop.xlane.xlu0 %4906 }
0x2673   :  { %v4913_v37 = vmul.f32 0.015625, %v4907_v9 }
0x2674   :  { %v4916_v27 = vadd.f32 1e-05, %v4912_v6 }
0x2675   :  { %v4917_v4 = vadd.f32 1e-05, %v4913_v37  ;;  %v4910_v30 = vpop.xlane.xlu1 %4909 }
0x2676   :  { %6385 = vrsqrt.f32 %v4916_v27  ;;  %v4914_v23 = vmul.f32 0.015625, %v4910_v30 }
0x2677   :  { %6387 = vrsqrt.f32 %v4917_v4 }
0x2678   :  { %v4918_v40 = vadd.f32 1e-05, %v4914_v23 }
0x267a   :  { %6389 = vrsqrt.f32 %v4918_v40 }
0x267f   :  { %v6384_v35 = vpop.eup %6383 }
0x2680   :  { %v4923_v0 = vmul.f32 %v6384_v35, %v4891_v62 }
0x2682   :  { %v4931_v39 = vmul.f32 %v4930_v2, %v4923_v0 }
0x2683   :  { %v6386_v43 = vpop.eup %6385 }
0x2684   :  { %v6388_v19 = vpop.eup %6387  ;;  %v4924_v31 = vmul.f32 %v6386_v43, %v4892_v1  ;;  %v4939_v18 = vadd.f32 %v4938_v26, %v4931_v39 }
0x2685   :  { %v4925_v20 = vmul.f32 %v6388_v19, %v4893_v28 }
0x2686   :  { %v4932_v45 = vmul.f32 %v4930_v2, %v4924_v31  ;;  %4943 = vst.msk [vmem:[#allocation14] sm:$0xff] %vm250_vm0, %v4939_v18 }
0x2687   :  { %v6390_v52 = vpop.eup %6389  ;;  %v4933_v33 = vmul.f32 %v4930_v2, %v4925_v20 }
0x2688   :  { %v4926_v34 = vmul.f32 %v6390_v52, %v4894_v38  ;;  %v4940_v14 = vadd.f32 %v4938_v26, %v4932_v45 }
0x2689   :  { %v4941_v59 = vadd.f32 %v4938_v26, %v4933_v33 }
0x268a   :  { %v4934_v46 = vmul.f32 %v4930_v2, %v4926_v34  ;;  %4944 = vst.msk [vmem:[#allocation14 + $0x8] sm:$0xff] %vm250_vm0, %v4940_v14 }
0x268b   :  { %4945 = vst.msk [vmem:[#allocation14 + $0x10] sm:$0xff] %vm250_vm0, %v4941_v59 }
0x268c   :  { %v4942_v51 = vadd.f32 %v4938_v26, %v4934_v46 }
0x268e   :  { %4946 = vst.msk [vmem:[#allocation14 + $0x18] sm:$0xff] %vm250_vm0, %v4942_v51 }
0x268f   :  { %6572 = shalt.err (!%p6569_p11)
}
0x2690   :  { %4958 = dma.vmem_to_hbm [thread:$0]  %s4953_s21, 512, %s8317_s22, [#allocation4], %s6593_s0, %s6593_s0, %s6594_s23  }
0x2691   :  { %6589 = dma.done.wait [#allocation4], 512  }
0x2692   :  { %6590 = vsyncadd [#allocation4], 4294966784 }
0x2693   :  { %4962 = vsyncpa [#allocation3], 1 }
0x2694   :  { %4963 = vsyncpa [#allocation6], 1 }
0x2695   :  { %4964 = vsyncpa [#allocation9], 1 }
0x2696   :  { %4965 = vsyncpa [#allocation12], 1 }
0x2697   :  { %4966 = vsyncpa [#allocation4], 1 }

</bundles_post_ra>
